<compile_context>
chip_gen: v7x
topology: tpu7x:2x2x1
jax: 0.10.0
libtpu: 0.0.40
codegen_flags: <defaults>
</compile_context>

<pallas_src>
import functools
import math

import jax
import jax.numpy as jnp
from jax.experimental import pallas as pl
from jax.experimental.pallas import tpu as pltpu


# ----------------------- generation-aware VMEM budgets ---------------------- #

def _vmem_capacity_bytes():
    try:
        return int(pltpu.get_tpu_info().vmem_capacity_bytes)
    except Exception:
        return 64 * 1024 * 1024            # conservative (v7x-sized) fallback


_VMEM_CAP = _vmem_capacity_bytes()
if _VMEM_CAP >= 100 * 1024 * 1024:         # v5e / v6e: 128 MiB VMEM parts
    _VMEM_LIMIT = 96 * 1024 * 1024
    _MM_TILE_BUDGET = 64 * 1024 * 1024
    _CONV_BLOCK_BUDGET = 40 * 1024 * 1024
else:                                      # v7x: 64 MiB VMEM per TensorCore
    _VMEM_LIMIT = 32 * 1024 * 1024
    _MM_TILE_BUDGET = 24 * 1024 * 1024
    _CONV_BLOCK_BUDGET = 16 * 1024 * 1024


# --------------------------- fused matmul kernels --------------------------- #

def _mm_kernel(a_ref, w_ref, b_ref, o_ref, *, relu):
    """Single-pass fused matmul + bias (+ ReLU); full K per block."""
    r = jnp.dot(a_ref[...], w_ref[...], preferred_element_type=jnp.float32)
    r = r + b_ref[...]                      # (tm, tn) + (1, tn), f32
    if relu:
        r = jnp.maximum(r, 0.0)
    o_ref[...] = r.astype(o_ref.dtype)


def _mm_acc_kernel(a_ref, w_ref, b_ref, o_ref, acc_ref, *, relu):
    """K-tiled fused matmul + bias (+ ReLU) with f32 accumulator scratch."""
    k = pl.program_id(2)

    @pl.when(k == 0)
    def _():
        acc_ref[...] = jnp.zeros_like(acc_ref)

    acc_ref[...] += jnp.dot(a_ref[...], w_ref[...],
                            preferred_element_type=jnp.float32)

    @pl.when(k == pl.num_programs(2) - 1)
    def _():
        r = acc_ref[...] + b_ref[...]
        if relu:
            r = jnp.maximum(r, 0.0)
        o_ref[...] = r.astype(o_ref.dtype)


def matmul_bias(a, w, b, *, relu, out_dtype=jnp.bfloat16):
    """Fused (a @ w + b) [+ ReLU].  a:(M,K), w:(K,N), b:(N,).  bf16 MXU, f32 acc."""
    M, K = a.shape
    K2, N = w.shape
    assert K == K2 and b.shape == (N,)

    a = a.astype(jnp.bfloat16)
    w = w.astype(jnp.bfloat16)
    b2 = b.astype(jnp.float32).reshape(1, N)

    # Lane-align the contraction dim (only conv1_1's K=27 triggers this).
    if K % 128 != 0:
        kp = ((K + 127) // 128) * 128
        a = jnp.pad(a, ((0, 0), (0, kp - K)))
        w = jnp.pad(w, ((0, kp - K), (0, 0)))
        K = kp

    # ---------------- tile selection (bf16 operands) -----------------------
    tn = N if (N % 128 != 0 or N <= 512) else 512       # tn always divides N
    tk = 128
    for c in (K, 4096, 3584, 2048, 1024, 512, 256, 128):
        if K % c == 0 and 2 * c * tn * 2 <= 12 * 1024 * 1024:
            tk = c
            break
    kt = K // tk

    out_isz = jnp.dtype(out_dtype).itemsize
    fixed = 2 * tk * tn * 2 + 2 * tn * 4                # dbl-buf weight + bias
    per_row = 2 * tk * 2 + 2 * tn * out_isz + (tn * 4 if kt > 1 else 0)

    # No M padding: ragged edge m-blocks are masked by Pallas.
    if M <= 8:
        tm = M
    else:
        tm = 8
        cands = ((M,) if (M <= 2048 and M % 8 == 0) else ()) + \
                (2048, 1024, 512, 256, 128, 64, 32, 16, 8)
        for c in cands:
            if c <= M and fixed + c * per_row <= _MM_TILE_BUDGET:
                tm = c
                break
    mt = pl.cdiv(M, tm)
    nt = N // tn

    cparams = pltpu.CompilerParams(
        dimension_semantics=(("parallel", "parallel") if kt == 1
                             else ("parallel", "parallel", "arbitrary")),
        vmem_limit_bytes=_VMEM_LIMIT)

    if kt == 1:
        out = pl.pallas_call(
            functools.partial(_mm_kernel, relu=relu),
            out_shape=jax.ShapeDtypeStruct((M, N), out_dtype),
            grid=(mt, nt),
            in_specs=[
                pl.BlockSpec((tm, tk), lambda i, j: (i, 0)),
                pl.BlockSpec((tk, tn), lambda i, j: (0, j)),
                pl.BlockSpec((1, tn), lambda i, j: (0, j)),
            ],
            out_specs=pl.BlockSpec((tm, tn), lambda i, j: (i, j)),
            compiler_params=cparams,
        )(a, w, b2)
    else:
        out = pl.pallas_call(
            functools.partial(_mm_acc_kernel, relu=relu),
            out_shape=jax.ShapeDtypeStruct((M, N), out_dtype),
            grid=(mt, nt, kt),
            in_specs=[
                pl.BlockSpec((tm, tk), lambda i, j, k: (i, k)),
                pl.BlockSpec((tk, tn), lambda i, j, k: (k, j)),
                pl.BlockSpec((1, tn), lambda i, j, k: (0, j)),
            ],
            out_specs=pl.BlockSpec((tm, tn), lambda i, j, k: (i, j)),
            scratch_shapes=[pltpu.VMEM((tm, tn), jnp.float32)],
            compiler_params=cparams,
        )(a, w, b2)

    return out


# ------------------- fused 3x3 conv (no im2col in HBM) ---------------------- #

def _conv3x3_kernel(xpad_hbm, w_ref, b_ref, o_ref, xbuf, sem, acc_ref, *,
                    R, W, Cin, Cout, HP, blocks_per_img):
    """One grid step: R output rows (R*W pixels) of a 3x3 / pad=1 conv + ReLU.

    xpad_hbm : (N*(H+2), W+2, Cin) zero-padded input, left in HBM (pl.ANY).
    w_ref    : (3, 3, Cin, Cout)   bf16 weights (whole, resident in VMEM).
    b_ref    : (1, Cout)           f32 bias.
    o_ref    : (R*W, Cout)         bf16 output block.
    xbuf     : (2*(R+2), W+2, Cin) manually double-buffered input window.
    """
    idx = pl.program_id(0)
    nsteps = pl.num_programs(0)

    def copy_for(step, slot):
        n = step // blocks_per_img
        i = step - n * blocks_per_img
        row0 = n * HP + i * R
        return pltpu.make_async_copy(
            xpad_hbm.at[pl.ds(row0, R + 2)],
            xbuf.at[pl.ds(slot * (R + 2), R + 2)],
            sem.at[slot])

    # Prime the pipeline on the very first grid step.
    @pl.when(idx == 0)
    def _():
        copy_for(0, 0).start()

    slot = idx % 2
    copy_for(idx, slot).wait()

    # Prefetch the next window while computing on the current one.
    @pl.when(idx + 1 < nsteps)
    def _():
        copy_for(idx + 1, 1 - slot).start()

    base = slot * (R + 2)
    for t in range(9):
        dy, dx = divmod(t, 3)
        a = xbuf[pl.ds(base + dy, R), pl.ds(dx, W), :]      # (R, W, Cin)
        a = a.reshape(R * W, Cin)
        p = jnp.dot(a, w_ref[dy, dx], preferred_element_type=jnp.float32)
        if t == 0:
            acc_ref[...] = p
        else:
            acc_ref[...] += p

    r = acc_ref[...] + b_ref[...]
    o_ref[...] = jnp.maximum(r, 0.0).astype(o_ref.dtype)


def _pick_conv_rows(N, H, W, Cin, Cout):
    """Largest R (R | H) whose per-block working set fits the VMEM budget."""
    for R in range(H, 0, -1):
        if H % R:
            continue
        if (R * W) % 8 != 0 and not (N == 1 and R == H):
            continue                       # out block must be 8-aligned / full
        xbuf = 2 * (R + 2) * (W + 2) * Cin * 2
        acc = R * W * Cout * 4
        outb = 2 * R * W * Cout * 2
        temp = 2 * R * W * Cin * 2
        wbytes = 2 * 9 * Cin * Cout * 2
        if xbuf + acc + outb + temp + wbytes + (1 << 20) <= _CONV_BLOCK_BUDGET:
            return R
    return None


@functools.lru_cache(maxsize=None)
def _fused_conv_call(N, H, W, Cin, Cout, R):
    HP = H + 2
    blocks_per_img = H // R
    nsteps = N * blocks_per_img
    kernel = functools.partial(_conv3x3_kernel, R=R, W=W, Cin=Cin, Cout=Cout,
                               HP=HP, blocks_per_img=blocks_per_img)
    call = pl.pallas_call(
        kernel,
        out_shape=jax.ShapeDtypeStruct((N * H * W, Cout), jnp.bfloat16),
        grid=(nsteps,),
        in_specs=[
            pl.BlockSpec(memory_space=pl.ANY),                        # padded x
            pl.BlockSpec((3, 3, Cin, Cout), lambda i: (0, 0, 0, 0)),  # weights
            pl.BlockSpec((1, Cout), lambda i: (0, 0)),                # bias
        ],
        out_specs=pl.BlockSpec((R * W, Cout), lambda i: (i, 0)),
        scratch_shapes=[
            pltpu.VMEM((2 * (R + 2), W + 2, Cin), jnp.bfloat16),
            pltpu.SemaphoreType.DMA((2,)),
            pltpu.VMEM((R * W, Cout), jnp.float32),
        ],
        compiler_params=pltpu.CompilerParams(
            dimension_semantics=("arbitrary",),
            vmem_limit_bytes=_VMEM_LIMIT),
    )
    return jax.jit(call)


_FUSED_CONV_DISABLED = set()


def _im2col_3x3(x):
    """x: (N,H,W,C) bf16 -> (N*H*W, 9*C), per-row ordering (kh, kw, cin)."""
    N, H, W, C = x.shape
    xp = jnp.pad(x, ((0, 0), (1, 1), (1, 1), (0, 0)))
    cols = [xp[:, dy:dy + H, dx:dx + W, :]
            for dy in range(3) for dx in range(3)]
    return jnp.concatenate(cols, axis=-1).reshape(N * H * W, 9 * C)


def conv3x3_relu(x, entry):
    """3x3 conv, pad=1, stride=1, + ReLU on NHWC bf16 activations."""
    N, H, W, Cin = x.shape
    wmat = entry["wmat"]
    b = entry["b"]
    Cout = int(wmat.shape[1])

    key = (N, H, W, Cin, Cout)
    if "w4" in entry and Cin >= 64 and key not in _FUSED_CONV_DISABLED:
        R = _pick_conv_rows(N, H, W, Cin, Cout)
        if R is not None:
            try:
                xp = jnp.pad(x.astype(jnp.bfloat16),
                             ((0, 0), (1, 1), (1, 1), (0, 0)))
                xp = xp.reshape(N * (H + 2), W + 2, Cin)
                y = _fused_conv_call(N, H, W, Cin, Cout, R)(
                    xp, entry["w4"], b.reshape(1, Cout))
                return y.reshape(N, H, W, Cout)
            except Exception:
                # Known-good fallback (previous im2col + matmul path).
                _FUSED_CONV_DISABLED.add(key)

    a = _im2col_3x3(x.astype(jnp.bfloat16))
    y = matmul_bias(a, wmat, b, relu=True, out_dtype=jnp.bfloat16)
    return y.reshape(N, H, W, Cout)


# ------------------------------- 2x2 max pool ------------------------------- #

def _maxpool_kernel(x_ref, o_ref):
    x = x_ref[...]                                  # (tr, 2, W, C)
    v = jnp.maximum(x[:, 0], x[:, 1])               # vertical max  -> (tr, W, C)
    tr, W, C = v.shape
    v = v.reshape(tr, W // 2, 2, C)
    o_ref[...] = jnp.max(v, axis=2)                 # horizontal max -> (tr, Wo, C)


def maxpool2x2(x):
    """2x2 max pool, stride 2.  x: (N, H, W, C) -> (N, H//2, W//2, C)."""
    N, H, W, C = x.shape
    Ho, Wo = H // 2, W // 2
    xr = x.reshape(N * Ho, 2, W, C)

    tr = 1                                          # output rows per grid step
    for c in (56, 32, 28, 16, 14, 8, 7, 4, 2, 1):
        if Ho % c == 0 and c * 2 * W * C * x.dtype.itemsize <= 16 * 1024 * 1024:
            tr = c
            break

    out = pl.pallas_call(
        _maxpool_kernel,
        out_shape=jax.ShapeDtypeStruct((N * Ho, Wo, C), x.dtype),
        grid=((N * Ho) // tr,),
        in_specs=[pl.BlockSpec((tr, 2, W, C), lambda i: (i, 0, 0, 0))],
        out_specs=pl.BlockSpec((tr, Wo, C), lambda i: (i, 0, 0)),
        compiler_params=pltpu.CompilerParams(
            dimension_semantics=("parallel",),
            vmem_limit_bytes=_VMEM_LIMIT),
    )(xr)
    return out.reshape(N, Ho, Wo, C)


# ------------------------------ params / glue ------------------------------- #

def _init_conv(key, co, ci, k):
    wk, bk = jax.random.split(key)
    fan_in = ci * k * k
    w = jax.random.normal(wk, (co, ci, k, k), jnp.float32) * math.sqrt(2.0 / fan_in)
    bound = 1.0 / math.sqrt(fan_in)
    b = jax.random.uniform(bk, (co,), jnp.float32, -bound, bound)
    return w, b


def init_vgg16_params(num_classes=100, seed=0):
    cfg = [
        ("conv1_1", 64, 3, 3), ("conv1_2", 64, 64, 3),
        ("conv2_1", 128, 64, 3), ("conv2_2", 128, 128, 3),
        ("conv3_1", 256, 128, 3), ("conv3_2", 256, 256, 3), ("conv3_3", 256, 256, 3),
        ("conv4_1", 512, 256, 3), ("conv4_2", 512, 512, 3), ("conv4_3", 512, 512, 3),
        ("conv5_1", 512, 512, 3), ("conv5_2", 512, 512, 3), ("conv5_3", 512, 512, 3),
        ("fc6", 4096, 512, 7), ("fc7", 4096, 4096, 1), ("fc8", num_classes, 4096, 1),
    ]
    keys = jax.random.split(jax.random.PRNGKey(seed), len(cfg))
    return {name: _init_conv(k, co, ci, ks)
            for k, (name, co, ci, ks) in zip(keys, cfg)}


def prepare_params(params):
    """One-time layout prep: torch (Co,Ci,kh,kw) -> bf16 matmul / tap layouts."""
    prepped = {}
    for name, (w, b) in params.items():
        co, ci, kh, kw = w.shape
        wmat = jnp.transpose(w, (2, 3, 1, 0)).reshape(kh * kw * ci, co)
        wmat = wmat.astype(jnp.bfloat16)
        entry = {"wmat": wmat, "b": b.astype(jnp.float32)}
        if kh == 3 and kw == 3:
            entry["w4"] = wmat.reshape(3, 3, ci, co)   # (dy, dx, Cin, Cout)
        prepped[name] = entry
    return prepped


def vgg16_forward(prepped, x_nchw):
    """Matches VGG16.forward (inference).  x_nchw: (N, 3, 224, 224) float32."""
    x = jnp.transpose(x_nchw, (0, 2, 3, 1)).astype(jnp.bfloat16)   # NCHW->NHWC

    for block in (("conv1_1", "conv1_2"),
                  ("conv2_1", "conv2_2"),
                  ("conv3_1", "conv3_2", "conv3_3"),
                  ("conv4_1", "conv4_2", "conv4_3"),
                  ("conv5_1", "conv5_2", "conv5_3")):
        for name in block:
            x = conv3x3_relu(x, prepped[name])
        x = maxpool2x2(x)                            # finally (N, 7, 7, 512)

    # fc6: 7x7 conv, pad=0 over a 7x7 map -> 1x1 spatial (a dense layer).
    # NOTE: the reference module has no ReLU after fc6/fc7.
    N = x.shape[0]
    e6 = prepped["fc6"]
    a6 = x.reshape(N, 7 * 7 * 512)                   # NHWC flatten = (kh,kw,ci)
    x = matmul_bias(a6, e6["wmat"], e6["b"], relu=False, out_dtype=jnp.bfloat16)
    # TODO(synk): nn.Dropout train-mode masking/scaling omitted (torch RNG not
    # reproducible); dropout is applied as its eval-mode identity.

    e7 = prepped["fc7"]
    x = matmul_bias(x, e7["wmat"], e7["b"], relu=False, out_dtype=jnp.bfloat16)

    e8 = prepped["fc8"]
    x = matmul_bias(x, e8["wmat"], e8["b"], relu=False, out_dtype=jnp.float32)
    # torch.squeeze(x, dim=(2, 3)): spatial dims are already gone here.
    return x                                         # (N, num_classes) f32


if __name__ == "__main__":
    num_classes = 100
    batch = 1   # fc6 (7x7 conv, pad=0) forces 224x224 input; batch kept minimal.
    params = init_vgg16_params(num_classes=num_classes, seed=0)
    prepped = prepare_params(params)
    x = jax.random.normal(jax.random.PRNGKey(0),
                          (batch, 3, 224, 224), jnp.float32)
    logits = vgg16_forward(prepped, x)
    logits = jax.block_until_ready(logits)
    assert logits.shape == (batch, num_classes), logits.shape
    assert bool(jnp.all(jnp.isfinite(logits)))
    print("KERNEL_OK")
</pallas_src>

<mosaic_0001>
module attributes {stable_mosaic.version = 11 : i64} {
  func.func @_mm_kernel(%arg0: i32, %arg1: i32, %arg2: memref<2048x128xbf16, #tpu.memory_space<vmem>>, %arg3: memref<128x64xbf16, #tpu.memory_space<vmem>>, %arg4: memref<1x64xf32, #tpu.memory_space<vmem>>, %arg5: memref<2048x64xbf16, #tpu.memory_space<vmem>>) attributes {dimension_semantics = [#tpu.dimension_semantics<parallel>, #tpu.dimension_semantics<parallel>], iteration_bounds = array<i64: 25, 1>, scalar_prefetch = 0 : i64, scratch_operands = 0 : i64, tpu.core_type = #tpu.core_type<tc>, window_params = [{transform_indices = @transform_0, window_bounds = array<i64: 2048, 128>}, {transform_indices = @transform_1, window_bounds = array<i64: 128, 64>}, {transform_indices = @transform_2, window_bounds = array<i64: 1, 64>}, {transform_indices = @transform_3, window_bounds = array<i64: 2048, 64>}]} {
    %c0 = arith.constant 0 : index
    %c0_0 = arith.constant 0 : index
    %0 = vector.load %arg2[%c0, %c0_0] : memref<2048x128xbf16, #tpu.memory_space<vmem>>, vector<2048x128xbf16>
    %c0_1 = arith.constant 0 : index
    %c0_2 = arith.constant 0 : index
    %1 = vector.load %arg3[%c0_1, %c0_2] : memref<128x64xbf16, #tpu.memory_space<vmem>>, vector<128x64xbf16>
    %cst = arith.constant dense<0.000000e+00> : vector<2048x64xf32>
    %2 = tpu.matmul %0, %1, %cst {dimension_numbers = #tpu.dot_dimension_numbers<[1], [0], [0], [1], [0, 0, 1, 1], [], []>} : vector<2048x128xbf16>, vector<128x64xbf16>, vector<2048x64xf32> -> vector<2048x64xf32>
    %c0_3 = arith.constant 0 : index
    %c0_4 = arith.constant 0 : index
    %3 = vector.load %arg4[%c0_3, %c0_4] : memref<1x64xf32, #tpu.memory_space<vmem>>, vector<1x64xf32>
    %4 = vector.broadcast %3 : vector<1x64xf32> to vector<2048x64xf32>
    %5 = arith.addf %2, %4 : vector<2048x64xf32>
    %cst_5 = arith.constant 0.000000e+00 : f32
    %6 = vector.broadcast %cst_5 : f32 to vector<2048x64xf32>
    %7 = arith.maximumf %5, %6 : vector<2048x64xf32>
    %8 = arith.truncf %7 : vector<2048x64xf32> to vector<2048x64xbf16>
    %c0_6 = arith.constant 0 : index
    %c0_7 = arith.constant 0 : index
    %9 = vector.load %arg5[%c0_6, %c0_7] : memref<2048x64xbf16, #tpu.memory_space<vmem>>, vector<2048x64xbf16>
    tpu.vector_store %arg5[%c0_6, %c0_7], %8 {strides = array<i32>} : memref<2048x64xbf16, #tpu.memory_space<vmem>>, vector<2048x64xbf16>,
    return
  }
  func.func @transform_0(%arg0: i32, %arg1: i32) -> (i32, i32) {
    %c0_i32 = arith.constant 0 : i32
    %c0_i32_0 = arith.constant 0 : i32
    return %arg0, %c0_i32 : i32, i32
  }
  func.func @transform_1(%arg0: i32, %arg1: i32) -> (i32, i32) {
    %c0_i32 = arith.constant 0 : i32
    %c0_i32_0 = arith.constant 0 : i32
    return %c0_i32, %arg1 : i32, i32
  }
  func.func @transform_2(%arg0: i32, %arg1: i32) -> (i32, i32) {
    %c0_i32 = arith.constant 0 : i32
    %c0_i32_0 = arith.constant 0 : i32
    return %c0_i32, %arg1 : i32, i32
  }
  func.func @transform_3(%arg0: i32, %arg1: i32) -> (i32, i32) {
    %c0_i32 = arith.constant 0 : i32
    return %arg0, %arg1 : i32, i32
  }
}

</mosaic_0001>

<bundles_post_ra>
// kernel: tpu_custom_call.1
= control target key start
LH: loop header
LB: loop body
LE: loop exit
PB: predicated region body
PF: predicated region fallthrough
CT: control target
= control target key end

     0   :  { %8 = vsyncpa [#allocation3], 0  ;;  %s7319_s0 = inlined_call_operand.hbm [shape: bf16[50176,128], index: 0, kind: input, shape index: {}]   ;;  %s7320_s1 = inlined_call_operand.vmem [shape: bf16[128,64], index: 1, kind: input, shape index: {}]   ;;  %s7321_s2 = inlined_call_operand.hbm [shape: f32[1,64], index: 2, kind: input, shape index: {}]   ;;  %s7322_s3 = inlined_call_operand.vmem [shape: bf16[50176,64], index: 3, kind: output, shape index: {}]  }
   0x1   :  { %10 = vsyncpa [#allocation3 + $0x1], 0 }
   0x2   :  { %11 = vsyncpa [#allocation5], 0  ;;  %s6032_s12 = smov 0   ;;  %s6034_s13 = smov 0  }
   0x3   :  { %s6036_s14 = smov 0   ;;  %s6038_s15 = smov 0  }
   0x4   :  { %s6040_s16 = smov 0   ;;  %s6042_s17 = smov 0  }
   0x5 LB: > { %s4457_s18 = sadd.s32 4294967295, %s5974_s17   ;;  %s29_s19 = sadd.s32 1, %s5970_s16  ;;  %s5974_s17 = sphi %s6042_s17, %s17_s17   ;;  %s5970_s16 = sphi %s6040_s16, %s7345_s16   ;;  %s5966_s15 = sphi %s6038_s15, %s7344_s15   ;;  %s5962_s14 = sphi %s6036_s14, %s7343_s14   ;;  %s5958_s13 = sphi %s6034_s13, %s7342_s13   ;;  %s5954_s12 = sphi %s6032_s12, %s7341_s12  }
   0x6   : > { %p31_p0 = scmp.ge.s32.totalorder %s29_s19, 25  ;;  %s36_s20 = sadd.s32 1, %s5962_s14 }
   0x7   : > { %p43_p1 = scmp.ne.s32.totalorder %s5962_s14, %s5958_s13  ;;  %p44_p2 = scmp.eq.s32.totalorder %s5974_s17, 0 }
   0x8   : > { %s7347_s19 = smov (%p31_p0, %s29_s19), 0  ;;  %p49_p4 = scmp.ne.s32.totalorder %s5958_s13, %s5954_s12 }
   0x9   : > { %p6068_p3 = por %p44_p2, %p43_p1  ;;  %s33_s22 = ssub.s32 %s5970_s16, %s7347_s19 }
   0xa   : > { %p6075_p5 = scmp.eq.s32.totalorder %s4457_s18, 0  ;;  %p34_p6 = scmp.eq.s32.totalorder %s33_s22, 0 }
   0xb   : > { %s7327_s21 = scalar_select %p6068_p3, 1, 0 }
   0xc   : > { %s7328_s23 = scalar_select %p6075_p5, 1, 0 }
   0xd   : > { %p127_p7 = scmp.eq.s32.totalorder %s4457_s18, 24  ;;  %p6081_p8 = por %p6075_p5, %p49_p4 }
   0xe   : > { %p4459_p9 = scmp.ge.s32.totalorder %s5974_s17, 1  ;;  %p140_p11 = scmp.lt.s32.totalorder %s5974_s17, 26 }
   0xf   : > { %s7329_s24 = scalar_select %p6081_p8, 1, 0 }
  0x10   : > { %s6087_s25 = scalar_select %p34_p6, %s5962_s14, %s36_s20  }
  0x11   : > { %p6089_p10 = por %p127_p7, %p43_p1  ;;  %p6094_p12 = pnand %p4459_p9, %p140_p11 }
  0x12   : > { %s6008_s28 = smov [#allocation4]   ;;  %s5832_s6 = scalar_lea.hbm %s7321_s2, 16 }
  0x13   : > { %s7330_s26 = scalar_select %p6089_p10, 1, 0 }
  0x14   : > { %s7331_s27 = scalar_select %p6094_p12, 1, 0 }
  0x15   : > { %s162_s29 = sshll.u32 %s6008_s28, 4  ;;  %p5573_p13 = pneg %p6094_p12  ;;  %s163_s29 = int_to_ptr.vmem [resolvable:$true] %s162_s29 }
  0x16   : > { %p5833_p1 = scmp.ne.s32.totalorder %s7321_s2, %s5832_s6  ;;  %p5839_p7 = scmp.lt.u32.totalorder %s5832_s6, %s7321_s2 }
  0x17   : > { %p6102_p0 = pnand %p5573_p13, %p6075_p5 }
  0x19   : > { %p5834_p2 = pneg %p6102_p0 }
  0x1b   : > { %p5835_p4 = pnand %p5834_p2, %p5833_p1 }
  0x1d   : > { %p5836_p6 = pneg %p5835_p4 }
  0x1f   : > { %p5841_p9 = pnand %p5839_p7, %p5836_p6 }
  0x21   : > { %5844 = shalt.err (!%p5841_p9)
}
  0x22   : > { %s5845_s11 = scalar_lea.vmem %s163_s29, 16  ;;  %s5852_s12 = scalar_lea.vmem %s163_s29, 32 }
  0x23   : > { %p5846_p11 = scmp.ne.s32.totalorder %s163_s29, %s5845_s11  ;;  %p5853_p5 = scmp.lt.s32.totalorder %s163_s29, %s163_s29 }
  0x24   : > { %p5854_p8 = scmp.lt.s32.totalorder %s5852_s12, %s5845_s11 }
  0x25   : > { %p5848_p13 = pnand %p5846_p11, %p5834_p2 }
  0x26   : > { %p5855_p12 = por %p5854_p8, %p5853_p5 }
  0x27   : > { %p5849_p10 = pneg %p5848_p13 }
  0x29   : > { %p5856_p3 = pnand %p5855_p12, %p5849_p10 }
  0x2b   : > { %5859 = shalt.err (!%p5856_p3)
}
  0x2c   : > { %5576 = dma.hbm_to_vmem [thread:$0]  (!%p6102_p0), %s7321_s2, 16, %s163_s29, [#allocation5]  }
  0x2d   : > { %p4462_p1 = scmp.ge.s32.totalorder %s5974_s17, 25 }
  0x2e   : > { %p7333_p4 = scmp.ne.s32.totalorder (!%p4462_p1), %s7327_s21, 0 }
  0x2f   : > { %169 = sbr.rel (%p4462_p1) target bundleno = 89 (0x59), region = 24 }
  0x36   : > { %172 = sbr.rel (!%p7333_p4) target bundleno = 89 (0x59), region = 28  ;;  %s173_s22 = sand.u32 (%p7333_p4), 1, %s5962_s14  }
  0x37   : > { %s4464_s28 = sshll.u32 (%p7333_p4), %s5970_s16, 8  ;;  %s4463_s4 = sshll.u32 (%p7333_p4), %s173_s22, 10 }
  0x38   : > { %s179_s5 = ssub.s32 (%p7333_p4), 6272, %s4464_s28  ;;  %s6130_s7 = scalar_lea.sflag (%p7333_p4), [#allocation3], %s173_s22 }
  0x39   : > { %p180_p5 = scmp.lt.s32.totalorder (%p7333_p4), %s179_s5, 256  ;;  %s177_s29 = scalar_lea.vmem (%p7333_p4), [#allocation2], %s4463_s4 }
  0x3d   : > { %s7349_s5 = smov (!%p180_p5, %s179_s5), 256 }
  0x3e   : > { %s6127_s6 = sshll.u32 %s7349_s5, 6 }
  0x3f   : > { %s184_s30 = ssub.s32 16384, %s6127_s6 }
  0x40   : > { %185 = vsyncadd %s6130_s7, %s184_s30  ;;  %p4466_p3 = scmp.ne.s32.totalorder %s6127_s6, 0  ;;  %s4884_s21 = sshll.u32 %s5970_s16, 14 }
  0x41   : > { %s6138_s10 = scalar_lea.hbm %s7319_s0, %s4884_s21  ;;  %s190_s11 = sshll.u32 %s177_s29, 4  ;;  %s6140_s11 = int_to_ptr.vmem [resolvable:$true] %s190_s11 }
  0x42   : > { %s5860_s12 = scalar_lea.hbm %s6138_s10, %s6127_s6  ;;  %s5864_s22 = scalar_lea.hbm %s7319_s0, 401408 }
  0x43   : > { %p5861_p8 = scmp.ne.s32.totalorder %s6138_s10, %s5860_s12  ;;  %p5865_p0 = scmp.lt.u32.totalorder %s6138_s10, %s7319_s0 }
  0x44   : > { %p5866_p2 = scmp.lt.u32.totalorder %s5864_s22, %s5860_s12  ;;  %p5868_p7 = scmp.lt.u32.totalorder %s5860_s12, %s6138_s10 }
  0x45   : > { %p5862_p10 = pnand %p5861_p8, %p4466_p3 }
  0x46   : > { %p5867_p6 = por %p5866_p2, %p5865_p0 }
  0x47   : > { %p5863_p12 = pneg %p5862_p10 }
  0x48   : > { %p5869_p9 = por %p5868_p7, %p5867_p6 }
  0x4a   : > { %p5870_p11 = pnand %p5869_p9, %p5863_p12 }
  0x4c   : > { %5873 = shalt.err (!%p5870_p11)
}
  0x4d   : > { %s5874_s5 = scalar_lea.vmem %s6140_s11, %s6127_s6  ;;  %s6009_s30 = smov [#allocation2]  }
  0x4e   : > { %p5875_p13 = scmp.ne.s32.totalorder %s6140_s11, %s5874_s5  ;;  %s5878_s29 = sshll.u32 %s6009_s30, 4  ;;  %s5879_s29 = int_to_ptr.vmem [resolvable:$false] %s5878_s29 }
  0x4f   : > { %s5880_s21 = scalar_lea.vmem %s5879_s29, 32768  ;;  %p5881_p5 = scmp.lt.s32.totalorder %s6140_s11, %s5879_s29 }
  0x50   : > { %p5876_p1 = pnand %p5875_p13, %p4466_p3  ;;  %p5882_p8 = scmp.lt.s32.totalorder %s5880_s21, %s5874_s5 }
  0x52   : > { %p5877_p4 = pneg %p5876_p1  ;;  %p5883_p10 = por %p5882_p8, %p5881_p5 }
  0x54   : > { %p5884_p0 = pnand %p5883_p10, %p5877_p4 }
  0x56   : > { %5887 = shalt.err (!%p5884_p0)
}
  0x57   : > { %s6010_s8 = smov 64   ;;  %s6011_s9 = smov 4  }
  0x58   : > { %196 = dma.hbm_to_vmem [thread:$0]  (%p4466_p3), %s6138_s10, %s6127_s6, %s6140_s11, %s6130_s7, %s6010_s8, %s6010_s8, %s6011_s9  }
  0x59 PF: > { %p7334_p12 = scmp.ne.s32.totalorder %s7331_s27, 0 }
  0x5a   : > { %s204_s12 = sand.u32 (!%p7334_p12), 1, %s5958_s13   ;;  %p7335_p2 = scmp.ne.s32.totalorder (!%p7334_p12), %s7329_s24, 0 }
  0x5b   : > { %202 = sbr.rel (%p7334_p12) target bundleno = 696 (0x2b8), region = 32  ;;  %s6170_s18 = sshll.u32 (!%p7334_p12), %s204_s12, 10 }
  0x5c   : > { %s205_s20 = scalar_lea.sflag (!%p7334_p12), [#allocation3], %s204_s12  ;;  %s6173_s22 = scalar_lea.vmem (!%p7334_p12), [#allocation2], %s6170_s18 }
  0x62   : > { %5945 = dma.done.wait (%p7335_p2), %s205_s20, 16384  }
  0x63   : > { %5947 = vsyncadd (%p7335_p2), %s205_s20, 4294950912  ;;  %p7336_p3 = scmp.ne.s32.totalorder %s7328_s23, 0 }
  0x65   : > { %5949 = dma.done.wait (%p7336_p3), [#allocation5], 16  }
  0x66   : > { %5951 = vsyncadd (%p7336_p3), [#allocation5], 4294967280  ;;  %v5694_v0 = vld [vmem:[%s7320_s1] sm:$0xff]   ;;  %v5695_v1 = vld [vmem:[%s7320_s1 + $0x8] sm:$0xff]   ;;  %vm3685_vm0 = vcmask 519168   ;;  %s6332_s20 = scalar_lea.vmem [#allocation6], %s6170_s18  }
  0x67   : > { %5280 = vmatprep.subr.bf16.mxu0 %v5694_v0  ;;  %5552 = vmatprep.subr.bf16.mxu1 %v5694_v0  ;;  %v5696_v2 = vld [vmem:[%s7320_s1 + $0x10] sm:$0xff]   ;;  %v5697_v3 = vld [vmem:[%s7320_s1 + $0x18] sm:$0xff]   ;;  %v5702_v4 = vld [vmem:[%s6173_s22] sm:$0xff]   ;;  %p7337_p6 = scmp.ne.s32.totalorder %s7330_s26, 0 }
  0x68   : > { %5281 = vmatpush3.bf16.msra.mxu0 %v5694_v0  ;;  %5560 = vmatpush3.bf16.msra.mxu1 %v5694_v0  ;;  %v5703_v5 = vld [vmem:[%s6173_s22 + $0x200] sm:$0xff]   ;;  %v5699_v7 = vld [vmem:[%s7320_s1 + $0x28] sm:$0xff]   ;;  %v5700_v8 = vld [vmem:[%s7320_s1 + $0x30] sm:$0xff]   ;;  %s4868_s18 = sshll.u32 (%p7337_p6), %s5966_s15, 8 }
  0x69   : > { %5282 = vmatprep.subr.bf16.mxu0 %v5695_v1  ;;  %5553 = vmatprep.subr.bf16.mxu1 %v5695_v1  ;;  %v5698_v6 = vld [vmem:[%s7320_s1 + $0x20] sm:$0xff]   ;;  %v5701_v9 = vld [vmem:[%s7320_s1 + $0x38] sm:$0xff]   ;;  %v5704_v10 = vld [vmem:[%s6173_s22 + $0x8] sm:$0xff]   ;;  %s3950_s27 = ssub.s32 (%p7337_p6), 6272, %s4868_s18 }
  0x6a   : > { %5296 = vmatprep.mubr.bf16.mxu0 %v5702_v4  ;;  %5424 = vmatprep.mubr.bf16.mxu1 %v5703_v5  ;;  %v5705_v11 = vld [vmem:[%s6173_s22 + $0x208] sm:$0xff]   ;;  %v5706_v12 = vld [vmem:[%s6173_s22 + $0x10] sm:$0xff]   ;;  %v5708_v14 = vld [vmem:[%s6173_s22 + $0x18] sm:$0xff]   ;;  %p3951_p7 = scmp.lt.s32.totalorder (%p7337_p6), %s3950_s27, 256 }
  0x6b   : > { %v5707_v13 = vld [vmem:[%s6173_s22 + $0x210] sm:$0xff]   ;;  %v5709_v15 = vld [vmem:[%s6173_s22 + $0x218] sm:$0xff]   ;;  %v5710_v16 = vld [vmem:[%s6173_s22 + $0x20] sm:$0xff]  }
  0x6c   : > { %5283 = vmatpush3.bf16.msra.mxu0 %v5695_v1  ;;  %5561 = vmatpush3.bf16.msra.mxu1 %v5695_v1  ;;  %v5711_v17 = vld [vmem:[%s6173_s22 + $0x220] sm:$0xff]   ;;  %v5712_v18 = vld [vmem:[%s6173_s22 + $0x28] sm:$0xff]   ;;  %v5714_v20 = vld [vmem:[%s6173_s22 + $0x30] sm:$0xff]  }
  0x6d   : > { %5284 = vmatprep.subr.bf16.mxu0 %v5696_v2  ;;  %5554 = vmatprep.subr.bf16.mxu1 %v5696_v2  ;;  %v5713_v19 = vld [vmem:[%s6173_s22 + $0x228] sm:$0xff]   ;;  %v5715_v21 = vld [vmem:[%s6173_s22 + $0x230] sm:$0xff]   ;;  %v5716_v22 = vld [vmem:[%s6173_s22 + $0x38] sm:$0xff]  }
  0x6e   : > { %v5717_v23 = vld [vmem:[%s6173_s22 + $0x238] sm:$0xff]   ;;  %v5718_v24 = vld [vmem:[%s6173_s22 + $0x40] sm:$0xff]   ;;  %v5720_v26 = vld [vmem:[%s6173_s22 + $0x48] sm:$0xff]  }
  0x6f   : > { %v5719_v25 = vld [vmem:[%s6173_s22 + $0x240] sm:$0xff]   ;;  %v5721_v27 = vld [vmem:[%s6173_s22 + $0x248] sm:$0xff]   ;;  %v5722_v28 = vld [vmem:[%s6173_s22 + $0x50] sm:$0xff]  }
  0x70   : > { %5285 = vmatpush3.bf16.msra.mxu0 %v5696_v2  ;;  %5562 = vmatpush3.bf16.msra.mxu1 %v5696_v2  ;;  %v5723_v29 = vld [vmem:[%s6173_s22 + $0x250] sm:$0xff]   ;;  %v5724_v30 = vld [vmem:[%s6173_s22 + $0x58] sm:$0xff]   ;;  %v5726_v32 = vld [vmem:[%s6173_s22 + $0x60] sm:$0xff]  }
  0x71   : > { %5286 = vmatprep.subr.bf16.mxu0 %v5697_v3  ;;  %5555 = vmatprep.subr.bf16.mxu1 %v5697_v3  ;;  %v5725_v31 = vld [vmem:[%s6173_s22 + $0x258] sm:$0xff]   ;;  %v5727_v33 = vld [vmem:[%s6173_s22 + $0x260] sm:$0xff]   ;;  %v5728_v34 = vld [vmem:[%s6173_s22 + $0x68] sm:$0xff]  }
  0x72   : > { %v5729_v35 = vld [vmem:[%s6173_s22 + $0x268] sm:$0xff]   ;;  %v5730_v36 = vld [vmem:[%s6173_s22 + $0x70] sm:$0xff]   ;;  %v5732_v38 = vld [vmem:[%s6173_s22 + $0x78] sm:$0xff]  }
  0x73   : > { %v5731_v37 = vld [vmem:[%s6173_s22 + $0x270] sm:$0xff]   ;;  %v5733_v39 = vld [vmem:[%s6173_s22 + $0x278] sm:$0xff]   ;;  %v5734_v40 = vld [vmem:[%s6173_s22 + $0x80] sm:$0xff]  }
  0x74   : > { %5287 = vmatpush3.bf16.msra.mxu0 %v5697_v3  ;;  %5563 = vmatpush3.bf16.msra.mxu1 %v5697_v3  ;;  %v5735_v41 = vld [vmem:[%s6173_s22 + $0x280] sm:$0xff]   ;;  %v5736_v42 = vld [vmem:[%s6173_s22 + $0x88] sm:$0xff]   ;;  %v5738_v44 = vld [vmem:[%s6173_s22 + $0x90] sm:$0xff]  }
  0x75   : > { %5288 = vmatprep.subr.bf16.mxu0 %v5698_v6  ;;  %5556 = vmatprep.subr.bf16.mxu1 %v5698_v6  ;;  %v5737_v43 = vld [vmem:[%s6173_s22 + $0x288] sm:$0xff]   ;;  %v5739_v45 = vld [vmem:[%s6173_s22 + $0x290] sm:$0xff]   ;;  %v5740_v46 = vld [vmem:[%s6173_s22 + $0x98] sm:$0xff]  }
  0x76   : > { %v5741_v47 = vld [vmem:[%s6173_s22 + $0x298] sm:$0xff]   ;;  %v5742_v48 = vld [vmem:[%s6173_s22 + $0xa0] sm:$0xff]   ;;  %v5744_v50 = vld [vmem:[%s6173_s22 + $0xa8] sm:$0xff]  }
  0x77   : > { %v5743_v49 = vld [vmem:[%s6173_s22 + $0x2a0] sm:$0xff]   ;;  %v5745_v51 = vld [vmem:[%s6173_s22 + $0x2a8] sm:$0xff]   ;;  %v5746_v52 = vld [vmem:[%s6173_s22 + $0xb0] sm:$0xff]  }
  0x78   : > { %5289 = vmatpush3.bf16.msra.mxu0 %v5698_v6  ;;  %5564 = vmatpush3.bf16.msra.mxu1 %v5698_v6  ;;  %v5747_v53 = vld [vmem:[%s6173_s22 + $0x2b0] sm:$0xff]   ;;  %v5748_v54 = vld [vmem:[%s6173_s22 + $0xb8] sm:$0xff]   ;;  %v5750_v56 = vld [vmem:[%s6173_s22 + $0xc0] sm:$0xff]  }
  0x79   : > { %5290 = vmatprep.subr.bf16.mxu0 %v5699_v7  ;;  %5557 = vmatprep.subr.bf16.mxu1 %v5699_v7  ;;  %v5749_v55 = vld [vmem:[%s6173_s22 + $0x2b8] sm:$0xff]   ;;  %v5751_v57 = vld [vmem:[%s6173_s22 + $0x2c0] sm:$0xff]   ;;  %v5752_v58 = vld [vmem:[%s6173_s22 + $0xc8] sm:$0xff]  }
  0x7a   : > { %v5753_v59 = vld [vmem:[%s6173_s22 + $0x2c8] sm:$0xff]   ;;  %v5754_v60 = vld [vmem:[%s6173_s22 + $0xd0] sm:$0xff]   ;;  %v5756_v62 = vld [vmem:[%s6173_s22 + $0xd8] sm:$0xff]  }
  0x7b   : > { %v5755_v61 = vld [vmem:[%s6173_s22 + $0x2d0] sm:$0xff]   ;;  %v5757_v63 = vld [vmem:[%s6173_s22 + $0x2d8] sm:$0xff]   ;;  %v5758_v0 = vld [vmem:[%s6173_s22 + $0xe0] sm:$0xff]  }
  0x7c   : > { %5291 = vmatpush3.bf16.msra.mxu0 %v5699_v7  ;;  %5565 = vmatpush3.bf16.msra.mxu1 %v5699_v7  ;;  %v5759_v1 = vld [vmem:[%s6173_s22 + $0x2e0] sm:$0xff]   ;;  %v5760_v2 = vld [vmem:[%s6173_s22 + $0xe8] sm:$0xff]   ;;  %v5762_v4 = vld [vmem:[%s6173_s22 + $0xf0] sm:$0xff]  }
  0x7d   : > { %5292 = vmatprep.subr.bf16.mxu0 %v5700_v8  ;;  %5558 = vmatprep.subr.bf16.mxu1 %v5700_v8  ;;  %v5761_v3 = vld [vmem:[%s6173_s22 + $0x2e8] sm:$0xff]   ;;  %v5763_v5 = vld [vmem:[%s6173_s22 + $0x2f0] sm:$0xff]   ;;  %v5764_v6 = vld [vmem:[%s6173_s22 + $0xf8] sm:$0xff]  }
  0x7e   : > { %v5765_v7 = vld [vmem:[%s6173_s22 + $0x2f8] sm:$0xff]  }
  0x80   : > { %5293 = vmatpush3.bf16.msra.mxu0 %v5700_v8  ;;  %5566 = vmatpush3.bf16.msra.mxu1 %v5700_v8  ;;  %v5766_v8 = vld [vmem:[%s6173_s22 + $0x100] sm:$0xff]  }
  0x81   : > { %5294 = vmatprep.subr.bf16.mxu0 %v5701_v9  ;;  %5559 = vmatprep.subr.bf16.mxu1 %v5701_v9 }
  0x84   : > { %5295 = vmatpush3.bf16.msra.mxu0 %v5701_v9  ;;  %5567 = vmatpush3.bf16.msra.mxu1 %v5701_v9  ;;  %v5767_v9 = vld [vmem:[%s6173_s22 + $0x300] sm:$0xff]  }
  0x87   : > { %5297 = vmatmul.mubr.bf16.vlgmr.msra.gmra.mrb[0].mxu0 %v5704_v10  ;;  %5425 = vmatmul.mubr.bf16.vlgmr.msra.gmra.mrb[0].mxu1 %v5705_v11  ;;  %v5768_v10 = vld [vmem:[%s6173_s22 + $0x108] sm:$0xff]  }
  0x88   : > { %5300 = vmatprep.mubr.bf16.mxu0 %v5706_v12  ;;  %5428 = vmatprep.mubr.bf16.mxu1 %v5707_v13  ;;  %v5769_v11 = vld [vmem:[%s6173_s22 + $0x308] sm:$0xff]   ;;  %v5770_v12 = vld [vmem:[%s6173_s22 + $0x110] sm:$0xff]  }
  0x89   : > { %v5771_v13 = vld [vmem:[%s6173_s22 + $0x310] sm:$0xff]  }
  0x8f   : > { %5301 = vmatmul.mubr.bf16.gmra.mrb[4].mxu0 %v5708_v14  ;;  %5429 = vmatmul.mubr.bf16.gmra.mrb[4].mxu1 %v5709_v15  ;;  %v5772_v14 = vld [vmem:[%s6173_s22 + $0x118] sm:$0xff]  }
  0x90   : > { %5304 = vmatprep.mubr.bf16.mxu0 %v5710_v16  ;;  %5432 = vmatprep.mubr.bf16.mxu1 %v5711_v17  ;;  %v5773_v15 = vld [vmem:[%s6173_s22 + $0x318] sm:$0xff]   ;;  %v5774_v16 = vld [vmem:[%s6173_s22 + $0x120] sm:$0xff]  }
  0x91   : > { %v5775_v17 = vld [vmem:[%s6173_s22 + $0x320] sm:$0xff]  }
  0x97   : > { %5305 = vmatmul.mubr.bf16.gmra.mrb[8].mxu0 %v5712_v18  ;;  %5433 = vmatmul.mubr.bf16.gmra.mrb[8].mxu1 %v5713_v19  ;;  %v5776_v18 = vld [vmem:[%s6173_s22 + $0x128] sm:$0xff]  }
  0x98   : > { %5308 = vmatprep.mubr.bf16.mxu0 %v5714_v20  ;;  %5436 = vmatprep.mubr.bf16.mxu1 %v5715_v21  ;;  %v5777_v19 = vld [vmem:[%s6173_s22 + $0x328] sm:$0xff]   ;;  %v5778_v20 = vld [vmem:[%s6173_s22 + $0x130] sm:$0xff]  }
  0x99   : > { %v5779_v21 = vld [vmem:[%s6173_s22 + $0x330] sm:$0xff]  }
  0x9f   : > { %5309 = vmatmul.mubr.bf16.gmra.mrb[12].mxu0 %v5716_v22  ;;  %5437 = vmatmul.mubr.bf16.gmra.mrb[12].mxu1 %v5717_v23  ;;  %v5780_v22 = vld [vmem:[%s6173_s22 + $0x138] sm:$0xff]  }
  0xa0   : > { %5312 = vmatprep.mubr.bf16.mxu0 %v5718_v24  ;;  %5440 = vmatprep.mubr.bf16.mxu1 %v5719_v25  ;;  %v5781_v23 = vld [vmem:[%s6173_s22 + $0x338] sm:$0xff]   ;;  %v5782_v24 = vld [vmem:[%s6173_s22 + $0x140] sm:$0xff]  }
  0xa1   : > { %v5783_v25 = vld [vmem:[%s6173_s22 + $0x340] sm:$0xff]  }
  0xa7   : > { %5313 = vmatmul.mubr.bf16.gmra.mrb[16].mxu0 %v5720_v26  ;;  %5441 = vmatmul.mubr.bf16.gmra.mrb[16].mxu1 %v5721_v27  ;;  %v5784_v26 = vld [vmem:[%s6173_s22 + $0x148] sm:$0xff]  }
  0xa8   : > { %5316 = vmatprep.mubr.bf16.mxu0 %v5722_v28  ;;  %5444 = vmatprep.mubr.bf16.mxu1 %v5723_v29  ;;  %v5785_v27 = vld [vmem:[%s6173_s22 + $0x348] sm:$0xff]   ;;  %v5786_v28 = vld [vmem:[%s6173_s22 + $0x150] sm:$0xff]  }
  0xa9   : > { %v5787_v29 = vld [vmem:[%s6173_s22 + $0x350] sm:$0xff]  }
  0xaf   : > { %5317 = vmatmul.mubr.bf16.gmra.mrb[20].mxu0 %v5724_v30  ;;  %5445 = vmatmul.mubr.bf16.gmra.mrb[20].mxu1 %v5725_v31  ;;  %v5788_v30 = vld [vmem:[%s6173_s22 + $0x158] sm:$0xff]  }
  0xb0   : > { %5320 = vmatprep.mubr.bf16.mxu0 %v5726_v32  ;;  %5448 = vmatprep.mubr.bf16.mxu1 %v5727_v33  ;;  %v5789_v31 = vld [vmem:[%s6173_s22 + $0x358] sm:$0xff]   ;;  %v5790_v32 = vld [vmem:[%s6173_s22 + $0x160] sm:$0xff]  }
  0xb1   : > { %v5791_v33 = vld [vmem:[%s6173_s22 + $0x360] sm:$0xff]  }
  0xb7   : > { %5321 = vmatmul.mubr.bf16.gmra.mrb[24].mxu0 %v5728_v34  ;;  %5449 = vmatmul.mubr.bf16.gmra.mrb[24].mxu1 %v5729_v35  ;;  %v5792_v34 = vld [vmem:[%s6173_s22 + $0x168] sm:$0xff]  }
  0xb8   : > { %5324 = vmatprep.mubr.bf16.mxu0 %v5730_v36  ;;  %5452 = vmatprep.mubr.bf16.mxu1 %v5731_v37  ;;  %v5793_v35 = vld [vmem:[%s6173_s22 + $0x368] sm:$0xff]   ;;  %v5794_v36 = vld [vmem:[%s6173_s22 + $0x170] sm:$0xff]  }
  0xb9   : > { %v5795_v37 = vld [vmem:[%s6173_s22 + $0x370] sm:$0xff]  }
  0xbf   : > { %5325 = vmatmul.mubr.bf16.gmra.mrb[28].mxu0 %v5732_v38  ;;  %5453 = vmatmul.mubr.bf16.gmra.mrb[28].mxu1 %v5733_v39  ;;  %v5796_v38 = vld [vmem:[%s6173_s22 + $0x178] sm:$0xff]  }
  0xc0   : > { %5328 = vmatprep.mubr.bf16.mxu0 %v5734_v40  ;;  %5456 = vmatprep.mubr.bf16.mxu1 %v5735_v41  ;;  %v5797_v39 = vld [vmem:[%s6173_s22 + $0x378] sm:$0xff]   ;;  %v5798_v40 = vld [vmem:[%s6173_s22 + $0x180] sm:$0xff]  }
  0xc1   : > { %v5799_v41 = vld [vmem:[%s6173_s22 + $0x380] sm:$0xff]  }
  0xc7   : > { %5329 = vmatmul.mubr.bf16.gmra.mrb[32].mxu0 %v5736_v42  ;;  %5457 = vmatmul.mubr.bf16.gmra.mrb[32].mxu1 %v5737_v43  ;;  %v5800_v42 = vld [vmem:[%s6173_s22 + $0x188] sm:$0xff]  }
  0xc8   : > { %5332 = vmatprep.mubr.bf16.mxu0 %v5738_v44  ;;  %5460 = vmatprep.mubr.bf16.mxu1 %v5739_v45  ;;  %v5801_v43 = vld [vmem:[%s6173_s22 + $0x388] sm:$0xff]   ;;  %v5802_v44 = vld [vmem:[%s6173_s22 + $0x190] sm:$0xff]  }
  0xc9   : > { %v5803_v45 = vld [vmem:[%s6173_s22 + $0x390] sm:$0xff]  }
  0xcf   : > { %5333 = vmatmul.mubr.bf16.gmra.mrb[36].mxu0 %v5740_v46  ;;  %5461 = vmatmul.mubr.bf16.gmra.mrb[36].mxu1 %v5741_v47  ;;  %v5804_v46 = vld [vmem:[%s6173_s22 + $0x198] sm:$0xff]  }
  0xd0   : > { %5336 = vmatprep.mubr.bf16.mxu0 %v5742_v48  ;;  %5464 = vmatprep.mubr.bf16.mxu1 %v5743_v49  ;;  %v5805_v47 = vld [vmem:[%s6173_s22 + $0x398] sm:$0xff]   ;;  %v5806_v48 = vld [vmem:[%s6173_s22 + $0x1a0] sm:$0xff]  }
  0xd1   : > { %v5807_v49 = vld [vmem:[%s6173_s22 + $0x3a0] sm:$0xff]  }
  0xd7   : > { %5337 = vmatmul.mubr.bf16.gmra.mrb[40].mxu0 %v5744_v50  ;;  %5465 = vmatmul.mubr.bf16.gmra.mrb[40].mxu1 %v5745_v51  ;;  %v5808_v50 = vld [vmem:[%s6173_s22 + $0x1a8] sm:$0xff]  }
  0xd8   : > { %5340 = vmatprep.mubr.bf16.mxu0 %v5746_v52  ;;  %5468 = vmatprep.mubr.bf16.mxu1 %v5747_v53  ;;  %v5809_v51 = vld [vmem:[%s6173_s22 + $0x3a8] sm:$0xff]   ;;  %v5810_v52 = vld [vmem:[%s6173_s22 + $0x1b0] sm:$0xff]  }
  0xd9   : > { %v5811_v53 = vld [vmem:[%s6173_s22 + $0x3b0] sm:$0xff]  }
  0xdf   : > { %5341 = vmatmul.mubr.bf16.gmra.mrb[44].mxu0 %v5748_v54  ;;  %5469 = vmatmul.mubr.bf16.gmra.mrb[44].mxu1 %v5749_v55  ;;  %v6317_v54 = vld [vmem:[#allocation4] ss:$0 sm:$0xff] }
  0xe0   : > { %5344 = vmatprep.mubr.bf16.mxu0 %v5750_v56  ;;  %5472 = vmatprep.mubr.bf16.mxu1 %v5751_v57 }
  0xe7   : > { %5345 = vmatmul.mubr.bf16.gmra.mrb[48].mxu0 %v5752_v58  ;;  %5473 = vmatmul.mubr.bf16.gmra.mrb[48].mxu1 %v5753_v59 }
  0xe8   : > { %5348 = vmatprep.mubr.bf16.mxu0 %v5754_v60  ;;  %5476 = vmatprep.mubr.bf16.mxu1 %v5755_v61  ;;  %v5812_v61 = vld [vmem:[%s6173_s22 + $0x1b8] sm:$0xff]  }
  0xef   : > { %5349 = vmatmul.mubr.bf16.gmra.mrb[52].mxu0 %v5756_v62  ;;  %5477 = vmatmul.mubr.bf16.gmra.mrb[52].mxu1 %v5757_v63  ;;  %v5813_v62 = vld [vmem:[%s6173_s22 + $0x3b8] sm:$0xff]  }
  0xf0   : > { %5352 = vmatprep.mubr.bf16.mxu0 %v5758_v0  ;;  %5480 = vmatprep.mubr.bf16.mxu1 %v5759_v1 }
  0xf7   : > { %5353 = vmatmul.mubr.bf16.gmra.mrb[56].mxu0 %v5760_v2  ;;  %5481 = vmatmul.mubr.bf16.gmra.mrb[56].mxu1 %v5761_v3  ;;  %v5814_v3 = vld [vmem:[%s6173_s22 + $0x1c0] sm:$0xff]  }
  0xf8   : > { %5356 = vmatprep.mubr.bf16.mxu0 %v5762_v4  ;;  %5484 = vmatprep.mubr.bf16.mxu1 %v5763_v5  ;;  %v5815_v4 = vld [vmem:[%s6173_s22 + $0x3c0] sm:$0xff]  }
  0xff   : > { %5357 = vmatmul.mubr.bf16.gmra.mrb[60].mxu0 %v5764_v6  ;;  %5485 = vmatmul.mubr.bf16.gmra.mrb[60].mxu1 %v5765_v7 }
 0x100   : > { %5360 = vmatprep.mubr.bf16.mxu0 %v5766_v8  ;;  %5488 = vmatprep.mubr.bf16.mxu1 %v5767_v9 }
 0x107   : > { %5361 = vmatmul.mubr.bf16.gmra.mrb[64].mxu0 %v5768_v10  ;;  %5489 = vmatmul.mubr.bf16.gmra.mrb[64].mxu1 %v5769_v11 }
 0x108   : > { %5364 = vmatprep.mubr.bf16.mxu0 %v5770_v12  ;;  %5492 = vmatprep.mubr.bf16.mxu1 %v5771_v13 }
 0x10f   : > { %5365 = vmatmul.mubr.bf16.gmra.mrb[68].mxu0 %v5772_v14  ;;  %5493 = vmatmul.mubr.bf16.gmra.mrb[68].mxu1 %v5773_v15 }
 0x110   : > { %5368 = vmatprep.mubr.bf16.mxu0 %v5774_v16  ;;  %5496 = vmatprep.mubr.bf16.mxu1 %v5775_v17 }
 0x117   : > { %5369 = vmatmul.mubr.bf16.gmra.mrb[72].mxu0 %v5776_v18  ;;  %5497 = vmatmul.mubr.bf16.gmra.mrb[72].mxu1 %v5777_v19 }
 0x118   : > { %5372 = vmatprep.mubr.bf16.mxu0 %v5778_v20  ;;  %5500 = vmatprep.mubr.bf16.mxu1 %v5779_v21 }
 0x11f   : > { %5373 = vmatmul.mubr.bf16.gmra.mrb[76].mxu0 %v5780_v22  ;;  %5501 = vmatmul.mubr.bf16.gmra.mrb[76].mxu1 %v5781_v23 }
 0x120   : > { %5376 = vmatprep.mubr.bf16.mxu0 %v5782_v24  ;;  %5504 = vmatprep.mubr.bf16.mxu1 %v5783_v25 }
 0x127   : > { %5377 = vmatmul.mubr.bf16.gmra.mrb[80].mxu0 %v5784_v26  ;;  %5505 = vmatmul.mubr.bf16.gmra.mrb[80].mxu1 %v5785_v27 }
 0x128   : > { %5380 = vmatprep.mubr.bf16.mxu0 %v5786_v28  ;;  %5508 = vmatprep.mubr.bf16.mxu1 %v5787_v29 }
 0x12f   : > { %5381 = vmatmul.mubr.bf16.gmra.mrb[84].mxu0 %v5788_v30  ;;  %5509 = vmatmul.mubr.bf16.gmra.mrb[84].mxu1 %v5789_v31 }
 0x130   : > { %5384 = vmatprep.mubr.bf16.mxu0 %v5790_v32  ;;  %5512 = vmatprep.mubr.bf16.mxu1 %v5791_v33  ;;  %v5816_v33 = vld [vmem:[%s6173_s22 + $0x1c8] sm:$0xff]  }
 0x137   : > { %5385 = vmatmul.mubr.bf16.gmra.mrb[88].mxu0 %v5792_v34  ;;  %5513 = vmatmul.mubr.bf16.gmra.mrb[88].mxu1 %v5793_v35  ;;  %v5817_v34 = vld [vmem:[%s6173_s22 + $0x3c8] sm:$0xff]  }
 0x138   : > { %5388 = vmatprep.mubr.bf16.mxu0 %v5794_v36  ;;  %5516 = vmatprep.mubr.bf16.mxu1 %v5795_v37 }
 0x13f   : > { %5389 = vmatmul.mubr.bf16.gmra.mrb[92].mxu0 %v5796_v38  ;;  %5517 = vmatmul.mubr.bf16.gmra.mrb[92].mxu1 %v5797_v39  ;;  %v5818_v39 = vld [vmem:[%s6173_s22 + $0x1d0] sm:$0xff]  }
 0x140   : > { %5392 = vmatprep.mubr.bf16.mxu0 %v5798_v40  ;;  %5520 = vmatprep.mubr.bf16.mxu1 %v5799_v41  ;;  %v5819_v40 = vld [vmem:[%s6173_s22 + $0x3d0] sm:$0xff]  }
 0x147   : > { %5393 = vmatmul.mubr.bf16.gmra.mrb[96].mxu0 %v5800_v42  ;;  %5521 = vmatmul.mubr.bf16.gmra.mrb[96].mxu1 %v5801_v43 }
 0x148   : > { %5396 = vmatprep.mubr.bf16.mxu0 %v5802_v44  ;;  %5524 = vmatprep.mubr.bf16.mxu1 %v5803_v45 }
 0x14f   : > { %5397 = vmatmul.mubr.bf16.gmra.mrb[100].mxu0 %v5804_v46  ;;  %5525 = vmatmul.mubr.bf16.gmra.mrb[100].mxu1 %v5805_v47 }
 0x150   : > { %5400 = vmatprep.mubr.bf16.mxu0 %v5806_v48  ;;  %5528 = vmatprep.mubr.bf16.mxu1 %v5807_v49 }
 0x157   : > { %5401 = vmatmul.mubr.bf16.gmra.mrb[104].mxu0 %v5808_v50  ;;  %5529 = vmatmul.mubr.bf16.gmra.mrb[104].mxu1 %v5809_v51 }
 0x158   : > { %5404 = vmatprep.mubr.bf16.mxu0 %v5810_v52  ;;  %5532 = vmatprep.mubr.bf16.mxu1 %v5811_v53 }
 0x15a   : > { %v5298_v55 = vpop.f32.mrb[0].mxu0  ;;  %v5426_v56 = vpop.f32.mrb[0].mxu1 }
 0x15b   : > { %v1391_v57 = vadd.f32 %v5298_v55, %v6317_v54  ;;  %v1903_v58 = vadd.f32 %v5426_v56, %v6317_v54  ;;  %v1382_v59 = vpop.f32.mrb[1].mxu0  ;;  %v1894_v60 = vpop.f32.mrb[1].mxu1 }
 0x15c   : > { %v1383_v63 = vadd.f32 %v6317_v54, %v1382_v59  ;;  %v1895_v0 = vadd.f32 %v6317_v54, %v1894_v60  ;;  %v5299_v1 = vpop.f32.mrb[2].mxu0  ;;  %v5427_v2 = vpop.f32.mrb[2].mxu1 }
 0x15d   : > { %v2407_v5 = vmax.f32 %v1391_v57, 0.0  ;;  %v2535_v6 = vmax.f32 %v1903_v58, 0.0  ;;  %v1394_v7 = vadd.f32 %v5299_v1, %v6317_v54  ;;  %v1906_v8 = vadd.f32 %v5427_v2, %v6317_v54  ;;  %v1385_v9 = vpop.f32.mrb[3].mxu0  ;;  %v1897_v10 = vpop.f32.mrb[3].mxu1 }
 0x15e   : > { %v2405_v11 = vmax.f32 %v1383_v63, 0.0  ;;  %v2533_v12 = vmax.f32 %v1895_v0, 0.0  ;;  %v1386_v13 = vadd.f32 %v6317_v54, %v1385_v9  ;;  %v1898_v14 = vadd.f32 %v6317_v54, %v1897_v10 }
 0x15f   : > { %v4887_v15 = vpack.c.bf16 %v2407_v5, %v2407_v5  ;;  %v5015_v16 = vpack.c.bf16 %v2535_v6, %v2535_v6  ;;  %v2408_v17 = vmax.f32 %v1394_v7, 0.0  ;;  %v2536_v18 = vmax.f32 %v1906_v8, 0.0  ;;  %5405 = vmatmul.mubr.bf16.gmra.mrb[108].mxu0 %v5812_v61  ;;  %5533 = vmatmul.mubr.bf16.gmra.mrb[108].mxu1 %v5813_v62  ;;  %v5820_v6 = vld [vmem:[%s6173_s22 + $0x1d8] sm:$0xff]  }
 0x160   : > { %v4885_v19 = vpack.c.bf16 %v2405_v11, %v2405_v11  ;;  %v5013_v20 = vpack.c.bf16 %v2533_v12, %v2533_v12  ;;  %v2406_v21 = vmax.f32 %v1386_v13, 0.0  ;;  %v2534_v22 = vmax.f32 %v1898_v14, 0.0  ;;  %5408 = vmatprep.mubr.bf16.mxu0 %v5814_v3  ;;  %5536 = vmatprep.mubr.bf16.mxu1 %v5815_v4  ;;  %v5821_v7 = vld [vmem:[%s6173_s22 + $0x3d8] sm:$0xff]   ;;  %v5822_v12 = vld [vmem:[%s6173_s22 + $0x1e0] sm:$0xff]  }
 0x161   : > { %3688 = vst.msk [vmem:[%s6332_s20 + $0x8] sm:$0xf] %vm3685_vm0, %v4887_v15  ;;  %3816 = vst.msk [vmem:[%s6332_s20 + $0x208] sm:$0xf] %vm3685_vm0, %v5015_v16  ;;  %v4888_v23 = vpack.c.bf16 %v2408_v17, %v2408_v17  ;;  %v5016_v24 = vpack.c.bf16 %v2536_v18, %v2536_v18  ;;  %v5823_v13 = vld [vmem:[%s6173_s22 + $0x3e0] sm:$0xff]  }
 0x162   : > { %3686 = vst.msk [vmem:[%s6332_s20] sm:$0xf] %vm3685_vm0, %v4885_v19  ;;  %3814 = vst.msk [vmem:[%s6332_s20 + $0x200] sm:$0xf] %vm3685_vm0, %v5013_v20  ;;  %v4886_v25 = vpack.c.bf16 %v2406_v21, %v2406_v21  ;;  %v5014_v26 = vpack.c.bf16 %v2534_v22, %v2534_v22  ;;  %v5302_v27 = vpop.f32.mrb[4].mxu0  ;;  %v5430_v28 = vpop.f32.mrb[4].mxu1 }
 0x163   : > { %3689 = vst.msk [vmem:[%s6332_s20 + $0xc] sm:$0xf] %vm3685_vm0, %v4888_v23  ;;  %3817 = vst.msk [vmem:[%s6332_s20 + $0x20c] sm:$0xf] %vm3685_vm0, %v5016_v24  ;;  %v1407_v29 = vadd.f32 %v5302_v27, %v6317_v54  ;;  %v1919_v30 = vadd.f32 %v5430_v28, %v6317_v54  ;;  %v1398_v31 = vpop.f32.mrb[5].mxu0  ;;  %v1910_v32 = vpop.f32.mrb[5].mxu1 }
 0x164   : > { %3687 = vst.msk [vmem:[%s6332_s20 + $0x4] sm:$0xf] %vm3685_vm0, %v4886_v25  ;;  %3815 = vst.msk [vmem:[%s6332_s20 + $0x204] sm:$0xf] %vm3685_vm0, %v5014_v26  ;;  %v1399_v35 = vadd.f32 %v6317_v54, %v1398_v31  ;;  %v1911_v36 = vadd.f32 %v6317_v54, %v1910_v32  ;;  %v5303_v37 = vpop.f32.mrb[6].mxu0  ;;  %v5431_v38 = vpop.f32.mrb[6].mxu1 }
 0x165   : > { %v2411_v41 = vmax.f32 %v1407_v29, 0.0  ;;  %v2539_v42 = vmax.f32 %v1919_v30, 0.0  ;;  %v1410_v43 = vadd.f32 %v5303_v37, %v6317_v54  ;;  %v1922_v44 = vadd.f32 %v5431_v38, %v6317_v54  ;;  %v1401_v45 = vpop.f32.mrb[7].mxu0  ;;  %v1913_v46 = vpop.f32.mrb[7].mxu1 }
 0x166   : > { %v2409_v47 = vmax.f32 %v1399_v35, 0.0  ;;  %v2537_v48 = vmax.f32 %v1911_v36, 0.0  ;;  %v1402_v49 = vadd.f32 %v6317_v54, %v1401_v45  ;;  %v1914_v50 = vadd.f32 %v6317_v54, %v1913_v46 }
 0x167   : > { %v4891_v51 = vpack.c.bf16 %v2411_v41, %v2411_v41  ;;  %v5019_v52 = vpack.c.bf16 %v2539_v42, %v2539_v42  ;;  %v2412_v53 = vmax.f32 %v1410_v43, 0.0  ;;  %v2540_v55 = vmax.f32 %v1922_v44, 0.0  ;;  %5409 = vmatmul.mubr.bf16.gmra.mrb[112].mxu0 %v5816_v33  ;;  %5537 = vmatmul.mubr.bf16.gmra.mrb[112].mxu1 %v5817_v34  ;;  %v5824_v42 = vld [vmem:[%s6173_s22 + $0x1e8] sm:$0xff]  }
 0x168   : > { %v4889_v56 = vpack.c.bf16 %v2409_v47, %v2409_v47  ;;  %v5017_v57 = vpack.c.bf16 %v2537_v48, %v2537_v48  ;;  %v2410_v58 = vmax.f32 %v1402_v49, 0.0  ;;  %v2538_v59 = vmax.f32 %v1914_v50, 0.0  ;;  %5412 = vmatprep.mubr.bf16.mxu0 %v5818_v39  ;;  %5540 = vmatprep.mubr.bf16.mxu1 %v5819_v40  ;;  %v5825_v43 = vld [vmem:[%s6173_s22 + $0x3e8] sm:$0xff]   ;;  %v5826_v48 = vld [vmem:[%s6173_s22 + $0x1f0] sm:$0xff]  }
 0x169   : > { %3692 = vst.msk [vmem:[%s6332_s20 + $0x18] sm:$0xf] %vm3685_vm0, %v4891_v51  ;;  %3820 = vst.msk [vmem:[%s6332_s20 + $0x218] sm:$0xf] %vm3685_vm0, %v5019_v52  ;;  %v4892_v60 = vpack.c.bf16 %v2412_v53, %v2412_v53  ;;  %v5020_v61 = vpack.c.bf16 %v2540_v55, %v2540_v55  ;;  %v5827_v49 = vld [vmem:[%s6173_s22 + $0x3f0] sm:$0xff]  }
 0x16a   : > { %3690 = vst.msk [vmem:[%s6332_s20 + $0x10] sm:$0xf] %vm3685_vm0, %v4889_v56  ;;  %3818 = vst.msk [vmem:[%s6332_s20 + $0x210] sm:$0xf] %vm3685_vm0, %v5017_v57  ;;  %v4890_v62 = vpack.c.bf16 %v2410_v58, %v2410_v58  ;;  %v5018_v63 = vpack.c.bf16 %v2538_v59, %v2538_v59  ;;  %v5306_v0 = vpop.f32.mrb[8].mxu0  ;;  %v5434_v1 = vpop.f32.mrb[8].mxu1 }
 0x16b   : > { %3693 = vst.msk [vmem:[%s6332_s20 + $0x1c] sm:$0xf] %vm3685_vm0, %v4892_v60  ;;  %3821 = vst.msk [vmem:[%s6332_s20 + $0x21c] sm:$0xf] %vm3685_vm0, %v5020_v61  ;;  %v1423_v2 = vadd.f32 %v5306_v0, %v6317_v54  ;;  %v1935_v3 = vadd.f32 %v5434_v1, %v6317_v54  ;;  %v1414_v4 = vpop.f32.mrb[9].mxu0  ;;  %v1926_v5 = vpop.f32.mrb[9].mxu1 }
 0x16c   : > { %3691 = vst.msk [vmem:[%s6332_s20 + $0x14] sm:$0xf] %vm3685_vm0, %v4890_v62  ;;  %3819 = vst.msk [vmem:[%s6332_s20 + $0x214] sm:$0xf] %vm3685_vm0, %v5018_v63  ;;  %v1415_v8 = vadd.f32 %v6317_v54, %v1414_v4  ;;  %v1927_v9 = vadd.f32 %v6317_v54, %v1926_v5  ;;  %v5307_v10 = vpop.f32.mrb[10].mxu0  ;;  %v5435_v11 = vpop.f32.mrb[10].mxu1 }
 0x16d   : > { %v2415_v14 = vmax.f32 %v1423_v2, 0.0  ;;  %v2543_v15 = vmax.f32 %v1935_v3, 0.0  ;;  %v1426_v16 = vadd.f32 %v5307_v10, %v6317_v54  ;;  %v1938_v17 = vadd.f32 %v5435_v11, %v6317_v54  ;;  %v1417_v18 = vpop.f32.mrb[11].mxu0  ;;  %v1929_v19 = vpop.f32.mrb[11].mxu1 }
 0x16e   : > { %v2413_v20 = vmax.f32 %v1415_v8, 0.0  ;;  %v2541_v21 = vmax.f32 %v1927_v9, 0.0  ;;  %v1418_v22 = vadd.f32 %v6317_v54, %v1417_v18  ;;  %v1930_v23 = vadd.f32 %v6317_v54, %v1929_v19 }
 0x16f   : > { %v4895_v24 = vpack.c.bf16 %v2415_v14, %v2415_v14  ;;  %v5023_v25 = vpack.c.bf16 %v2543_v15, %v2543_v15  ;;  %v2416_v26 = vmax.f32 %v1426_v16, 0.0  ;;  %v2544_v27 = vmax.f32 %v1938_v17, 0.0  ;;  %5413 = vmatmul.mubr.bf16.gmra.mrb[116].mxu0 %v5820_v6  ;;  %5541 = vmatmul.mubr.bf16.gmra.mrb[116].mxu1 %v5821_v7  ;;  %v5828_v15 = vld [vmem:[%s6173_s22 + $0x1f8] sm:$0xff]  }
 0x170   : > { %v4893_v28 = vpack.c.bf16 %v2413_v20, %v2413_v20  ;;  %v5021_v29 = vpack.c.bf16 %v2541_v21, %v2541_v21  ;;  %v2414_v30 = vmax.f32 %v1418_v22, 0.0  ;;  %v2542_v31 = vmax.f32 %v1930_v23, 0.0  ;;  %5416 = vmatprep.mubr.bf16.mxu0 %v5822_v12  ;;  %5544 = vmatprep.mubr.bf16.mxu1 %v5823_v13  ;;  %v5829_v16 = vld [vmem:[%s6173_s22 + $0x3f8] sm:$0xff]   ;;  %s5141_s22 = sshll.u32 (%p7337_p6), %s5966_s15, 10 }
 0x171   : > { %3696 = vst.msk [vmem:[%s6332_s20 + $0x28] sm:$0xf] %vm3685_vm0, %v4895_v24  ;;  %3824 = vst.msk [vmem:[%s6332_s20 + $0x228] sm:$0xf] %vm3685_vm0, %v5023_v25  ;;  %v4896_v32 = vpack.c.bf16 %v2416_v26, %v2416_v26  ;;  %v5024_v33 = vpack.c.bf16 %v2544_v27, %v2544_v27  ;;  %s7119_s10 = scalar_lea.vmem (%p7337_p6), %s7322_s3, %s5141_s22  }
 0x172   : > { %3694 = vst.msk [vmem:[%s6332_s20 + $0x20] sm:$0xf] %vm3685_vm0, %v4893_v28  ;;  %3822 = vst.msk [vmem:[%s6332_s20 + $0x220] sm:$0xf] %vm3685_vm0, %v5021_v29  ;;  %v4894_v34 = vpack.c.bf16 %v2414_v30, %v2414_v30  ;;  %v5022_v35 = vpack.c.bf16 %v2542_v31, %v2542_v31  ;;  %v5310_v36 = vpop.f32.mrb[12].mxu0  ;;  %v5438_v37 = vpop.f32.mrb[12].mxu1 }
 0x173   : > { %3697 = vst.msk [vmem:[%s6332_s20 + $0x2c] sm:$0xf] %vm3685_vm0, %v4896_v32  ;;  %3825 = vst.msk [vmem:[%s6332_s20 + $0x22c] sm:$0xf] %vm3685_vm0, %v5024_v33  ;;  %v1439_v38 = vadd.f32 %v5310_v36, %v6317_v54  ;;  %v1951_v39 = vadd.f32 %v5438_v37, %v6317_v54  ;;  %v1430_v40 = vpop.f32.mrb[13].mxu0  ;;  %v1942_v41 = vpop.f32.mrb[13].mxu1 }
 0x174   : > { %3695 = vst.msk [vmem:[%s6332_s20 + $0x24] sm:$0xf] %vm3685_vm0, %v4894_v34  ;;  %3823 = vst.msk [vmem:[%s6332_s20 + $0x224] sm:$0xf] %vm3685_vm0, %v5022_v35  ;;  %v1431_v44 = vadd.f32 %v6317_v54, %v1430_v40  ;;  %v1943_v45 = vadd.f32 %v6317_v54, %v1942_v41  ;;  %v5311_v46 = vpop.f32.mrb[14].mxu0  ;;  %v5439_v47 = vpop.f32.mrb[14].mxu1 }
 0x175   : > { %v2419_v50 = vmax.f32 %v1439_v38, 0.0  ;;  %v2547_v51 = vmax.f32 %v1951_v39, 0.0  ;;  %v1442_v52 = vadd.f32 %v5311_v46, %v6317_v54  ;;  %v1954_v53 = vadd.f32 %v5439_v47, %v6317_v54  ;;  %v1433_v55 = vpop.f32.mrb[15].mxu0  ;;  %v1945_v56 = vpop.f32.mrb[15].mxu1 }
 0x176   : > { %v2417_v57 = vmax.f32 %v1431_v44, 0.0  ;;  %v2545_v58 = vmax.f32 %v1943_v45, 0.0  ;;  %v1434_v59 = vadd.f32 %v6317_v54, %v1433_v55  ;;  %v1946_v60 = vadd.f32 %v6317_v54, %v1945_v56 }
 0x177   : > { %v4899_v61 = vpack.c.bf16 %v2419_v50, %v2419_v50  ;;  %v5027_v62 = vpack.c.bf16 %v2547_v51, %v2547_v51  ;;  %v2420_v63 = vmax.f32 %v1442_v52, 0.0  ;;  %v2548_v0 = vmax.f32 %v1954_v53, 0.0  ;;  %5417 = vmatmul.mubr.bf16.gmra.mrb[120].mxu0 %v5824_v42  ;;  %5545 = vmatmul.mubr.bf16.gmra.mrb[120].mxu1 %v5825_v43 }
 0x178   : > { %v4897_v1 = vpack.c.bf16 %v2417_v57, %v2417_v57  ;;  %v5025_v2 = vpack.c.bf16 %v2545_v58, %v2545_v58  ;;  %v2418_v3 = vmax.f32 %v1434_v59, 0.0  ;;  %v2546_v4 = vmax.f32 %v1946_v60, 0.0  ;;  %5420 = vmatprep.mubr.bf16.mxu0 %v5826_v48  ;;  %5548 = vmatprep.mubr.bf16.mxu1 %v5827_v49 }
 0x179   : > { %3700 = vst.msk [vmem:[%s6332_s20 + $0x38] sm:$0xf] %vm3685_vm0, %v4899_v61  ;;  %3828 = vst.msk [vmem:[%s6332_s20 + $0x238] sm:$0xf] %vm3685_vm0, %v5027_v62  ;;  %v4900_v5 = vpack.c.bf16 %v2420_v63, %v2420_v63  ;;  %v5028_v6 = vpack.c.bf16 %v2548_v0, %v2548_v0 }
 0x17a   : > { %3698 = vst.msk [vmem:[%s6332_s20 + $0x30] sm:$0xf] %vm3685_vm0, %v4897_v1  ;;  %3826 = vst.msk [vmem:[%s6332_s20 + $0x230] sm:$0xf] %vm3685_vm0, %v5025_v2  ;;  %v4898_v7 = vpack.c.bf16 %v2418_v3, %v2418_v3  ;;  %v5026_v8 = vpack.c.bf16 %v2546_v4, %v2546_v4  ;;  %v5314_v9 = vpop.f32.mrb[16].mxu0  ;;  %v5442_v10 = vpop.f32.mrb[16].mxu1 }
 0x17b   : > { %3701 = vst.msk [vmem:[%s6332_s20 + $0x3c] sm:$0xf] %vm3685_vm0, %v4900_v5  ;;  %3829 = vst.msk [vmem:[%s6332_s20 + $0x23c] sm:$0xf] %vm3685_vm0, %v5028_v6  ;;  %v1455_v11 = vadd.f32 %v5314_v9, %v6317_v54  ;;  %v1967_v12 = vadd.f32 %v5442_v10, %v6317_v54  ;;  %v1446_v13 = vpop.f32.mrb[17].mxu0  ;;  %v1958_v14 = vpop.f32.mrb[17].mxu1 }
 0x17c   : > { %3699 = vst.msk [vmem:[%s6332_s20 + $0x34] sm:$0xf] %vm3685_vm0, %v4898_v7  ;;  %3827 = vst.msk [vmem:[%s6332_s20 + $0x234] sm:$0xf] %vm3685_vm0, %v5026_v8  ;;  %v1447_v17 = vadd.f32 %v6317_v54, %v1446_v13  ;;  %v1959_v18 = vadd.f32 %v6317_v54, %v1958_v14  ;;  %v5315_v19 = vpop.f32.mrb[18].mxu0  ;;  %v5443_v20 = vpop.f32.mrb[18].mxu1 }
 0x17d   : > { %v2423_v21 = vmax.f32 %v1455_v11, 0.0  ;;  %v2551_v22 = vmax.f32 %v1967_v12, 0.0  ;;  %v1458_v23 = vadd.f32 %v5315_v19, %v6317_v54  ;;  %v1970_v24 = vadd.f32 %v5443_v20, %v6317_v54  ;;  %v1449_v25 = vpop.f32.mrb[19].mxu0  ;;  %v1961_v26 = vpop.f32.mrb[19].mxu1 }
 0x17e   : > { %v2421_v27 = vmax.f32 %v1447_v17, 0.0  ;;  %v2549_v28 = vmax.f32 %v1959_v18, 0.0  ;;  %v1450_v29 = vadd.f32 %v6317_v54, %v1449_v25  ;;  %v1962_v30 = vadd.f32 %v6317_v54, %v1961_v26 }
 0x17f   : > { %v4903_v31 = vpack.c.bf16 %v2423_v21, %v2423_v21  ;;  %v5031_v32 = vpack.c.bf16 %v2551_v22, %v2551_v22  ;;  %v2424_v33 = vmax.f32 %v1458_v23, 0.0  ;;  %v2552_v34 = vmax.f32 %v1970_v24, 0.0  ;;  %5421 = vmatmul.mubr.bf16.gmra.mrb[124].mxu0 %v5828_v15  ;;  %5549 = vmatmul.mubr.bf16.gmra.mrb[124].mxu1 %v5829_v16 }
 0x180   : > { %v4901_v35 = vpack.c.bf16 %v2421_v27, %v2421_v27  ;;  %v5029_v36 = vpack.c.bf16 %v2549_v28, %v2549_v28  ;;  %v2422_v37 = vmax.f32 %v1450_v29, 0.0  ;;  %v2550_v38 = vmax.f32 %v1962_v30, 0.0 }
 0x181   : > { %3704 = vst.msk [vmem:[%s6332_s20 + $0x48] sm:$0xf] %vm3685_vm0, %v4903_v31  ;;  %3832 = vst.msk [vmem:[%s6332_s20 + $0x248] sm:$0xf] %vm3685_vm0, %v5031_v32  ;;  %v4904_v39 = vpack.c.bf16 %v2424_v33, %v2424_v33  ;;  %v5032_v40 = vpack.c.bf16 %v2552_v34, %v2552_v34 }
 0x182   : > { %3702 = vst.msk [vmem:[%s6332_s20 + $0x40] sm:$0xf] %vm3685_vm0, %v4901_v35  ;;  %3830 = vst.msk [vmem:[%s6332_s20 + $0x240] sm:$0xf] %vm3685_vm0, %v5029_v36  ;;  %v4902_v41 = vpack.c.bf16 %v2422_v37, %v2422_v37  ;;  %v5030_v42 = vpack.c.bf16 %v2550_v38, %v2550_v38  ;;  %v5318_v43 = vpop.f32.mrb[20].mxu0  ;;  %v5446_v44 = vpop.f32.mrb[20].mxu1 }
 0x183   : > { %3705 = vst.msk [vmem:[%s6332_s20 + $0x4c] sm:$0xf] %vm3685_vm0, %v4904_v39  ;;  %3833 = vst.msk [vmem:[%s6332_s20 + $0x24c] sm:$0xf] %vm3685_vm0, %v5032_v40  ;;  %v1471_v45 = vadd.f32 %v5318_v43, %v6317_v54  ;;  %v1983_v46 = vadd.f32 %v5446_v44, %v6317_v54  ;;  %v1462_v47 = vpop.f32.mrb[21].mxu0  ;;  %v1974_v48 = vpop.f32.mrb[21].mxu1 }
 0x184   : > { %3703 = vst.msk [vmem:[%s6332_s20 + $0x44] sm:$0xf] %vm3685_vm0, %v4902_v41  ;;  %3831 = vst.msk [vmem:[%s6332_s20 + $0x244] sm:$0xf] %vm3685_vm0, %v5030_v42  ;;  %v1463_v49 = vadd.f32 %v6317_v54, %v1462_v47  ;;  %v1975_v50 = vadd.f32 %v6317_v54, %v1974_v48  ;;  %v5319_v51 = vpop.f32.mrb[22].mxu0  ;;  %v5447_v52 = vpop.f32.mrb[22].mxu1 }
 0x185   : > { %v2427_v53 = vmax.f32 %v1471_v45, 0.0  ;;  %v2555_v55 = vmax.f32 %v1983_v46, 0.0  ;;  %v1474_v56 = vadd.f32 %v5319_v51, %v6317_v54  ;;  %v1986_v57 = vadd.f32 %v5447_v52, %v6317_v54  ;;  %v1465_v58 = vpop.f32.mrb[23].mxu0  ;;  %v1977_v59 = vpop.f32.mrb[23].mxu1 }
 0x186   : > { %v2425_v60 = vmax.f32 %v1463_v49, 0.0  ;;  %v2553_v61 = vmax.f32 %v1975_v50, 0.0  ;;  %v1466_v62 = vadd.f32 %v6317_v54, %v1465_v58  ;;  %v1978_v63 = vadd.f32 %v6317_v54, %v1977_v59 }
 0x187   : > { %v4907_v0 = vpack.c.bf16 %v2427_v53, %v2427_v53  ;;  %v5035_v1 = vpack.c.bf16 %v2555_v55, %v2555_v55  ;;  %v2428_v2 = vmax.f32 %v1474_v56, 0.0  ;;  %v2556_v3 = vmax.f32 %v1986_v57, 0.0 }
 0x188   : > { %v4905_v4 = vpack.c.bf16 %v2425_v60, %v2425_v60  ;;  %v5033_v5 = vpack.c.bf16 %v2553_v61, %v2553_v61  ;;  %v2426_v6 = vmax.f32 %v1466_v62, 0.0  ;;  %v2554_v7 = vmax.f32 %v1978_v63, 0.0 }
 0x189   : > { %3708 = vst.msk [vmem:[%s6332_s20 + $0x58] sm:$0xf] %vm3685_vm0, %v4907_v0  ;;  %3836 = vst.msk [vmem:[%s6332_s20 + $0x258] sm:$0xf] %vm3685_vm0, %v5035_v1  ;;  %v4908_v8 = vpack.c.bf16 %v2428_v2, %v2428_v2  ;;  %v5036_v9 = vpack.c.bf16 %v2556_v3, %v2556_v3 }
 0x18a   : > { %3706 = vst.msk [vmem:[%s6332_s20 + $0x50] sm:$0xf] %vm3685_vm0, %v4905_v4  ;;  %3834 = vst.msk [vmem:[%s6332_s20 + $0x250] sm:$0xf] %vm3685_vm0, %v5033_v5  ;;  %v4906_v10 = vpack.c.bf16 %v2426_v6, %v2426_v6  ;;  %v5034_v11 = vpack.c.bf16 %v2554_v7, %v2554_v7  ;;  %v5322_v12 = vpop.f32.mrb[24].mxu0  ;;  %v5450_v13 = vpop.f32.mrb[24].mxu1 }
 0x18b   : > { %3709 = vst.msk [vmem:[%s6332_s20 + $0x5c] sm:$0xf] %vm3685_vm0, %v4908_v8  ;;  %3837 = vst.msk [vmem:[%s6332_s20 + $0x25c] sm:$0xf] %vm3685_vm0, %v5036_v9  ;;  %v1487_v14 = vadd.f32 %v5322_v12, %v6317_v54  ;;  %v1999_v15 = vadd.f32 %v5450_v13, %v6317_v54  ;;  %v1478_v16 = vpop.f32.mrb[25].mxu0  ;;  %v1990_v17 = vpop.f32.mrb[25].mxu1 }
 0x18c   : > { %3707 = vst.msk [vmem:[%s6332_s20 + $0x54] sm:$0xf] %vm3685_vm0, %v4906_v10  ;;  %3835 = vst.msk [vmem:[%s6332_s20 + $0x254] sm:$0xf] %vm3685_vm0, %v5034_v11  ;;  %v1479_v18 = vadd.f32 %v6317_v54, %v1478_v16  ;;  %v1991_v19 = vadd.f32 %v6317_v54, %v1990_v17  ;;  %v5323_v20 = vpop.f32.mrb[26].mxu0  ;;  %v5451_v21 = vpop.f32.mrb[26].mxu1 }
 0x18d   : > { %v2431_v22 = vmax.f32 %v1487_v14, 0.0  ;;  %v2559_v23 = vmax.f32 %v1999_v15, 0.0  ;;  %v1490_v24 = vadd.f32 %v5323_v20, %v6317_v54  ;;  %v2002_v25 = vadd.f32 %v5451_v21, %v6317_v54  ;;  %v1481_v26 = vpop.f32.mrb[27].mxu0  ;;  %v1993_v27 = vpop.f32.mrb[27].mxu1 }
 0x18e   : > { %v2429_v28 = vmax.f32 %v1479_v18, 0.0  ;;  %v2557_v29 = vmax.f32 %v1991_v19, 0.0  ;;  %v1482_v30 = vadd.f32 %v6317_v54, %v1481_v26  ;;  %v1994_v31 = vadd.f32 %v6317_v54, %v1993_v27 }
 0x18f   : > { %v4911_v32 = vpack.c.bf16 %v2431_v22, %v2431_v22  ;;  %v5039_v33 = vpack.c.bf16 %v2559_v23, %v2559_v23  ;;  %v2432_v34 = vmax.f32 %v1490_v24, 0.0  ;;  %v2560_v35 = vmax.f32 %v2002_v25, 0.0 }
 0x190   : > { %v4909_v36 = vpack.c.bf16 %v2429_v28, %v2429_v28  ;;  %v5037_v37 = vpack.c.bf16 %v2557_v29, %v2557_v29  ;;  %v2430_v38 = vmax.f32 %v1482_v30, 0.0  ;;  %v2558_v39 = vmax.f32 %v1994_v31, 0.0 }
 0x191   : > { %3712 = vst.msk [vmem:[%s6332_s20 + $0x68] sm:$0xf] %vm3685_vm0, %v4911_v32  ;;  %3840 = vst.msk [vmem:[%s6332_s20 + $0x268] sm:$0xf] %vm3685_vm0, %v5039_v33  ;;  %v4912_v40 = vpack.c.bf16 %v2432_v34, %v2432_v34  ;;  %v5040_v41 = vpack.c.bf16 %v2560_v35, %v2560_v35 }
 0x192   : > { %3710 = vst.msk [vmem:[%s6332_s20 + $0x60] sm:$0xf] %vm3685_vm0, %v4909_v36  ;;  %3838 = vst.msk [vmem:[%s6332_s20 + $0x260] sm:$0xf] %vm3685_vm0, %v5037_v37  ;;  %v4910_v42 = vpack.c.bf16 %v2430_v38, %v2430_v38  ;;  %v5038_v43 = vpack.c.bf16 %v2558_v39, %v2558_v39  ;;  %v5326_v44 = vpop.f32.mrb[28].mxu0  ;;  %v5454_v45 = vpop.f32.mrb[28].mxu1 }
 0x193   : > { %3713 = vst.msk [vmem:[%s6332_s20 + $0x6c] sm:$0xf] %vm3685_vm0, %v4912_v40  ;;  %3841 = vst.msk [vmem:[%s6332_s20 + $0x26c] sm:$0xf] %vm3685_vm0, %v5040_v41  ;;  %v1503_v46 = vadd.f32 %v5326_v44, %v6317_v54  ;;  %v2015_v47 = vadd.f32 %v5454_v45, %v6317_v54  ;;  %v1494_v48 = vpop.f32.mrb[29].mxu0  ;;  %v2006_v49 = vpop.f32.mrb[29].mxu1 }
 0x194   : > { %3711 = vst.msk [vmem:[%s6332_s20 + $0x64] sm:$0xf] %vm3685_vm0, %v4910_v42  ;;  %3839 = vst.msk [vmem:[%s6332_s20 + $0x264] sm:$0xf] %vm3685_vm0, %v5038_v43  ;;  %v1495_v50 = vadd.f32 %v6317_v54, %v1494_v48  ;;  %v2007_v51 = vadd.f32 %v6317_v54, %v2006_v49  ;;  %v5327_v52 = vpop.f32.mrb[30].mxu0  ;;  %v5455_v53 = vpop.f32.mrb[30].mxu1 }
 0x195   : > { %v2435_v55 = vmax.f32 %v1503_v46, 0.0  ;;  %v2563_v56 = vmax.f32 %v2015_v47, 0.0  ;;  %v1506_v57 = vadd.f32 %v5327_v52, %v6317_v54  ;;  %v2018_v58 = vadd.f32 %v5455_v53, %v6317_v54  ;;  %v1497_v59 = vpop.f32.mrb[31].mxu0  ;;  %v2009_v60 = vpop.f32.mrb[31].mxu1 }
 0x196   : > { %v2433_v61 = vmax.f32 %v1495_v50, 0.0  ;;  %v2561_v62 = vmax.f32 %v2007_v51, 0.0  ;;  %v1498_v63 = vadd.f32 %v6317_v54, %v1497_v59  ;;  %v2010_v0 = vadd.f32 %v6317_v54, %v2009_v60 }
 0x197   : > { %v4915_v1 = vpack.c.bf16 %v2435_v55, %v2435_v55  ;;  %v5043_v2 = vpack.c.bf16 %v2563_v56, %v2563_v56  ;;  %v2436_v3 = vmax.f32 %v1506_v57, 0.0  ;;  %v2564_v4 = vmax.f32 %v2018_v58, 0.0 }
 0x198   : > { %v4913_v5 = vpack.c.bf16 %v2433_v61, %v2433_v61  ;;  %v5041_v6 = vpack.c.bf16 %v2561_v62, %v2561_v62  ;;  %v2434_v7 = vmax.f32 %v1498_v63, 0.0  ;;  %v2562_v8 = vmax.f32 %v2010_v0, 0.0 }
 0x199   : > { %3716 = vst.msk [vmem:[%s6332_s20 + $0x78] sm:$0xf] %vm3685_vm0, %v4915_v1  ;;  %3844 = vst.msk [vmem:[%s6332_s20 + $0x278] sm:$0xf] %vm3685_vm0, %v5043_v2  ;;  %v4916_v9 = vpack.c.bf16 %v2436_v3, %v2436_v3  ;;  %v5044_v10 = vpack.c.bf16 %v2564_v4, %v2564_v4 }
 0x19a   : > { %3714 = vst.msk [vmem:[%s6332_s20 + $0x70] sm:$0xf] %vm3685_vm0, %v4913_v5  ;;  %3842 = vst.msk [vmem:[%s6332_s20 + $0x270] sm:$0xf] %vm3685_vm0, %v5041_v6  ;;  %v4914_v11 = vpack.c.bf16 %v2434_v7, %v2434_v7  ;;  %v5042_v12 = vpack.c.bf16 %v2562_v8, %v2562_v8  ;;  %v5330_v13 = vpop.f32.mrb[32].mxu0  ;;  %v5458_v14 = vpop.f32.mrb[32].mxu1 }
 0x19b   : > { %3717 = vst.msk [vmem:[%s6332_s20 + $0x7c] sm:$0xf] %vm3685_vm0, %v4916_v9  ;;  %3845 = vst.msk [vmem:[%s6332_s20 + $0x27c] sm:$0xf] %vm3685_vm0, %v5044_v10  ;;  %v1519_v15 = vadd.f32 %v5330_v13, %v6317_v54  ;;  %v2031_v16 = vadd.f32 %v5458_v14, %v6317_v54  ;;  %v1510_v17 = vpop.f32.mrb[33].mxu0  ;;  %v2022_v18 = vpop.f32.mrb[33].mxu1 }
 0x19c   : > { %3715 = vst.msk [vmem:[%s6332_s20 + $0x74] sm:$0xf] %vm3685_vm0, %v4914_v11  ;;  %3843 = vst.msk [vmem:[%s6332_s20 + $0x274] sm:$0xf] %vm3685_vm0, %v5042_v12  ;;  %v1511_v19 = vadd.f32 %v6317_v54, %v1510_v17  ;;  %v2023_v20 = vadd.f32 %v6317_v54, %v2022_v18  ;;  %v5331_v21 = vpop.f32.mrb[34].mxu0  ;;  %v5459_v22 = vpop.f32.mrb[34].mxu1 }
 0x19d   : > { %v2439_v23 = vmax.f32 %v1519_v15, 0.0  ;;  %v2567_v24 = vmax.f32 %v2031_v16, 0.0  ;;  %v1522_v25 = vadd.f32 %v5331_v21, %v6317_v54  ;;  %v2034_v26 = vadd.f32 %v5459_v22, %v6317_v54  ;;  %v1513_v27 = vpop.f32.mrb[35].mxu0  ;;  %v2025_v28 = vpop.f32.mrb[35].mxu1 }
 0x19e   : > { %v2437_v29 = vmax.f32 %v1511_v19, 0.0  ;;  %v2565_v30 = vmax.f32 %v2023_v20, 0.0  ;;  %v1514_v31 = vadd.f32 %v6317_v54, %v1513_v27  ;;  %v2026_v32 = vadd.f32 %v6317_v54, %v2025_v28 }
 0x19f   : > { %v4919_v33 = vpack.c.bf16 %v2439_v23, %v2439_v23  ;;  %v5047_v34 = vpack.c.bf16 %v2567_v24, %v2567_v24  ;;  %v2440_v35 = vmax.f32 %v1522_v25, 0.0  ;;  %v2568_v36 = vmax.f32 %v2034_v26, 0.0 }
 0x1a0   : > { %v4917_v37 = vpack.c.bf16 %v2437_v29, %v2437_v29  ;;  %v5045_v38 = vpack.c.bf16 %v2565_v30, %v2565_v30  ;;  %v2438_v39 = vmax.f32 %v1514_v31, 0.0  ;;  %v2566_v40 = vmax.f32 %v2026_v32, 0.0 }
 0x1a1   : > { %3720 = vst.msk [vmem:[%s6332_s20 + $0x88] sm:$0xf] %vm3685_vm0, %v4919_v33  ;;  %3848 = vst.msk [vmem:[%s6332_s20 + $0x288] sm:$0xf] %vm3685_vm0, %v5047_v34  ;;  %v4920_v41 = vpack.c.bf16 %v2440_v35, %v2440_v35  ;;  %v5048_v42 = vpack.c.bf16 %v2568_v36, %v2568_v36 }
 0x1a2   : > { %3718 = vst.msk [vmem:[%s6332_s20 + $0x80] sm:$0xf] %vm3685_vm0, %v4917_v37  ;;  %3846 = vst.msk [vmem:[%s6332_s20 + $0x280] sm:$0xf] %vm3685_vm0, %v5045_v38  ;;  %v4918_v43 = vpack.c.bf16 %v2438_v39, %v2438_v39  ;;  %v5046_v44 = vpack.c.bf16 %v2566_v40, %v2566_v40  ;;  %v5334_v45 = vpop.f32.mrb[36].mxu0  ;;  %v5462_v46 = vpop.f32.mrb[36].mxu1 }
 0x1a3   : > { %3721 = vst.msk [vmem:[%s6332_s20 + $0x8c] sm:$0xf] %vm3685_vm0, %v4920_v41  ;;  %3849 = vst.msk [vmem:[%s6332_s20 + $0x28c] sm:$0xf] %vm3685_vm0, %v5048_v42  ;;  %v1535_v47 = vadd.f32 %v5334_v45, %v6317_v54  ;;  %v2047_v48 = vadd.f32 %v5462_v46, %v6317_v54  ;;  %v1526_v49 = vpop.f32.mrb[37].mxu0  ;;  %v2038_v50 = vpop.f32.mrb[37].mxu1 }
 0x1a4   : > { %3719 = vst.msk [vmem:[%s6332_s20 + $0x84] sm:$0xf] %vm3685_vm0, %v4918_v43  ;;  %3847 = vst.msk [vmem:[%s6332_s20 + $0x284] sm:$0xf] %vm3685_vm0, %v5046_v44  ;;  %v1527_v51 = vadd.f32 %v6317_v54, %v1526_v49  ;;  %v2039_v52 = vadd.f32 %v6317_v54, %v2038_v50  ;;  %v5335_v53 = vpop.f32.mrb[38].mxu0  ;;  %v5463_v55 = vpop.f32.mrb[38].mxu1 }
 0x1a5   : > { %v2443_v56 = vmax.f32 %v1535_v47, 0.0  ;;  %v2571_v57 = vmax.f32 %v2047_v48, 0.0  ;;  %v1538_v58 = vadd.f32 %v5335_v53, %v6317_v54  ;;  %v2050_v59 = vadd.f32 %v5463_v55, %v6317_v54  ;;  %v1529_v60 = vpop.f32.mrb[39].mxu0  ;;  %v2041_v61 = vpop.f32.mrb[39].mxu1 }
 0x1a6   : > { %v2441_v62 = vmax.f32 %v1527_v51, 0.0  ;;  %v2569_v63 = vmax.f32 %v2039_v52, 0.0  ;;  %v1530_v0 = vadd.f32 %v6317_v54, %v1529_v60  ;;  %v2042_v1 = vadd.f32 %v6317_v54, %v2041_v61 }
 0x1a7   : > { %v4923_v2 = vpack.c.bf16 %v2443_v56, %v2443_v56  ;;  %v5051_v3 = vpack.c.bf16 %v2571_v57, %v2571_v57  ;;  %v2444_v4 = vmax.f32 %v1538_v58, 0.0  ;;  %v2572_v5 = vmax.f32 %v2050_v59, 0.0 }
 0x1a8   : > { %v4921_v6 = vpack.c.bf16 %v2441_v62, %v2441_v62  ;;  %v5049_v7 = vpack.c.bf16 %v2569_v63, %v2569_v63  ;;  %v2442_v8 = vmax.f32 %v1530_v0, 0.0  ;;  %v2570_v9 = vmax.f32 %v2042_v1, 0.0 }
 0x1a9   : > { %3724 = vst.msk [vmem:[%s6332_s20 + $0x98] sm:$0xf] %vm3685_vm0, %v4923_v2  ;;  %3852 = vst.msk [vmem:[%s6332_s20 + $0x298] sm:$0xf] %vm3685_vm0, %v5051_v3  ;;  %v4924_v10 = vpack.c.bf16 %v2444_v4, %v2444_v4  ;;  %v5052_v11 = vpack.c.bf16 %v2572_v5, %v2572_v5 }
 0x1aa   : > { %3722 = vst.msk [vmem:[%s6332_s20 + $0x90] sm:$0xf] %vm3685_vm0, %v4921_v6  ;;  %3850 = vst.msk [vmem:[%s6332_s20 + $0x290] sm:$0xf] %vm3685_vm0, %v5049_v7  ;;  %v4922_v12 = vpack.c.bf16 %v2442_v8, %v2442_v8  ;;  %v5050_v13 = vpack.c.bf16 %v2570_v9, %v2570_v9  ;;  %v5338_v14 = vpop.f32.mrb[40].mxu0  ;;  %v5466_v15 = vpop.f32.mrb[40].mxu1 }
 0x1ab   : > { %3725 = vst.msk [vmem:[%s6332_s20 + $0x9c] sm:$0xf] %vm3685_vm0, %v4924_v10  ;;  %3853 = vst.msk [vmem:[%s6332_s20 + $0x29c] sm:$0xf] %vm3685_vm0, %v5052_v11  ;;  %v1551_v16 = vadd.f32 %v5338_v14, %v6317_v54  ;;  %v2063_v17 = vadd.f32 %v5466_v15, %v6317_v54  ;;  %v1542_v18 = vpop.f32.mrb[41].mxu0  ;;  %v2054_v19 = vpop.f32.mrb[41].mxu1 }
 0x1ac   : > { %3723 = vst.msk [vmem:[%s6332_s20 + $0x94] sm:$0xf] %vm3685_vm0, %v4922_v12  ;;  %3851 = vst.msk [vmem:[%s6332_s20 + $0x294] sm:$0xf] %vm3685_vm0, %v5050_v13  ;;  %v1543_v20 = vadd.f32 %v6317_v54, %v1542_v18  ;;  %v2055_v21 = vadd.f32 %v6317_v54, %v2054_v19  ;;  %v5339_v22 = vpop.f32.mrb[42].mxu0  ;;  %v5467_v23 = vpop.f32.mrb[42].mxu1 }
 0x1ad   : > { %v2447_v24 = vmax.f32 %v1551_v16, 0.0  ;;  %v2575_v25 = vmax.f32 %v2063_v17, 0.0  ;;  %v1554_v26 = vadd.f32 %v5339_v22, %v6317_v54  ;;  %v2066_v27 = vadd.f32 %v5467_v23, %v6317_v54  ;;  %v1545_v28 = vpop.f32.mrb[43].mxu0  ;;  %v2057_v29 = vpop.f32.mrb[43].mxu1  ;;  %v6624_v16 = vld [vmem:[#allocation4] ss:$0 sm:$0xff] }
 0x1ae   : > { %v2445_v30 = vmax.f32 %v1543_v20, 0.0  ;;  %v2573_v31 = vmax.f32 %v2055_v21, 0.0  ;;  %v1546_v32 = vadd.f32 %v6317_v54, %v1545_v28  ;;  %v2058_v33 = vadd.f32 %v6317_v54, %v2057_v29 }
 0x1af   : > { %v4927_v34 = vpack.c.bf16 %v2447_v24, %v2447_v24  ;;  %v5055_v35 = vpack.c.bf16 %v2575_v25, %v2575_v25  ;;  %v2448_v36 = vmax.f32 %v1554_v26, 0.0  ;;  %v2576_v37 = vmax.f32 %v2066_v27, 0.0 }
 0x1b0   : > { %v4925_v38 = vpack.c.bf16 %v2445_v30, %v2445_v30  ;;  %v5053_v39 = vpack.c.bf16 %v2573_v31, %v2573_v31  ;;  %v2446_v40 = vmax.f32 %v1546_v32, 0.0  ;;  %v2574_v41 = vmax.f32 %v2058_v33, 0.0 }
 0x1b1   : > { %3728 = vst.msk [vmem:[%s6332_s20 + $0xa8] sm:$0xf] %vm3685_vm0, %v4927_v34  ;;  %3856 = vst.msk [vmem:[%s6332_s20 + $0x2a8] sm:$0xf] %vm3685_vm0, %v5055_v35  ;;  %v4928_v42 = vpack.c.bf16 %v2448_v36, %v2448_v36  ;;  %v5056_v43 = vpack.c.bf16 %v2576_v37, %v2576_v37 }
 0x1b2   : > { %3726 = vst.msk [vmem:[%s6332_s20 + $0xa0] sm:$0xf] %vm3685_vm0, %v4925_v38  ;;  %3854 = vst.msk [vmem:[%s6332_s20 + $0x2a0] sm:$0xf] %vm3685_vm0, %v5053_v39  ;;  %v4926_v44 = vpack.c.bf16 %v2446_v40, %v2446_v40  ;;  %v5054_v45 = vpack.c.bf16 %v2574_v41, %v2574_v41  ;;  %v5342_v46 = vpop.f32.mrb[44].mxu0  ;;  %v5470_v47 = vpop.f32.mrb[44].mxu1 }
 0x1b3   : > { %3729 = vst.msk [vmem:[%s6332_s20 + $0xac] sm:$0xf] %vm3685_vm0, %v4928_v42  ;;  %3857 = vst.msk [vmem:[%s6332_s20 + $0x2ac] sm:$0xf] %vm3685_vm0, %v5056_v43  ;;  %v1567_v48 = vadd.f32 %v5342_v46, %v6317_v54  ;;  %v2079_v49 = vadd.f32 %v5470_v47, %v6317_v54  ;;  %v1558_v50 = vpop.f32.mrb[45].mxu0  ;;  %v2070_v51 = vpop.f32.mrb[45].mxu1 }
 0x1b4   : > { %3727 = vst.msk [vmem:[%s6332_s20 + $0xa4] sm:$0xf] %vm3685_vm0, %v4926_v44  ;;  %3855 = vst.msk [vmem:[%s6332_s20 + $0x2a4] sm:$0xf] %vm3685_vm0, %v5054_v45  ;;  %v1559_v52 = vadd.f32 %v6317_v54, %v1558_v50  ;;  %v2071_v53 = vadd.f32 %v6317_v54, %v2070_v51  ;;  %v5343_v55 = vpop.f32.mrb[46].mxu0  ;;  %v5471_v56 = vpop.f32.mrb[46].mxu1 }
 0x1b5   : > { %v2451_v57 = vmax.f32 %v1567_v48, 0.0  ;;  %v2579_v58 = vmax.f32 %v2079_v49, 0.0  ;;  %v1570_v59 = vadd.f32 %v5343_v55, %v6317_v54  ;;  %v2082_v60 = vadd.f32 %v5471_v56, %v6317_v54  ;;  %v1561_v61 = vpop.f32.mrb[47].mxu0  ;;  %v2073_v62 = vpop.f32.mrb[47].mxu1 }
 0x1b6   : > { %v2449_v63 = vmax.f32 %v1559_v52, 0.0  ;;  %v2577_v0 = vmax.f32 %v2071_v53, 0.0  ;;  %v1562_v1 = vadd.f32 %v6317_v54, %v1561_v61  ;;  %v2074_v2 = vadd.f32 %v6317_v54, %v2073_v62 }
 0x1b7   : > { %v4931_v3 = vpack.c.bf16 %v2451_v57, %v2451_v57  ;;  %v5059_v4 = vpack.c.bf16 %v2579_v58, %v2579_v58  ;;  %v2452_v5 = vmax.f32 %v1570_v59, 0.0  ;;  %v2580_v6 = vmax.f32 %v2082_v60, 0.0 }
 0x1b8   : > { %v4929_v7 = vpack.c.bf16 %v2449_v63, %v2449_v63  ;;  %v5057_v8 = vpack.c.bf16 %v2577_v0, %v2577_v0  ;;  %v2450_v9 = vmax.f32 %v1562_v1, 0.0  ;;  %v2578_v10 = vmax.f32 %v2074_v2, 0.0 }
 0x1b9   : > { %3732 = vst.msk [vmem:[%s6332_s20 + $0xb8] sm:$0xf] %vm3685_vm0, %v4931_v3  ;;  %3860 = vst.msk [vmem:[%s6332_s20 + $0x2b8] sm:$0xf] %vm3685_vm0, %v5059_v4  ;;  %v4932_v11 = vpack.c.bf16 %v2452_v5, %v2452_v5  ;;  %v5060_v12 = vpack.c.bf16 %v2580_v6, %v2580_v6 }
 0x1ba   : > { %3730 = vst.msk [vmem:[%s6332_s20 + $0xb0] sm:$0xf] %vm3685_vm0, %v4929_v7  ;;  %3858 = vst.msk [vmem:[%s6332_s20 + $0x2b0] sm:$0xf] %vm3685_vm0, %v5057_v8  ;;  %v4930_v54 = vpack.c.bf16 %v2450_v9, %v2450_v9  ;;  %v5058_v13 = vpack.c.bf16 %v2578_v10, %v2578_v10  ;;  %v5346_v14 = vpop.f32.mrb[48].mxu0  ;;  %v5474_v15 = vpop.f32.mrb[48].mxu1 }
 0x1bb   : > { %3733 = vst.msk [vmem:[%s6332_s20 + $0xbc] sm:$0xf] %vm3685_vm0, %v4932_v11  ;;  %3861 = vst.msk [vmem:[%s6332_s20 + $0x2bc] sm:$0xf] %vm3685_vm0, %v5060_v12  ;;  %v1583_v17 = vadd.f32 %v6624_v16, %v5346_v14  ;;  %v2095_v18 = vadd.f32 %v6624_v16, %v5474_v15  ;;  %v1574_v19 = vpop.f32.mrb[49].mxu0  ;;  %v2086_v20 = vpop.f32.mrb[49].mxu1 }
 0x1bc   : > { %3731 = vst.msk [vmem:[%s6332_s20 + $0xb4] sm:$0xf] %vm3685_vm0, %v4930_v54  ;;  %3859 = vst.msk [vmem:[%s6332_s20 + $0x2b4] sm:$0xf] %vm3685_vm0, %v5058_v13  ;;  %v1575_v21 = vadd.f32 %v6624_v16, %v1574_v19  ;;  %v2087_v22 = vadd.f32 %v6624_v16, %v2086_v20  ;;  %v5347_v23 = vpop.f32.mrb[50].mxu0  ;;  %v5475_v24 = vpop.f32.mrb[50].mxu1 }
 0x1bd   : > { %v2455_v25 = vmax.f32 %v1583_v17, 0.0  ;;  %v2583_v26 = vmax.f32 %v2095_v18, 0.0  ;;  %v1586_v27 = vadd.f32 %v6624_v16, %v5347_v23  ;;  %v2098_v28 = vadd.f32 %v6624_v16, %v5475_v24  ;;  %v1577_v29 = vpop.f32.mrb[51].mxu0  ;;  %v2089_v30 = vpop.f32.mrb[51].mxu1 }
 0x1be   : > { %v2453_v31 = vmax.f32 %v1575_v21, 0.0  ;;  %v2581_v32 = vmax.f32 %v2087_v22, 0.0  ;;  %v1578_v33 = vadd.f32 %v6624_v16, %v1577_v29  ;;  %v2090_v34 = vadd.f32 %v6624_v16, %v2089_v30 }
 0x1bf   : > { %v4935_v35 = vpack.c.bf16 %v2455_v25, %v2455_v25  ;;  %v5063_v36 = vpack.c.bf16 %v2583_v26, %v2583_v26  ;;  %v2456_v37 = vmax.f32 %v1586_v27, 0.0  ;;  %v2584_v38 = vmax.f32 %v2098_v28, 0.0 }
 0x1c0   : > { %v4933_v39 = vpack.c.bf16 %v2453_v31, %v2453_v31  ;;  %v5061_v40 = vpack.c.bf16 %v2581_v32, %v2581_v32  ;;  %v2454_v41 = vmax.f32 %v1578_v33, 0.0  ;;  %v2582_v42 = vmax.f32 %v2090_v34, 0.0 }
 0x1c1   : > { %3736 = vst.msk [vmem:[%s6332_s20 + $0xc8] sm:$0xf] %vm3685_vm0, %v4935_v35  ;;  %3864 = vst.msk [vmem:[%s6332_s20 + $0x2c8] sm:$0xf] %vm3685_vm0, %v5063_v36  ;;  %v4936_v43 = vpack.c.bf16 %v2456_v37, %v2456_v37  ;;  %v5064_v44 = vpack.c.bf16 %v2584_v38, %v2584_v38 }
 0x1c2   : > { %3734 = vst.msk [vmem:[%s6332_s20 + $0xc0] sm:$0xf] %vm3685_vm0, %v4933_v39  ;;  %3862 = vst.msk [vmem:[%s6332_s20 + $0x2c0] sm:$0xf] %vm3685_vm0, %v5061_v40  ;;  %v4934_v45 = vpack.c.bf16 %v2454_v41, %v2454_v41  ;;  %v5062_v46 = vpack.c.bf16 %v2582_v42, %v2582_v42  ;;  %v5350_v47 = vpop.f32.mrb[52].mxu0  ;;  %v5478_v48 = vpop.f32.mrb[52].mxu1 }
 0x1c3   : > { %3737 = vst.msk [vmem:[%s6332_s20 + $0xcc] sm:$0xf] %vm3685_vm0, %v4936_v43  ;;  %3865 = vst.msk [vmem:[%s6332_s20 + $0x2cc] sm:$0xf] %vm3685_vm0, %v5064_v44  ;;  %v1599_v49 = vadd.f32 %v6624_v16, %v5350_v47  ;;  %v2111_v50 = vadd.f32 %v6624_v16, %v5478_v48  ;;  %v1590_v51 = vpop.f32.mrb[53].mxu0  ;;  %v2102_v52 = vpop.f32.mrb[53].mxu1 }
 0x1c4   : > { %3735 = vst.msk [vmem:[%s6332_s20 + $0xc4] sm:$0xf] %vm3685_vm0, %v4934_v45  ;;  %3863 = vst.msk [vmem:[%s6332_s20 + $0x2c4] sm:$0xf] %vm3685_vm0, %v5062_v46  ;;  %v1591_v53 = vadd.f32 %v6624_v16, %v1590_v51  ;;  %v2103_v55 = vadd.f32 %v6624_v16, %v2102_v52  ;;  %v5351_v56 = vpop.f32.mrb[54].mxu0  ;;  %v5479_v57 = vpop.f32.mrb[54].mxu1 }
 0x1c5   : > { %v2459_v58 = vmax.f32 %v1599_v49, 0.0  ;;  %v2587_v59 = vmax.f32 %v2111_v50, 0.0  ;;  %v1602_v60 = vadd.f32 %v6624_v16, %v5351_v56  ;;  %v2114_v61 = vadd.f32 %v6624_v16, %v5479_v57  ;;  %v1593_v62 = vpop.f32.mrb[55].mxu0  ;;  %v2105_v63 = vpop.f32.mrb[55].mxu1 }
 0x1c6   : > { %v2457_v0 = vmax.f32 %v1591_v53, 0.0  ;;  %v2585_v1 = vmax.f32 %v2103_v55, 0.0  ;;  %v1594_v2 = vadd.f32 %v6624_v16, %v1593_v62  ;;  %v2106_v3 = vadd.f32 %v6624_v16, %v2105_v63 }
 0x1c7   : > { %v4939_v4 = vpack.c.bf16 %v2459_v58, %v2459_v58  ;;  %v5067_v5 = vpack.c.bf16 %v2587_v59, %v2587_v59  ;;  %v2460_v6 = vmax.f32 %v1602_v60, 0.0  ;;  %v2588_v7 = vmax.f32 %v2114_v61, 0.0 }
 0x1c8   : > { %v4937_v8 = vpack.c.bf16 %v2457_v0, %v2457_v0  ;;  %v5065_v9 = vpack.c.bf16 %v2585_v1, %v2585_v1  ;;  %v2458_v10 = vmax.f32 %v1594_v2, 0.0  ;;  %v2586_v11 = vmax.f32 %v2106_v3, 0.0 }
 0x1c9   : > { %3740 = vst.msk [vmem:[%s6332_s20 + $0xd8] sm:$0xf] %vm3685_vm0, %v4939_v4  ;;  %3868 = vst.msk [vmem:[%s6332_s20 + $0x2d8] sm:$0xf] %vm3685_vm0, %v5067_v5  ;;  %v4940_v12 = vpack.c.bf16 %v2460_v6, %v2460_v6  ;;  %v5068_v54 = vpack.c.bf16 %v2588_v7, %v2588_v7 }
 0x1ca   : > { %3738 = vst.msk [vmem:[%s6332_s20 + $0xd0] sm:$0xf] %vm3685_vm0, %v4937_v8  ;;  %3866 = vst.msk [vmem:[%s6332_s20 + $0x2d0] sm:$0xf] %vm3685_vm0, %v5065_v9  ;;  %v4938_v13 = vpack.c.bf16 %v2458_v10, %v2458_v10  ;;  %v5066_v14 = vpack.c.bf16 %v2586_v11, %v2586_v11  ;;  %v5354_v15 = vpop.f32.mrb[56].mxu0  ;;  %v5482_v17 = vpop.f32.mrb[56].mxu1 }
 0x1cb   : > { %3741 = vst.msk [vmem:[%s6332_s20 + $0xdc] sm:$0xf] %vm3685_vm0, %v4940_v12  ;;  %3869 = vst.msk [vmem:[%s6332_s20 + $0x2dc] sm:$0xf] %vm3685_vm0, %v5068_v54  ;;  %v1615_v18 = vadd.f32 %v6624_v16, %v5354_v15  ;;  %v2127_v19 = vadd.f32 %v6624_v16, %v5482_v17  ;;  %v1606_v20 = vpop.f32.mrb[57].mxu0  ;;  %v2118_v21 = vpop.f32.mrb[57].mxu1 }
 0x1cc   : > { %3739 = vst.msk [vmem:[%s6332_s20 + $0xd4] sm:$0xf] %vm3685_vm0, %v4938_v13  ;;  %3867 = vst.msk [vmem:[%s6332_s20 + $0x2d4] sm:$0xf] %vm3685_vm0, %v5066_v14  ;;  %v1607_v22 = vadd.f32 %v6624_v16, %v1606_v20  ;;  %v2119_v23 = vadd.f32 %v6624_v16, %v2118_v21  ;;  %v5355_v24 = vpop.f32.mrb[58].mxu0  ;;  %v5483_v25 = vpop.f32.mrb[58].mxu1 }
 0x1cd   : > { %v2463_v26 = vmax.f32 %v1615_v18, 0.0  ;;  %v2591_v27 = vmax.f32 %v2127_v19, 0.0  ;;  %v1618_v28 = vadd.f32 %v6624_v16, %v5355_v24  ;;  %v2130_v29 = vadd.f32 %v6624_v16, %v5483_v25  ;;  %v1609_v30 = vpop.f32.mrb[59].mxu0  ;;  %v2121_v31 = vpop.f32.mrb[59].mxu1 }
 0x1ce   : > { %v2461_v32 = vmax.f32 %v1607_v22, 0.0  ;;  %v2589_v33 = vmax.f32 %v2119_v23, 0.0  ;;  %v1610_v34 = vadd.f32 %v6624_v16, %v1609_v30  ;;  %v2122_v35 = vadd.f32 %v6624_v16, %v2121_v31 }
 0x1cf   : > { %v4943_v36 = vpack.c.bf16 %v2463_v26, %v2463_v26  ;;  %v5071_v37 = vpack.c.bf16 %v2591_v27, %v2591_v27  ;;  %v2464_v38 = vmax.f32 %v1618_v28, 0.0  ;;  %v2592_v39 = vmax.f32 %v2130_v29, 0.0 }
 0x1d0   : > { %v4941_v40 = vpack.c.bf16 %v2461_v32, %v2461_v32  ;;  %v5069_v41 = vpack.c.bf16 %v2589_v33, %v2589_v33  ;;  %v2462_v42 = vmax.f32 %v1610_v34, 0.0  ;;  %v2590_v43 = vmax.f32 %v2122_v35, 0.0 }
 0x1d1   : > { %3744 = vst.msk [vmem:[%s6332_s20 + $0xe8] sm:$0xf] %vm3685_vm0, %v4943_v36  ;;  %3872 = vst.msk [vmem:[%s6332_s20 + $0x2e8] sm:$0xf] %vm3685_vm0, %v5071_v37  ;;  %v4944_v44 = vpack.c.bf16 %v2464_v38, %v2464_v38  ;;  %v5072_v45 = vpack.c.bf16 %v2592_v39, %v2592_v39 }
 0x1d2   : > { %3742 = vst.msk [vmem:[%s6332_s20 + $0xe0] sm:$0xf] %vm3685_vm0, %v4941_v40  ;;  %3870 = vst.msk [vmem:[%s6332_s20 + $0x2e0] sm:$0xf] %vm3685_vm0, %v5069_v41  ;;  %v4942_v46 = vpack.c.bf16 %v2462_v42, %v2462_v42  ;;  %v5070_v47 = vpack.c.bf16 %v2590_v43, %v2590_v43  ;;  %v5358_v48 = vpop.f32.mrb[60].mxu0  ;;  %v5486_v49 = vpop.f32.mrb[60].mxu1 }
 0x1d3   : > { %3745 = vst.msk [vmem:[%s6332_s20 + $0xec] sm:$0xf] %vm3685_vm0, %v4944_v44  ;;  %3873 = vst.msk [vmem:[%s6332_s20 + $0x2ec] sm:$0xf] %vm3685_vm0, %v5072_v45  ;;  %v1631_v50 = vadd.f32 %v6624_v16, %v5358_v48  ;;  %v2143_v51 = vadd.f32 %v6624_v16, %v5486_v49  ;;  %v1622_v52 = vpop.f32.mrb[61].mxu0  ;;  %v2134_v53 = vpop.f32.mrb[61].mxu1 }
 0x1d4   : > { %3743 = vst.msk [vmem:[%s6332_s20 + $0xe4] sm:$0xf] %vm3685_vm0, %v4942_v46  ;;  %3871 = vst.msk [vmem:[%s6332_s20 + $0x2e4] sm:$0xf] %vm3685_vm0, %v5070_v47  ;;  %v1623_v55 = vadd.f32 %v6624_v16, %v1622_v52  ;;  %v2135_v56 = vadd.f32 %v6624_v16, %v2134_v53  ;;  %v5359_v57 = vpop.f32.mrb[62].mxu0  ;;  %v5487_v58 = vpop.f32.mrb[62].mxu1 }
 0x1d5   : > { %v2467_v59 = vmax.f32 %v1631_v50, 0.0  ;;  %v2595_v60 = vmax.f32 %v2143_v51, 0.0  ;;  %v1634_v61 = vadd.f32 %v6624_v16, %v5359_v57  ;;  %v2146_v62 = vadd.f32 %v6624_v16, %v5487_v58  ;;  %v1625_v63 = vpop.f32.mrb[63].mxu0  ;;  %v2137_v0 = vpop.f32.mrb[63].mxu1 }
 0x1d6   : > { %v2465_v1 = vmax.f32 %v1623_v55, 0.0  ;;  %v2593_v2 = vmax.f32 %v2135_v56, 0.0  ;;  %v1626_v3 = vadd.f32 %v6624_v16, %v1625_v63  ;;  %v2138_v4 = vadd.f32 %v6624_v16, %v2137_v0 }
 0x1d7   : > { %v4947_v5 = vpack.c.bf16 %v2467_v59, %v2467_v59  ;;  %v5075_v6 = vpack.c.bf16 %v2595_v60, %v2595_v60  ;;  %v2468_v7 = vmax.f32 %v1634_v61, 0.0  ;;  %v2596_v8 = vmax.f32 %v2146_v62, 0.0 }
 0x1d8   : > { %v4945_v9 = vpack.c.bf16 %v2465_v1, %v2465_v1  ;;  %v5073_v10 = vpack.c.bf16 %v2593_v2, %v2593_v2  ;;  %v2466_v11 = vmax.f32 %v1626_v3, 0.0  ;;  %v2594_v12 = vmax.f32 %v2138_v4, 0.0 }
 0x1d9   : > { %3748 = vst.msk [vmem:[%s6332_s20 + $0xf8] sm:$0xf] %vm3685_vm0, %v4947_v5  ;;  %3876 = vst.msk [vmem:[%s6332_s20 + $0x2f8] sm:$0xf] %vm3685_vm0, %v5075_v6  ;;  %v4948_v54 = vpack.c.bf16 %v2468_v7, %v2468_v7  ;;  %v5076_v13 = vpack.c.bf16 %v2596_v8, %v2596_v8 }
 0x1da   : > { %3746 = vst.msk [vmem:[%s6332_s20 + $0xf0] sm:$0xf] %vm3685_vm0, %v4945_v9  ;;  %3874 = vst.msk [vmem:[%s6332_s20 + $0x2f0] sm:$0xf] %vm3685_vm0, %v5073_v10  ;;  %v4946_v14 = vpack.c.bf16 %v2466_v11, %v2466_v11  ;;  %v5074_v15 = vpack.c.bf16 %v2594_v12, %v2594_v12  ;;  %v5362_v17 = vpop.f32.mrb[64].mxu0  ;;  %v5490_v18 = vpop.f32.mrb[64].mxu1 }
 0x1db   : > { %3749 = vst.msk [vmem:[%s6332_s20 + $0xfc] sm:$0xf] %vm3685_vm0, %v4948_v54  ;;  %3877 = vst.msk [vmem:[%s6332_s20 + $0x2fc] sm:$0xf] %vm3685_vm0, %v5076_v13  ;;  %v1647_v19 = vadd.f32 %v6624_v16, %v5362_v17  ;;  %v2159_v20 = vadd.f32 %v6624_v16, %v5490_v18  ;;  %v1638_v21 = vpop.f32.mrb[65].mxu0  ;;  %v2150_v22 = vpop.f32.mrb[65].mxu1 }
 0x1dc   : > { %3747 = vst.msk [vmem:[%s6332_s20 + $0xf4] sm:$0xf] %vm3685_vm0, %v4946_v14  ;;  %3875 = vst.msk [vmem:[%s6332_s20 + $0x2f4] sm:$0xf] %vm3685_vm0, %v5074_v15  ;;  %v1639_v23 = vadd.f32 %v6624_v16, %v1638_v21  ;;  %v2151_v24 = vadd.f32 %v6624_v16, %v2150_v22  ;;  %v5363_v25 = vpop.f32.mrb[66].mxu0  ;;  %v5491_v26 = vpop.f32.mrb[66].mxu1 }
 0x1dd   : > { %v2471_v27 = vmax.f32 %v1647_v19, 0.0  ;;  %v2599_v28 = vmax.f32 %v2159_v20, 0.0  ;;  %v1650_v29 = vadd.f32 %v6624_v16, %v5363_v25  ;;  %v2162_v30 = vadd.f32 %v6624_v16, %v5491_v26  ;;  %v1641_v31 = vpop.f32.mrb[67].mxu0  ;;  %v2153_v32 = vpop.f32.mrb[67].mxu1 }
 0x1de   : > { %v2469_v33 = vmax.f32 %v1639_v23, 0.0  ;;  %v2597_v34 = vmax.f32 %v2151_v24, 0.0  ;;  %v1642_v35 = vadd.f32 %v6624_v16, %v1641_v31  ;;  %v2154_v36 = vadd.f32 %v6624_v16, %v2153_v32 }
 0x1df   : > { %v4951_v37 = vpack.c.bf16 %v2471_v27, %v2471_v27  ;;  %v5079_v38 = vpack.c.bf16 %v2599_v28, %v2599_v28  ;;  %v2472_v39 = vmax.f32 %v1650_v29, 0.0  ;;  %v2600_v40 = vmax.f32 %v2162_v30, 0.0 }
 0x1e0   : > { %v4949_v41 = vpack.c.bf16 %v2469_v33, %v2469_v33  ;;  %v5077_v42 = vpack.c.bf16 %v2597_v34, %v2597_v34  ;;  %v2470_v43 = vmax.f32 %v1642_v35, 0.0  ;;  %v2598_v44 = vmax.f32 %v2154_v36, 0.0 }
 0x1e1   : > { %3752 = vst.msk [vmem:[%s6332_s20 + $0x108] sm:$0xf] %vm3685_vm0, %v4951_v37  ;;  %3880 = vst.msk [vmem:[%s6332_s20 + $0x308] sm:$0xf] %vm3685_vm0, %v5079_v38  ;;  %v4952_v45 = vpack.c.bf16 %v2472_v39, %v2472_v39  ;;  %v5080_v46 = vpack.c.bf16 %v2600_v40, %v2600_v40 }
 0x1e2   : > { %3750 = vst.msk [vmem:[%s6332_s20 + $0x100] sm:$0xf] %vm3685_vm0, %v4949_v41  ;;  %3878 = vst.msk [vmem:[%s6332_s20 + $0x300] sm:$0xf] %vm3685_vm0, %v5077_v42  ;;  %v4950_v47 = vpack.c.bf16 %v2470_v43, %v2470_v43  ;;  %v5078_v48 = vpack.c.bf16 %v2598_v44, %v2598_v44  ;;  %v5366_v49 = vpop.f32.mrb[68].mxu0  ;;  %v5494_v50 = vpop.f32.mrb[68].mxu1 }
 0x1e3   : > { %3753 = vst.msk [vmem:[%s6332_s20 + $0x10c] sm:$0xf] %vm3685_vm0, %v4952_v45  ;;  %3881 = vst.msk [vmem:[%s6332_s20 + $0x30c] sm:$0xf] %vm3685_vm0, %v5080_v46  ;;  %v1663_v51 = vadd.f32 %v6624_v16, %v5366_v49  ;;  %v2175_v52 = vadd.f32 %v6624_v16, %v5494_v50  ;;  %v1654_v53 = vpop.f32.mrb[69].mxu0  ;;  %v2166_v55 = vpop.f32.mrb[69].mxu1 }
 0x1e4   : > { %3751 = vst.msk [vmem:[%s6332_s20 + $0x104] sm:$0xf] %vm3685_vm0, %v4950_v47  ;;  %3879 = vst.msk [vmem:[%s6332_s20 + $0x304] sm:$0xf] %vm3685_vm0, %v5078_v48  ;;  %v1655_v56 = vadd.f32 %v6624_v16, %v1654_v53  ;;  %v2167_v57 = vadd.f32 %v6624_v16, %v2166_v55  ;;  %v5367_v58 = vpop.f32.mrb[70].mxu0  ;;  %v5495_v59 = vpop.f32.mrb[70].mxu1 }
 0x1e5   : > { %v2475_v60 = vmax.f32 %v1663_v51, 0.0  ;;  %v2603_v61 = vmax.f32 %v2175_v52, 0.0  ;;  %v1666_v62 = vadd.f32 %v6624_v16, %v5367_v58  ;;  %v2178_v63 = vadd.f32 %v6624_v16, %v5495_v59  ;;  %v1657_v0 = vpop.f32.mrb[71].mxu0  ;;  %v2169_v1 = vpop.f32.mrb[71].mxu1 }
 0x1e6   : > { %v2473_v2 = vmax.f32 %v1655_v56, 0.0  ;;  %v2601_v3 = vmax.f32 %v2167_v57, 0.0  ;;  %v1658_v4 = vadd.f32 %v6624_v16, %v1657_v0  ;;  %v2170_v5 = vadd.f32 %v6624_v16, %v2169_v1 }
 0x1e7   : > { %v4955_v6 = vpack.c.bf16 %v2475_v60, %v2475_v60  ;;  %v5083_v7 = vpack.c.bf16 %v2603_v61, %v2603_v61  ;;  %v2476_v8 = vmax.f32 %v1666_v62, 0.0  ;;  %v2604_v9 = vmax.f32 %v2178_v63, 0.0 }
 0x1e8   : > { %v4953_v10 = vpack.c.bf16 %v2473_v2, %v2473_v2  ;;  %v5081_v11 = vpack.c.bf16 %v2601_v3, %v2601_v3  ;;  %v2474_v12 = vmax.f32 %v1658_v4, 0.0  ;;  %v2602_v54 = vmax.f32 %v2170_v5, 0.0 }
 0x1e9   : > { %3756 = vst.msk [vmem:[%s6332_s20 + $0x118] sm:$0xf] %vm3685_vm0, %v4955_v6  ;;  %3884 = vst.msk [vmem:[%s6332_s20 + $0x318] sm:$0xf] %vm3685_vm0, %v5083_v7  ;;  %v4956_v13 = vpack.c.bf16 %v2476_v8, %v2476_v8  ;;  %v5084_v14 = vpack.c.bf16 %v2604_v9, %v2604_v9 }
 0x1ea   : > { %3754 = vst.msk [vmem:[%s6332_s20 + $0x110] sm:$0xf] %vm3685_vm0, %v4953_v10  ;;  %3882 = vst.msk [vmem:[%s6332_s20 + $0x310] sm:$0xf] %vm3685_vm0, %v5081_v11  ;;  %v4954_v15 = vpack.c.bf16 %v2474_v12, %v2474_v12  ;;  %v5082_v17 = vpack.c.bf16 %v2602_v54, %v2602_v54  ;;  %v5370_v18 = vpop.f32.mrb[72].mxu0  ;;  %v5498_v19 = vpop.f32.mrb[72].mxu1 }
 0x1eb   : > { %3757 = vst.msk [vmem:[%s6332_s20 + $0x11c] sm:$0xf] %vm3685_vm0, %v4956_v13  ;;  %3885 = vst.msk [vmem:[%s6332_s20 + $0x31c] sm:$0xf] %vm3685_vm0, %v5084_v14  ;;  %v1679_v20 = vadd.f32 %v6624_v16, %v5370_v18  ;;  %v2191_v21 = vadd.f32 %v6624_v16, %v5498_v19  ;;  %v1670_v22 = vpop.f32.mrb[73].mxu0  ;;  %v2182_v23 = vpop.f32.mrb[73].mxu1 }
 0x1ec   : > { %3755 = vst.msk [vmem:[%s6332_s20 + $0x114] sm:$0xf] %vm3685_vm0, %v4954_v15  ;;  %3883 = vst.msk [vmem:[%s6332_s20 + $0x314] sm:$0xf] %vm3685_vm0, %v5082_v17  ;;  %v1671_v24 = vadd.f32 %v6624_v16, %v1670_v22  ;;  %v2183_v25 = vadd.f32 %v6624_v16, %v2182_v23  ;;  %v5371_v26 = vpop.f32.mrb[74].mxu0  ;;  %v5499_v27 = vpop.f32.mrb[74].mxu1 }
 0x1ed   : > { %v2479_v28 = vmax.f32 %v1679_v20, 0.0  ;;  %v2607_v29 = vmax.f32 %v2191_v21, 0.0  ;;  %v1682_v30 = vadd.f32 %v6624_v16, %v5371_v26  ;;  %v2194_v31 = vadd.f32 %v6624_v16, %v5499_v27  ;;  %v1673_v32 = vpop.f32.mrb[75].mxu0  ;;  %v2185_v33 = vpop.f32.mrb[75].mxu1 }
 0x1ee   : > { %v2477_v34 = vmax.f32 %v1671_v24, 0.0  ;;  %v2605_v35 = vmax.f32 %v2183_v25, 0.0  ;;  %v1674_v36 = vadd.f32 %v6624_v16, %v1673_v32  ;;  %v2186_v37 = vadd.f32 %v6624_v16, %v2185_v33 }
 0x1ef   : > { %v4959_v38 = vpack.c.bf16 %v2479_v28, %v2479_v28  ;;  %v5087_v39 = vpack.c.bf16 %v2607_v29, %v2607_v29  ;;  %v2480_v40 = vmax.f32 %v1682_v30, 0.0  ;;  %v2608_v41 = vmax.f32 %v2194_v31, 0.0 }
 0x1f0   : > { %v4957_v42 = vpack.c.bf16 %v2477_v34, %v2477_v34  ;;  %v5085_v43 = vpack.c.bf16 %v2605_v35, %v2605_v35  ;;  %v2478_v44 = vmax.f32 %v1674_v36, 0.0  ;;  %v2606_v45 = vmax.f32 %v2186_v37, 0.0 }
 0x1f1   : > { %3760 = vst.msk [vmem:[%s6332_s20 + $0x128] sm:$0xf] %vm3685_vm0, %v4959_v38  ;;  %3888 = vst.msk [vmem:[%s6332_s20 + $0x328] sm:$0xf] %vm3685_vm0, %v5087_v39  ;;  %v4960_v46 = vpack.c.bf16 %v2480_v40, %v2480_v40  ;;  %v5088_v47 = vpack.c.bf16 %v2608_v41, %v2608_v41 }
 0x1f2   : > { %3758 = vst.msk [vmem:[%s6332_s20 + $0x120] sm:$0xf] %vm3685_vm0, %v4957_v42  ;;  %3886 = vst.msk [vmem:[%s6332_s20 + $0x320] sm:$0xf] %vm3685_vm0, %v5085_v43  ;;  %v4958_v48 = vpack.c.bf16 %v2478_v44, %v2478_v44  ;;  %v5086_v49 = vpack.c.bf16 %v2606_v45, %v2606_v45  ;;  %v5374_v50 = vpop.f32.mrb[76].mxu0  ;;  %v5502_v51 = vpop.f32.mrb[76].mxu1 }
 0x1f3   : > { %3761 = vst.msk [vmem:[%s6332_s20 + $0x12c] sm:$0xf] %vm3685_vm0, %v4960_v46  ;;  %3889 = vst.msk [vmem:[%s6332_s20 + $0x32c] sm:$0xf] %vm3685_vm0, %v5088_v47  ;;  %v1695_v52 = vadd.f32 %v6624_v16, %v5374_v50  ;;  %v2207_v53 = vadd.f32 %v6624_v16, %v5502_v51  ;;  %v1686_v55 = vpop.f32.mrb[77].mxu0  ;;  %v2198_v56 = vpop.f32.mrb[77].mxu1 }
 0x1f4   : > { %3759 = vst.msk [vmem:[%s6332_s20 + $0x124] sm:$0xf] %vm3685_vm0, %v4958_v48  ;;  %3887 = vst.msk [vmem:[%s6332_s20 + $0x324] sm:$0xf] %vm3685_vm0, %v5086_v49  ;;  %v1687_v57 = vadd.f32 %v6624_v16, %v1686_v55  ;;  %v2199_v58 = vadd.f32 %v6624_v16, %v2198_v56  ;;  %v5375_v59 = vpop.f32.mrb[78].mxu0  ;;  %v5503_v60 = vpop.f32.mrb[78].mxu1 }
 0x1f5   : > { %v2483_v61 = vmax.f32 %v1695_v52, 0.0  ;;  %v2611_v62 = vmax.f32 %v2207_v53, 0.0  ;;  %v1698_v63 = vadd.f32 %v6624_v16, %v5375_v59  ;;  %v2210_v0 = vadd.f32 %v6624_v16, %v5503_v60  ;;  %v1689_v1 = vpop.f32.mrb[79].mxu0  ;;  %v2201_v2 = vpop.f32.mrb[79].mxu1 }
 0x1f6   : > { %v2481_v3 = vmax.f32 %v1687_v57, 0.0  ;;  %v2609_v4 = vmax.f32 %v2199_v58, 0.0  ;;  %v1690_v5 = vadd.f32 %v6624_v16, %v1689_v1  ;;  %v2202_v6 = vadd.f32 %v6624_v16, %v2201_v2 }
 0x1f7   : > { %v4963_v7 = vpack.c.bf16 %v2483_v61, %v2483_v61  ;;  %v5091_v8 = vpack.c.bf16 %v2611_v62, %v2611_v62  ;;  %v2484_v9 = vmax.f32 %v1698_v63, 0.0  ;;  %v2612_v10 = vmax.f32 %v2210_v0, 0.0 }
 0x1f8   : > { %v4961_v11 = vpack.c.bf16 %v2481_v3, %v2481_v3  ;;  %v5089_v12 = vpack.c.bf16 %v2609_v4, %v2609_v4  ;;  %v2482_v54 = vmax.f32 %v1690_v5, 0.0  ;;  %v2610_v13 = vmax.f32 %v2202_v6, 0.0 }
 0x1f9   : > { %3764 = vst.msk [vmem:[%s6332_s20 + $0x138] sm:$0xf] %vm3685_vm0, %v4963_v7  ;;  %3892 = vst.msk [vmem:[%s6332_s20 + $0x338] sm:$0xf] %vm3685_vm0, %v5091_v8  ;;  %v4964_v14 = vpack.c.bf16 %v2484_v9, %v2484_v9  ;;  %v5092_v15 = vpack.c.bf16 %v2612_v10, %v2612_v10 }
 0x1fa   : > { %3762 = vst.msk [vmem:[%s6332_s20 + $0x130] sm:$0xf] %vm3685_vm0, %v4961_v11  ;;  %3890 = vst.msk [vmem:[%s6332_s20 + $0x330] sm:$0xf] %vm3685_vm0, %v5089_v12  ;;  %v4962_v17 = vpack.c.bf16 %v2482_v54, %v2482_v54  ;;  %v5090_v18 = vpack.c.bf16 %v2610_v13, %v2610_v13  ;;  %v5378_v19 = vpop.f32.mrb[80].mxu0  ;;  %v5506_v20 = vpop.f32.mrb[80].mxu1 }
 0x1fb   : > { %3765 = vst.msk [vmem:[%s6332_s20 + $0x13c] sm:$0xf] %vm3685_vm0, %v4964_v14  ;;  %3893 = vst.msk [vmem:[%s6332_s20 + $0x33c] sm:$0xf] %vm3685_vm0, %v5092_v15  ;;  %v1711_v21 = vadd.f32 %v6624_v16, %v5378_v19  ;;  %v2223_v22 = vadd.f32 %v6624_v16, %v5506_v20  ;;  %v1702_v23 = vpop.f32.mrb[81].mxu0  ;;  %v2214_v24 = vpop.f32.mrb[81].mxu1 }
 0x1fc   : > { %3763 = vst.msk [vmem:[%s6332_s20 + $0x134] sm:$0xf] %vm3685_vm0, %v4962_v17  ;;  %3891 = vst.msk [vmem:[%s6332_s20 + $0x334] sm:$0xf] %vm3685_vm0, %v5090_v18  ;;  %v1703_v25 = vadd.f32 %v6624_v16, %v1702_v23  ;;  %v2215_v26 = vadd.f32 %v6624_v16, %v2214_v24  ;;  %v5379_v27 = vpop.f32.mrb[82].mxu0  ;;  %v5507_v28 = vpop.f32.mrb[82].mxu1 }
 0x1fd   : > { %v2487_v29 = vmax.f32 %v1711_v21, 0.0  ;;  %v2615_v30 = vmax.f32 %v2223_v22, 0.0  ;;  %v1714_v31 = vadd.f32 %v6624_v16, %v5379_v27  ;;  %v2226_v32 = vadd.f32 %v6624_v16, %v5507_v28  ;;  %v1705_v33 = vpop.f32.mrb[83].mxu0  ;;  %v2217_v34 = vpop.f32.mrb[83].mxu1 }
 0x1fe   : > { %v2485_v35 = vmax.f32 %v1703_v25, 0.0  ;;  %v2613_v36 = vmax.f32 %v2215_v26, 0.0  ;;  %v1706_v37 = vadd.f32 %v6624_v16, %v1705_v33  ;;  %v2218_v38 = vadd.f32 %v6624_v16, %v2217_v34 }
 0x1ff   : > { %v4967_v39 = vpack.c.bf16 %v2487_v29, %v2487_v29  ;;  %v5095_v40 = vpack.c.bf16 %v2615_v30, %v2615_v30  ;;  %v2488_v41 = vmax.f32 %v1714_v31, 0.0  ;;  %v2616_v42 = vmax.f32 %v2226_v32, 0.0 }
 0x200   : > { %v4965_v43 = vpack.c.bf16 %v2485_v35, %v2485_v35  ;;  %v5093_v44 = vpack.c.bf16 %v2613_v36, %v2613_v36  ;;  %v2486_v45 = vmax.f32 %v1706_v37, 0.0  ;;  %v2614_v46 = vmax.f32 %v2218_v38, 0.0 }
 0x201   : > { %3768 = vst.msk [vmem:[%s6332_s20 + $0x148] sm:$0xf] %vm3685_vm0, %v4967_v39  ;;  %3896 = vst.msk [vmem:[%s6332_s20 + $0x348] sm:$0xf] %vm3685_vm0, %v5095_v40  ;;  %v4968_v47 = vpack.c.bf16 %v2488_v41, %v2488_v41  ;;  %v5096_v48 = vpack.c.bf16 %v2616_v42, %v2616_v42 }
 0x202   : > { %3766 = vst.msk [vmem:[%s6332_s20 + $0x140] sm:$0xf] %vm3685_vm0, %v4965_v43  ;;  %3894 = vst.msk [vmem:[%s6332_s20 + $0x340] sm:$0xf] %vm3685_vm0, %v5093_v44  ;;  %v4966_v49 = vpack.c.bf16 %v2486_v45, %v2486_v45  ;;  %v5094_v50 = vpack.c.bf16 %v2614_v46, %v2614_v46  ;;  %v5382_v51 = vpop.f32.mrb[84].mxu0  ;;  %v5510_v52 = vpop.f32.mrb[84].mxu1 }
 0x203   : > { %3769 = vst.msk [vmem:[%s6332_s20 + $0x14c] sm:$0xf] %vm3685_vm0, %v4968_v47  ;;  %3897 = vst.msk [vmem:[%s6332_s20 + $0x34c] sm:$0xf] %vm3685_vm0, %v5096_v48  ;;  %v1727_v53 = vadd.f32 %v6624_v16, %v5382_v51  ;;  %v2239_v55 = vadd.f32 %v6624_v16, %v5510_v52  ;;  %v1718_v56 = vpop.f32.mrb[85].mxu0  ;;  %v2230_v57 = vpop.f32.mrb[85].mxu1 }
 0x204   : > { %3767 = vst.msk [vmem:[%s6332_s20 + $0x144] sm:$0xf] %vm3685_vm0, %v4966_v49  ;;  %3895 = vst.msk [vmem:[%s6332_s20 + $0x344] sm:$0xf] %vm3685_vm0, %v5094_v50  ;;  %v1719_v58 = vadd.f32 %v6624_v16, %v1718_v56  ;;  %v2231_v59 = vadd.f32 %v6624_v16, %v2230_v57  ;;  %v5383_v60 = vpop.f32.mrb[86].mxu0  ;;  %v5511_v61 = vpop.f32.mrb[86].mxu1 }
 0x205   : > { %v2491_v62 = vmax.f32 %v1727_v53, 0.0  ;;  %v2619_v63 = vmax.f32 %v2239_v55, 0.0  ;;  %v1730_v0 = vadd.f32 %v6624_v16, %v5383_v60  ;;  %v2242_v1 = vadd.f32 %v6624_v16, %v5511_v61  ;;  %v1721_v2 = vpop.f32.mrb[87].mxu0  ;;  %v2233_v3 = vpop.f32.mrb[87].mxu1 }
 0x206   : > { %v2489_v4 = vmax.f32 %v1719_v58, 0.0  ;;  %v2617_v5 = vmax.f32 %v2231_v59, 0.0  ;;  %v1722_v6 = vadd.f32 %v6624_v16, %v1721_v2  ;;  %v2234_v7 = vadd.f32 %v6624_v16, %v2233_v3 }
 0x207   : > { %v4971_v8 = vpack.c.bf16 %v2491_v62, %v2491_v62  ;;  %v5099_v9 = vpack.c.bf16 %v2619_v63, %v2619_v63  ;;  %v2492_v10 = vmax.f32 %v1730_v0, 0.0  ;;  %v2620_v11 = vmax.f32 %v2242_v1, 0.0 }
 0x208   : > { %v4969_v12 = vpack.c.bf16 %v2489_v4, %v2489_v4  ;;  %v5097_v54 = vpack.c.bf16 %v2617_v5, %v2617_v5  ;;  %v2490_v13 = vmax.f32 %v1722_v6, 0.0  ;;  %v2618_v14 = vmax.f32 %v2234_v7, 0.0 }
 0x209   : > { %3772 = vst.msk [vmem:[%s6332_s20 + $0x158] sm:$0xf] %vm3685_vm0, %v4971_v8  ;;  %3900 = vst.msk [vmem:[%s6332_s20 + $0x358] sm:$0xf] %vm3685_vm0, %v5099_v9  ;;  %v4972_v15 = vpack.c.bf16 %v2492_v10, %v2492_v10  ;;  %v5100_v17 = vpack.c.bf16 %v2620_v11, %v2620_v11 }
 0x20a   : > { %3770 = vst.msk [vmem:[%s6332_s20 + $0x150] sm:$0xf] %vm3685_vm0, %v4969_v12  ;;  %3898 = vst.msk [vmem:[%s6332_s20 + $0x350] sm:$0xf] %vm3685_vm0, %v5097_v54  ;;  %v4970_v18 = vpack.c.bf16 %v2490_v13, %v2490_v13  ;;  %v5098_v19 = vpack.c.bf16 %v2618_v14, %v2618_v14  ;;  %v5386_v20 = vpop.f32.mrb[88].mxu0  ;;  %v5514_v21 = vpop.f32.mrb[88].mxu1 }
 0x20b   : > { %3773 = vst.msk [vmem:[%s6332_s20 + $0x15c] sm:$0xf] %vm3685_vm0, %v4972_v15  ;;  %3901 = vst.msk [vmem:[%s6332_s20 + $0x35c] sm:$0xf] %vm3685_vm0, %v5100_v17  ;;  %v1743_v22 = vadd.f32 %v6624_v16, %v5386_v20  ;;  %v2255_v23 = vadd.f32 %v6624_v16, %v5514_v21  ;;  %v1734_v24 = vpop.f32.mrb[89].mxu0  ;;  %v2246_v25 = vpop.f32.mrb[89].mxu1 }
 0x20c   : > { %3771 = vst.msk [vmem:[%s6332_s20 + $0x154] sm:$0xf] %vm3685_vm0, %v4970_v18  ;;  %3899 = vst.msk [vmem:[%s6332_s20 + $0x354] sm:$0xf] %vm3685_vm0, %v5098_v19  ;;  %v1735_v26 = vadd.f32 %v6624_v16, %v1734_v24  ;;  %v2247_v27 = vadd.f32 %v6624_v16, %v2246_v25  ;;  %v5387_v28 = vpop.f32.mrb[90].mxu0  ;;  %v5515_v29 = vpop.f32.mrb[90].mxu1 }
 0x20d   : > { %v2495_v30 = vmax.f32 %v1743_v22, 0.0  ;;  %v2623_v31 = vmax.f32 %v2255_v23, 0.0  ;;  %v1746_v32 = vadd.f32 %v6624_v16, %v5387_v28  ;;  %v2258_v33 = vadd.f32 %v6624_v16, %v5515_v29  ;;  %v1737_v34 = vpop.f32.mrb[91].mxu0  ;;  %v2249_v35 = vpop.f32.mrb[91].mxu1 }
 0x20e   : > { %v2493_v36 = vmax.f32 %v1735_v26, 0.0  ;;  %v2621_v37 = vmax.f32 %v2247_v27, 0.0  ;;  %v1738_v38 = vadd.f32 %v6624_v16, %v1737_v34  ;;  %v2250_v39 = vadd.f32 %v6624_v16, %v2249_v35 }
 0x20f   : > { %v4975_v40 = vpack.c.bf16 %v2495_v30, %v2495_v30  ;;  %v5103_v41 = vpack.c.bf16 %v2623_v31, %v2623_v31  ;;  %v2496_v42 = vmax.f32 %v1746_v32, 0.0  ;;  %v2624_v43 = vmax.f32 %v2258_v33, 0.0 }
 0x210   : > { %v4973_v44 = vpack.c.bf16 %v2493_v36, %v2493_v36  ;;  %v5101_v45 = vpack.c.bf16 %v2621_v37, %v2621_v37  ;;  %v2494_v46 = vmax.f32 %v1738_v38, 0.0  ;;  %v2622_v47 = vmax.f32 %v2250_v39, 0.0 }
 0x211   : > { %3776 = vst.msk [vmem:[%s6332_s20 + $0x168] sm:$0xf] %vm3685_vm0, %v4975_v40  ;;  %3904 = vst.msk [vmem:[%s6332_s20 + $0x368] sm:$0xf] %vm3685_vm0, %v5103_v41  ;;  %v4976_v48 = vpack.c.bf16 %v2496_v42, %v2496_v42  ;;  %v5104_v49 = vpack.c.bf16 %v2624_v43, %v2624_v43 }
 0x212   : > { %3774 = vst.msk [vmem:[%s6332_s20 + $0x160] sm:$0xf] %vm3685_vm0, %v4973_v44  ;;  %3902 = vst.msk [vmem:[%s6332_s20 + $0x360] sm:$0xf] %vm3685_vm0, %v5101_v45  ;;  %v4974_v50 = vpack.c.bf16 %v2494_v46, %v2494_v46  ;;  %v5102_v51 = vpack.c.bf16 %v2622_v47, %v2622_v47  ;;  %v5390_v52 = vpop.f32.mrb[92].mxu0  ;;  %v5518_v53 = vpop.f32.mrb[92].mxu1 }
 0x213   : > { %3777 = vst.msk [vmem:[%s6332_s20 + $0x16c] sm:$0xf] %vm3685_vm0, %v4976_v48  ;;  %3905 = vst.msk [vmem:[%s6332_s20 + $0x36c] sm:$0xf] %vm3685_vm0, %v5104_v49  ;;  %v1759_v55 = vadd.f32 %v6624_v16, %v5390_v52  ;;  %v2271_v56 = vadd.f32 %v6624_v16, %v5518_v53  ;;  %v1750_v57 = vpop.f32.mrb[93].mxu0  ;;  %v2262_v58 = vpop.f32.mrb[93].mxu1 }
 0x214   : > { %3775 = vst.msk [vmem:[%s6332_s20 + $0x164] sm:$0xf] %vm3685_vm0, %v4974_v50  ;;  %3903 = vst.msk [vmem:[%s6332_s20 + $0x364] sm:$0xf] %vm3685_vm0, %v5102_v51  ;;  %v1751_v59 = vadd.f32 %v6624_v16, %v1750_v57  ;;  %v2263_v60 = vadd.f32 %v6624_v16, %v2262_v58  ;;  %v5391_v61 = vpop.f32.mrb[94].mxu0  ;;  %v5519_v62 = vpop.f32.mrb[94].mxu1 }
 0x215   : > { %v2499_v63 = vmax.f32 %v1759_v55, 0.0  ;;  %v2627_v0 = vmax.f32 %v2271_v56, 0.0  ;;  %v1762_v1 = vadd.f32 %v6624_v16, %v5391_v61  ;;  %v2274_v2 = vadd.f32 %v6624_v16, %v5519_v62  ;;  %v1753_v3 = vpop.f32.mrb[95].mxu0  ;;  %v2265_v4 = vpop.f32.mrb[95].mxu1  ;;  %v6938_v55 = vld [vmem:[#allocation4] ss:$0 sm:$0xff] }
 0x216   : > { %v2497_v5 = vmax.f32 %v1751_v59, 0.0  ;;  %v2625_v6 = vmax.f32 %v2263_v60, 0.0  ;;  %v1754_v7 = vadd.f32 %v6624_v16, %v1753_v3  ;;  %v2266_v8 = vadd.f32 %v6624_v16, %v2265_v4 }
 0x217   : > { %v4979_v9 = vpack.c.bf16 %v2499_v63, %v2499_v63  ;;  %v5107_v10 = vpack.c.bf16 %v2627_v0, %v2627_v0  ;;  %v2500_v11 = vmax.f32 %v1762_v1, 0.0  ;;  %v2628_v12 = vmax.f32 %v2274_v2, 0.0 }
 0x218   : > { %v4977_v54 = vpack.c.bf16 %v2497_v5, %v2497_v5  ;;  %v5105_v13 = vpack.c.bf16 %v2625_v6, %v2625_v6  ;;  %v2498_v14 = vmax.f32 %v1754_v7, 0.0  ;;  %v2626_v15 = vmax.f32 %v2266_v8, 0.0 }
 0x219   : > { %3780 = vst.msk [vmem:[%s6332_s20 + $0x178] sm:$0xf] %vm3685_vm0, %v4979_v9  ;;  %3908 = vst.msk [vmem:[%s6332_s20 + $0x378] sm:$0xf] %vm3685_vm0, %v5107_v10  ;;  %v4980_v17 = vpack.c.bf16 %v2500_v11, %v2500_v11  ;;  %v5108_v18 = vpack.c.bf16 %v2628_v12, %v2628_v12 }
 0x21a   : > { %3778 = vst.msk [vmem:[%s6332_s20 + $0x170] sm:$0xf] %vm3685_vm0, %v4977_v54  ;;  %3906 = vst.msk [vmem:[%s6332_s20 + $0x370] sm:$0xf] %vm3685_vm0, %v5105_v13  ;;  %v4978_v19 = vpack.c.bf16 %v2498_v14, %v2498_v14  ;;  %v5106_v20 = vpack.c.bf16 %v2626_v15, %v2626_v15  ;;  %v5394_v21 = vpop.f32.mrb[96].mxu0  ;;  %v5522_v22 = vpop.f32.mrb[96].mxu1 }
 0x21b   : > { %3781 = vst.msk [vmem:[%s6332_s20 + $0x17c] sm:$0xf] %vm3685_vm0, %v4980_v17  ;;  %3909 = vst.msk [vmem:[%s6332_s20 + $0x37c] sm:$0xf] %vm3685_vm0, %v5108_v18  ;;  %v1775_v23 = vadd.f32 %v6624_v16, %v5394_v21  ;;  %v2287_v24 = vadd.f32 %v6624_v16, %v5522_v22  ;;  %v1766_v25 = vpop.f32.mrb[97].mxu0  ;;  %v2278_v26 = vpop.f32.mrb[97].mxu1 }
 0x21c   : > { %3779 = vst.msk [vmem:[%s6332_s20 + $0x174] sm:$0xf] %vm3685_vm0, %v4978_v19  ;;  %3907 = vst.msk [vmem:[%s6332_s20 + $0x374] sm:$0xf] %vm3685_vm0, %v5106_v20  ;;  %v1767_v27 = vadd.f32 %v6624_v16, %v1766_v25  ;;  %v2279_v28 = vadd.f32 %v6624_v16, %v2278_v26  ;;  %v5395_v29 = vpop.f32.mrb[98].mxu0  ;;  %v5523_v30 = vpop.f32.mrb[98].mxu1 }
 0x21d   : > { %v2503_v31 = vmax.f32 %v1775_v23, 0.0  ;;  %v2631_v32 = vmax.f32 %v2287_v24, 0.0  ;;  %v1778_v33 = vadd.f32 %v6624_v16, %v5395_v29  ;;  %v2290_v34 = vadd.f32 %v6624_v16, %v5523_v30  ;;  %v1769_v35 = vpop.f32.mrb[99].mxu0  ;;  %v2281_v36 = vpop.f32.mrb[99].mxu1 }
 0x21e   : > { %v2501_v37 = vmax.f32 %v1767_v27, 0.0  ;;  %v2629_v38 = vmax.f32 %v2279_v28, 0.0  ;;  %v1770_v39 = vadd.f32 %v6624_v16, %v1769_v35  ;;  %v2282_v40 = vadd.f32 %v6624_v16, %v2281_v36 }
 0x21f   : > { %v4983_v41 = vpack.c.bf16 %v2503_v31, %v2503_v31  ;;  %v5111_v42 = vpack.c.bf16 %v2631_v32, %v2631_v32  ;;  %v2504_v43 = vmax.f32 %v1778_v33, 0.0  ;;  %v2632_v44 = vmax.f32 %v2290_v34, 0.0 }
 0x220   : > { %v4981_v45 = vpack.c.bf16 %v2501_v37, %v2501_v37  ;;  %v5109_v46 = vpack.c.bf16 %v2629_v38, %v2629_v38  ;;  %v2502_v47 = vmax.f32 %v1770_v39, 0.0  ;;  %v2630_v48 = vmax.f32 %v2282_v40, 0.0 }
 0x221   : > { %3784 = vst.msk [vmem:[%s6332_s20 + $0x188] sm:$0xf] %vm3685_vm0, %v4983_v41  ;;  %3912 = vst.msk [vmem:[%s6332_s20 + $0x388] sm:$0xf] %vm3685_vm0, %v5111_v42  ;;  %v4984_v49 = vpack.c.bf16 %v2504_v43, %v2504_v43  ;;  %v5112_v50 = vpack.c.bf16 %v2632_v44, %v2632_v44 }
 0x222   : > { %3782 = vst.msk [vmem:[%s6332_s20 + $0x180] sm:$0xf] %vm3685_vm0, %v4981_v45  ;;  %3910 = vst.msk [vmem:[%s6332_s20 + $0x380] sm:$0xf] %vm3685_vm0, %v5109_v46  ;;  %v4982_v16 = vpack.c.bf16 %v2502_v47, %v2502_v47  ;;  %v5110_v51 = vpack.c.bf16 %v2630_v48, %v2630_v48  ;;  %v5398_v52 = vpop.f32.mrb[100].mxu0  ;;  %v5526_v53 = vpop.f32.mrb[100].mxu1 }
 0x223   : > { %3785 = vst.msk [vmem:[%s6332_s20 + $0x18c] sm:$0xf] %vm3685_vm0, %v4984_v49  ;;  %3913 = vst.msk [vmem:[%s6332_s20 + $0x38c] sm:$0xf] %vm3685_vm0, %v5112_v50  ;;  %v1791_v56 = vadd.f32 %v6938_v55, %v5398_v52  ;;  %v2303_v57 = vadd.f32 %v6938_v55, %v5526_v53  ;;  %v1782_v58 = vpop.f32.mrb[101].mxu0  ;;  %v2294_v59 = vpop.f32.mrb[101].mxu1 }
 0x224   : > { %3783 = vst.msk [vmem:[%s6332_s20 + $0x184] sm:$0xf] %vm3685_vm0, %v4982_v16  ;;  %3911 = vst.msk [vmem:[%s6332_s20 + $0x384] sm:$0xf] %vm3685_vm0, %v5110_v51  ;;  %v1783_v60 = vadd.f32 %v6938_v55, %v1782_v58  ;;  %v2295_v61 = vadd.f32 %v6938_v55, %v2294_v59  ;;  %v5399_v62 = vpop.f32.mrb[102].mxu0  ;;  %v5527_v63 = vpop.f32.mrb[102].mxu1 }
 0x225   : > { %v2507_v0 = vmax.f32 %v1791_v56, 0.0  ;;  %v2635_v1 = vmax.f32 %v2303_v57, 0.0  ;;  %v1794_v2 = vadd.f32 %v6938_v55, %v5399_v62  ;;  %v2306_v3 = vadd.f32 %v6938_v55, %v5527_v63  ;;  %v1785_v4 = vpop.f32.mrb[103].mxu0  ;;  %v2297_v5 = vpop.f32.mrb[103].mxu1 }
 0x226   : > { %v2505_v6 = vmax.f32 %v1783_v60, 0.0  ;;  %v2633_v7 = vmax.f32 %v2295_v61, 0.0  ;;  %v1786_v8 = vadd.f32 %v6938_v55, %v1785_v4  ;;  %v2298_v9 = vadd.f32 %v6938_v55, %v2297_v5 }
 0x227   : > { %v4987_v10 = vpack.c.bf16 %v2507_v0, %v2507_v0  ;;  %v5115_v11 = vpack.c.bf16 %v2635_v1, %v2635_v1  ;;  %v2508_v12 = vmax.f32 %v1794_v2, 0.0  ;;  %v2636_v54 = vmax.f32 %v2306_v3, 0.0 }
 0x228   : > { %v4985_v13 = vpack.c.bf16 %v2505_v6, %v2505_v6  ;;  %v5113_v14 = vpack.c.bf16 %v2633_v7, %v2633_v7  ;;  %v2506_v15 = vmax.f32 %v1786_v8, 0.0  ;;  %v2634_v17 = vmax.f32 %v2298_v9, 0.0 }
 0x229   : > { %3788 = vst.msk [vmem:[%s6332_s20 + $0x198] sm:$0xf] %vm3685_vm0, %v4987_v10  ;;  %3916 = vst.msk [vmem:[%s6332_s20 + $0x398] sm:$0xf] %vm3685_vm0, %v5115_v11  ;;  %v4988_v18 = vpack.c.bf16 %v2508_v12, %v2508_v12  ;;  %v5116_v19 = vpack.c.bf16 %v2636_v54, %v2636_v54 }
 0x22a   : > { %3786 = vst.msk [vmem:[%s6332_s20 + $0x190] sm:$0xf] %vm3685_vm0, %v4985_v13  ;;  %3914 = vst.msk [vmem:[%s6332_s20 + $0x390] sm:$0xf] %vm3685_vm0, %v5113_v14  ;;  %v4986_v20 = vpack.c.bf16 %v2506_v15, %v2506_v15  ;;  %v5114_v21 = vpack.c.bf16 %v2634_v17, %v2634_v17  ;;  %v5402_v22 = vpop.f32.mrb[104].mxu0  ;;  %v5530_v23 = vpop.f32.mrb[104].mxu1 }
 0x22b   : > { %3789 = vst.msk [vmem:[%s6332_s20 + $0x19c] sm:$0xf] %vm3685_vm0, %v4988_v18  ;;  %3917 = vst.msk [vmem:[%s6332_s20 + $0x39c] sm:$0xf] %vm3685_vm0, %v5116_v19  ;;  %v1807_v24 = vadd.f32 %v6938_v55, %v5402_v22  ;;  %v2319_v25 = vadd.f32 %v6938_v55, %v5530_v23  ;;  %v1798_v26 = vpop.f32.mrb[105].mxu0  ;;  %v2310_v27 = vpop.f32.mrb[105].mxu1 }
 0x22c   : > { %3787 = vst.msk [vmem:[%s6332_s20 + $0x194] sm:$0xf] %vm3685_vm0, %v4986_v20  ;;  %3915 = vst.msk [vmem:[%s6332_s20 + $0x394] sm:$0xf] %vm3685_vm0, %v5114_v21  ;;  %v1799_v28 = vadd.f32 %v6938_v55, %v1798_v26  ;;  %v2311_v29 = vadd.f32 %v6938_v55, %v2310_v27  ;;  %v5403_v30 = vpop.f32.mrb[106].mxu0  ;;  %v5531_v31 = vpop.f32.mrb[106].mxu1 }
 0x22d   : > { %v2511_v32 = vmax.f32 %v1807_v24, 0.0  ;;  %v2639_v33 = vmax.f32 %v2319_v25, 0.0  ;;  %v1810_v34 = vadd.f32 %v6938_v55, %v5403_v30  ;;  %v2322_v35 = vadd.f32 %v6938_v55, %v5531_v31  ;;  %v1801_v36 = vpop.f32.mrb[107].mxu0  ;;  %v2313_v37 = vpop.f32.mrb[107].mxu1 }
 0x22e   : > { %v2509_v38 = vmax.f32 %v1799_v28, 0.0  ;;  %v2637_v39 = vmax.f32 %v2311_v29, 0.0  ;;  %v1802_v40 = vadd.f32 %v6938_v55, %v1801_v36  ;;  %v2314_v41 = vadd.f32 %v6938_v55, %v2313_v37 }
 0x22f   : > { %v4991_v42 = vpack.c.bf16 %v2511_v32, %v2511_v32  ;;  %v5119_v43 = vpack.c.bf16 %v2639_v33, %v2639_v33  ;;  %v2512_v44 = vmax.f32 %v1810_v34, 0.0  ;;  %v2640_v45 = vmax.f32 %v2322_v35, 0.0 }
 0x230   : > { %v4989_v46 = vpack.c.bf16 %v2509_v38, %v2509_v38  ;;  %v5117_v47 = vpack.c.bf16 %v2637_v39, %v2637_v39  ;;  %v2510_v48 = vmax.f32 %v1802_v40, 0.0  ;;  %v2638_v49 = vmax.f32 %v2314_v41, 0.0 }
 0x231   : > { %3792 = vst.msk [vmem:[%s6332_s20 + $0x1a8] sm:$0xf] %vm3685_vm0, %v4991_v42  ;;  %3920 = vst.msk [vmem:[%s6332_s20 + $0x3a8] sm:$0xf] %vm3685_vm0, %v5119_v43  ;;  %v4992_v50 = vpack.c.bf16 %v2512_v44, %v2512_v44  ;;  %v5120_v16 = vpack.c.bf16 %v2640_v45, %v2640_v45 }
 0x232   : > { %3790 = vst.msk [vmem:[%s6332_s20 + $0x1a0] sm:$0xf] %vm3685_vm0, %v4989_v46  ;;  %3918 = vst.msk [vmem:[%s6332_s20 + $0x3a0] sm:$0xf] %vm3685_vm0, %v5117_v47  ;;  %v4990_v51 = vpack.c.bf16 %v2510_v48, %v2510_v48  ;;  %v5118_v52 = vpack.c.bf16 %v2638_v49, %v2638_v49  ;;  %v5406_v53 = vpop.f32.mrb[108].mxu0  ;;  %v5534_v56 = vpop.f32.mrb[108].mxu1 }
 0x233   : > { %3793 = vst.msk [vmem:[%s6332_s20 + $0x1ac] sm:$0xf] %vm3685_vm0, %v4992_v50  ;;  %3921 = vst.msk [vmem:[%s6332_s20 + $0x3ac] sm:$0xf] %vm3685_vm0, %v5120_v16  ;;  %v1823_v57 = vadd.f32 %v6938_v55, %v5406_v53  ;;  %v2335_v58 = vadd.f32 %v6938_v55, %v5534_v56  ;;  %v1814_v59 = vpop.f32.mrb[109].mxu0  ;;  %v2326_v60 = vpop.f32.mrb[109].mxu1 }
 0x234   : > { %3791 = vst.msk [vmem:[%s6332_s20 + $0x1a4] sm:$0xf] %vm3685_vm0, %v4990_v51  ;;  %3919 = vst.msk [vmem:[%s6332_s20 + $0x3a4] sm:$0xf] %vm3685_vm0, %v5118_v52  ;;  %v1815_v61 = vadd.f32 %v6938_v55, %v1814_v59  ;;  %v2327_v62 = vadd.f32 %v6938_v55, %v2326_v60  ;;  %v5407_v63 = vpop.f32.mrb[110].mxu0  ;;  %v5535_v0 = vpop.f32.mrb[110].mxu1 }
 0x235   : > { %v2515_v1 = vmax.f32 %v1823_v57, 0.0  ;;  %v2643_v2 = vmax.f32 %v2335_v58, 0.0  ;;  %v1826_v3 = vadd.f32 %v6938_v55, %v5407_v63  ;;  %v2338_v4 = vadd.f32 %v6938_v55, %v5535_v0  ;;  %v1817_v5 = vpop.f32.mrb[111].mxu0  ;;  %v2329_v6 = vpop.f32.mrb[111].mxu1 }
 0x236   : > { %v2513_v7 = vmax.f32 %v1815_v61, 0.0  ;;  %v2641_v8 = vmax.f32 %v2327_v62, 0.0  ;;  %v1818_v9 = vadd.f32 %v6938_v55, %v1817_v5  ;;  %v2330_v10 = vadd.f32 %v6938_v55, %v2329_v6 }
 0x237   : > { %v4995_v11 = vpack.c.bf16 %v2515_v1, %v2515_v1  ;;  %v5123_v12 = vpack.c.bf16 %v2643_v2, %v2643_v2  ;;  %v2516_v54 = vmax.f32 %v1826_v3, 0.0  ;;  %v2644_v13 = vmax.f32 %v2338_v4, 0.0 }
 0x238   : > { %v4993_v14 = vpack.c.bf16 %v2513_v7, %v2513_v7  ;;  %v5121_v15 = vpack.c.bf16 %v2641_v8, %v2641_v8  ;;  %v2514_v17 = vmax.f32 %v1818_v9, 0.0  ;;  %v2642_v18 = vmax.f32 %v2330_v10, 0.0 }
 0x239   : > { %3796 = vst.msk [vmem:[%s6332_s20 + $0x1b8] sm:$0xf] %vm3685_vm0, %v4995_v11  ;;  %3924 = vst.msk [vmem:[%s6332_s20 + $0x3b8] sm:$0xf] %vm3685_vm0, %v5123_v12  ;;  %v4996_v19 = vpack.c.bf16 %v2516_v54, %v2516_v54  ;;  %v5124_v20 = vpack.c.bf16 %v2644_v13, %v2644_v13 }
 0x23a   : > { %3794 = vst.msk [vmem:[%s6332_s20 + $0x1b0] sm:$0xf] %vm3685_vm0, %v4993_v14  ;;  %3922 = vst.msk [vmem:[%s6332_s20 + $0x3b0] sm:$0xf] %vm3685_vm0, %v5121_v15  ;;  %v4994_v21 = vpack.c.bf16 %v2514_v17, %v2514_v17  ;;  %v5122_v22 = vpack.c.bf16 %v2642_v18, %v2642_v18  ;;  %v5410_v23 = vpop.f32.mrb[112].mxu0  ;;  %v5538_v24 = vpop.f32.mrb[112].mxu1 }
 0x23b   : > { %3797 = vst.msk [vmem:[%s6332_s20 + $0x1bc] sm:$0xf] %vm3685_vm0, %v4996_v19  ;;  %3925 = vst.msk [vmem:[%s6332_s20 + $0x3bc] sm:$0xf] %vm3685_vm0, %v5124_v20  ;;  %v1839_v25 = vadd.f32 %v6938_v55, %v5410_v23  ;;  %v2351_v26 = vadd.f32 %v6938_v55, %v5538_v24  ;;  %v1830_v27 = vpop.f32.mrb[113].mxu0  ;;  %v2342_v28 = vpop.f32.mrb[113].mxu1 }
 0x23c   : > { %3795 = vst.msk [vmem:[%s6332_s20 + $0x1b4] sm:$0xf] %vm3685_vm0, %v4994_v21  ;;  %3923 = vst.msk [vmem:[%s6332_s20 + $0x3b4] sm:$0xf] %vm3685_vm0, %v5122_v22  ;;  %v1831_v29 = vadd.f32 %v6938_v55, %v1830_v27  ;;  %v2343_v30 = vadd.f32 %v6938_v55, %v2342_v28  ;;  %v5411_v31 = vpop.f32.mrb[114].mxu0  ;;  %v5539_v32 = vpop.f32.mrb[114].mxu1 }
 0x23d   : > { %v2519_v33 = vmax.f32 %v1839_v25, 0.0  ;;  %v2647_v34 = vmax.f32 %v2351_v26, 0.0  ;;  %v1842_v35 = vadd.f32 %v6938_v55, %v5411_v31  ;;  %v2354_v36 = vadd.f32 %v6938_v55, %v5539_v32  ;;  %v1833_v37 = vpop.f32.mrb[115].mxu0  ;;  %v2345_v38 = vpop.f32.mrb[115].mxu1 }
 0x23e   : > { %v2517_v39 = vmax.f32 %v1831_v29, 0.0  ;;  %v2645_v40 = vmax.f32 %v2343_v30, 0.0  ;;  %v1834_v41 = vadd.f32 %v6938_v55, %v1833_v37  ;;  %v2346_v42 = vadd.f32 %v6938_v55, %v2345_v38 }
 0x23f   : > { %v4999_v43 = vpack.c.bf16 %v2519_v33, %v2519_v33  ;;  %v5127_v44 = vpack.c.bf16 %v2647_v34, %v2647_v34  ;;  %v2520_v45 = vmax.f32 %v1842_v35, 0.0  ;;  %v2648_v46 = vmax.f32 %v2354_v36, 0.0 }
 0x240   : > { %v4997_v47 = vpack.c.bf16 %v2517_v39, %v2517_v39  ;;  %v5125_v48 = vpack.c.bf16 %v2645_v40, %v2645_v40  ;;  %v2518_v49 = vmax.f32 %v1834_v41, 0.0  ;;  %v2646_v50 = vmax.f32 %v2346_v42, 0.0 }
 0x241   : > { %3800 = vst.msk [vmem:[%s6332_s20 + $0x1c8] sm:$0xf] %vm3685_vm0, %v4999_v43  ;;  %3928 = vst.msk [vmem:[%s6332_s20 + $0x3c8] sm:$0xf] %vm3685_vm0, %v5127_v44  ;;  %v5000_v16 = vpack.c.bf16 %v2520_v45, %v2520_v45  ;;  %v5128_v51 = vpack.c.bf16 %v2648_v46, %v2648_v46 }
 0x242   : > { %3798 = vst.msk [vmem:[%s6332_s20 + $0x1c0] sm:$0xf] %vm3685_vm0, %v4997_v47  ;;  %3926 = vst.msk [vmem:[%s6332_s20 + $0x3c0] sm:$0xf] %vm3685_vm0, %v5125_v48  ;;  %v4998_v52 = vpack.c.bf16 %v2518_v49, %v2518_v49  ;;  %v5126_v53 = vpack.c.bf16 %v2646_v50, %v2646_v50  ;;  %v5414_v56 = vpop.f32.mrb[116].mxu0  ;;  %v5542_v57 = vpop.f32.mrb[116].mxu1 }
 0x243   : > { %3801 = vst.msk [vmem:[%s6332_s20 + $0x1cc] sm:$0xf] %vm3685_vm0, %v5000_v16  ;;  %3929 = vst.msk [vmem:[%s6332_s20 + $0x3cc] sm:$0xf] %vm3685_vm0, %v5128_v51  ;;  %v1855_v58 = vadd.f32 %v6938_v55, %v5414_v56  ;;  %v2367_v59 = vadd.f32 %v6938_v55, %v5542_v57  ;;  %v1846_v60 = vpop.f32.mrb[117].mxu0  ;;  %v2358_v61 = vpop.f32.mrb[117].mxu1 }
 0x244   : > { %3799 = vst.msk [vmem:[%s6332_s20 + $0x1c4] sm:$0xf] %vm3685_vm0, %v4998_v52  ;;  %3927 = vst.msk [vmem:[%s6332_s20 + $0x3c4] sm:$0xf] %vm3685_vm0, %v5126_v53  ;;  %v1847_v62 = vadd.f32 %v6938_v55, %v1846_v60  ;;  %v2359_v63 = vadd.f32 %v6938_v55, %v2358_v61  ;;  %v5415_v0 = vpop.f32.mrb[118].mxu0  ;;  %v5543_v1 = vpop.f32.mrb[118].mxu1 }
 0x245   : > { %v2523_v2 = vmax.f32 %v1855_v58, 0.0  ;;  %v2651_v3 = vmax.f32 %v2367_v59, 0.0  ;;  %v1858_v4 = vadd.f32 %v6938_v55, %v5415_v0  ;;  %v2370_v5 = vadd.f32 %v6938_v55, %v5543_v1  ;;  %v1849_v6 = vpop.f32.mrb[119].mxu0  ;;  %v2361_v7 = vpop.f32.mrb[119].mxu1 }
 0x246   : > { %v2521_v8 = vmax.f32 %v1847_v62, 0.0  ;;  %v2649_v9 = vmax.f32 %v2359_v63, 0.0  ;;  %v1850_v10 = vadd.f32 %v6938_v55, %v1849_v6  ;;  %v2362_v11 = vadd.f32 %v6938_v55, %v2361_v7 }
 0x247   : > { %v5003_v12 = vpack.c.bf16 %v2523_v2, %v2523_v2  ;;  %v5131_v54 = vpack.c.bf16 %v2651_v3, %v2651_v3  ;;  %v2524_v13 = vmax.f32 %v1858_v4, 0.0  ;;  %v2652_v14 = vmax.f32 %v2370_v5, 0.0 }
 0x248   : > { %v5001_v15 = vpack.c.bf16 %v2521_v8, %v2521_v8  ;;  %v5129_v17 = vpack.c.bf16 %v2649_v9, %v2649_v9  ;;  %v2522_v18 = vmax.f32 %v1850_v10, 0.0  ;;  %v2650_v19 = vmax.f32 %v2362_v11, 0.0 }
 0x249   : > { %3804 = vst.msk [vmem:[%s6332_s20 + $0x1d8] sm:$0xf] %vm3685_vm0, %v5003_v12  ;;  %3932 = vst.msk [vmem:[%s6332_s20 + $0x3d8] sm:$0xf] %vm3685_vm0, %v5131_v54  ;;  %v5004_v20 = vpack.c.bf16 %v2524_v13, %v2524_v13  ;;  %v5132_v21 = vpack.c.bf16 %v2652_v14, %v2652_v14 }
 0x24a   : > { %3802 = vst.msk [vmem:[%s6332_s20 + $0x1d0] sm:$0xf] %vm3685_vm0, %v5001_v15  ;;  %3930 = vst.msk [vmem:[%s6332_s20 + $0x3d0] sm:$0xf] %vm3685_vm0, %v5129_v17  ;;  %v5002_v22 = vpack.c.bf16 %v2522_v18, %v2522_v18  ;;  %v5130_v23 = vpack.c.bf16 %v2650_v19, %v2650_v19  ;;  %v5418_v24 = vpop.f32.mrb[120].mxu0  ;;  %v5546_v25 = vpop.f32.mrb[120].mxu1 }
 0x24b   : > { %3805 = vst.msk [vmem:[%s6332_s20 + $0x1dc] sm:$0xf] %vm3685_vm0, %v5004_v20  ;;  %3933 = vst.msk [vmem:[%s6332_s20 + $0x3dc] sm:$0xf] %vm3685_vm0, %v5132_v21  ;;  %v1871_v26 = vadd.f32 %v6938_v55, %v5418_v24  ;;  %v2383_v27 = vadd.f32 %v6938_v55, %v5546_v25  ;;  %v1862_v28 = vpop.f32.mrb[121].mxu0  ;;  %v2374_v29 = vpop.f32.mrb[121].mxu1 }
 0x24c   : > { %3803 = vst.msk [vmem:[%s6332_s20 + $0x1d4] sm:$0xf] %vm3685_vm0, %v5002_v22  ;;  %3931 = vst.msk [vmem:[%s6332_s20 + $0x3d4] sm:$0xf] %vm3685_vm0, %v5130_v23  ;;  %v1863_v30 = vadd.f32 %v6938_v55, %v1862_v28  ;;  %v2375_v31 = vadd.f32 %v6938_v55, %v2374_v29  ;;  %v5419_v32 = vpop.f32.mrb[122].mxu0  ;;  %v5547_v33 = vpop.f32.mrb[122].mxu1 }
 0x24d   : > { %v2527_v34 = vmax.f32 %v1871_v26, 0.0  ;;  %v2655_v35 = vmax.f32 %v2383_v27, 0.0  ;;  %v1874_v36 = vadd.f32 %v6938_v55, %v5419_v32  ;;  %v2386_v37 = vadd.f32 %v6938_v55, %v5547_v33  ;;  %v1865_v38 = vpop.f32.mrb[123].mxu0  ;;  %v2377_v39 = vpop.f32.mrb[123].mxu1 }
 0x24e   : > { %v2525_v40 = vmax.f32 %v1863_v30, 0.0  ;;  %v2653_v41 = vmax.f32 %v2375_v31, 0.0  ;;  %v1866_v42 = vadd.f32 %v6938_v55, %v1865_v38  ;;  %v2378_v43 = vadd.f32 %v6938_v55, %v2377_v39 }
 0x24f   : > { %v5007_v44 = vpack.c.bf16 %v2527_v34, %v2527_v34  ;;  %v5135_v45 = vpack.c.bf16 %v2655_v35, %v2655_v35  ;;  %v2528_v46 = vmax.f32 %v1874_v36, 0.0  ;;  %v2656_v47 = vmax.f32 %v2386_v37, 0.0 }
 0x250   : > { %v5005_v48 = vpack.c.bf16 %v2525_v40, %v2525_v40  ;;  %v5133_v49 = vpack.c.bf16 %v2653_v41, %v2653_v41  ;;  %v2526_v50 = vmax.f32 %v1866_v42, 0.0  ;;  %v2654_v16 = vmax.f32 %v2378_v43, 0.0 }
 0x251   : > { %3808 = vst.msk [vmem:[%s6332_s20 + $0x1e8] sm:$0xf] %vm3685_vm0, %v5007_v44  ;;  %3936 = vst.msk [vmem:[%s6332_s20 + $0x3e8] sm:$0xf] %vm3685_vm0, %v5135_v45  ;;  %v5008_v51 = vpack.c.bf16 %v2528_v46, %v2528_v46  ;;  %v5136_v52 = vpack.c.bf16 %v2656_v47, %v2656_v47 }
 0x252   : > { %3806 = vst.msk [vmem:[%s6332_s20 + $0x1e0] sm:$0xf] %vm3685_vm0, %v5005_v48  ;;  %3934 = vst.msk [vmem:[%s6332_s20 + $0x3e0] sm:$0xf] %vm3685_vm0, %v5133_v49  ;;  %v5006_v53 = vpack.c.bf16 %v2526_v50, %v2526_v50  ;;  %v5134_v56 = vpack.c.bf16 %v2654_v16, %v2654_v16  ;;  %v5422_v57 = vpop.f32.mrb[124].mxu0  ;;  %v5550_v58 = vpop.f32.mrb[124].mxu1 }
 0x253   : > { %3809 = vst.msk [vmem:[%s6332_s20 + $0x1ec] sm:$0xf] %vm3685_vm0, %v5008_v51  ;;  %3937 = vst.msk [vmem:[%s6332_s20 + $0x3ec] sm:$0xf] %vm3685_vm0, %v5136_v52  ;;  %v1887_v59 = vadd.f32 %v6938_v55, %v5422_v57  ;;  %v2399_v60 = vadd.f32 %v6938_v55, %v5550_v58  ;;  %v1878_v61 = vpop.f32.mrb[125].mxu0  ;;  %v2390_v62 = vpop.f32.mrb[125].mxu1 }
 0x254   : > { %3807 = vst.msk [vmem:[%s6332_s20 + $0x1e4] sm:$0xf] %vm3685_vm0, %v5006_v53  ;;  %3935 = vst.msk [vmem:[%s6332_s20 + $0x3e4] sm:$0xf] %vm3685_vm0, %v5134_v56  ;;  %v1879_v63 = vadd.f32 %v6938_v55, %v1878_v61  ;;  %v2391_v0 = vadd.f32 %v6938_v55, %v2390_v62  ;;  %v5423_v1 = vpop.f32.mrb[126].mxu0  ;;  %v5551_v2 = vpop.f32.mrb[126].mxu1 }
 0x255   : > { %v2531_v3 = vmax.f32 %v1887_v59, 0.0  ;;  %v2659_v4 = vmax.f32 %v2399_v60, 0.0  ;;  %v1890_v5 = vadd.f32 %v6938_v55, %v5423_v1  ;;  %v2402_v6 = vadd.f32 %v6938_v55, %v5551_v2  ;;  %v1881_v7 = vpop.f32.mrb[127].mxu0  ;;  %v2393_v8 = vpop.f32.mrb[127].mxu1 }
 0x256   : > { %v2529_v9 = vmax.f32 %v1879_v63, 0.0  ;;  %v2657_v10 = vmax.f32 %v2391_v0, 0.0  ;;  %v1882_v11 = vadd.f32 %v6938_v55, %v1881_v7  ;;  %v2394_v12 = vadd.f32 %v6938_v55, %v2393_v8  ;;  %3948 = sbr.rel (!%p7337_p6) target bundleno = 696 (0x2b8), region = 44 }
 0x257   : > { %v5011_v54 = vpack.c.bf16 %v2531_v3, %v2531_v3  ;;  %v5139_v13 = vpack.c.bf16 %v2659_v4, %v2659_v4  ;;  %v2532_v14 = vmax.f32 %v1890_v5, 0.0  ;;  %v2660_v15 = vmax.f32 %v2402_v6, 0.0 }
 0x258   : > { %v5009_v17 = vpack.c.bf16 %v2529_v9, %v2529_v9  ;;  %v5137_v18 = vpack.c.bf16 %v2657_v10, %v2657_v10  ;;  %v2530_v19 = vmax.f32 %v1882_v11, 0.0  ;;  %v2658_v20 = vmax.f32 %v2394_v12, 0.0 }
 0x259   : > { %3812 = vst.msk [vmem:[%s6332_s20 + $0x1f8] sm:$0xf] %vm3685_vm0, %v5011_v54  ;;  %3940 = vst.msk [vmem:[%s6332_s20 + $0x3f8] sm:$0xf] %vm3685_vm0, %v5139_v13  ;;  %v5012_v21 = vpack.c.bf16 %v2532_v14, %v2532_v14  ;;  %v5140_v22 = vpack.c.bf16 %v2660_v15, %v2660_v15 }
 0x25a   : > { %3810 = vst.msk [vmem:[%s6332_s20 + $0x1f0] sm:$0xf] %vm3685_vm0, %v5009_v17  ;;  %3938 = vst.msk [vmem:[%s6332_s20 + $0x3f0] sm:$0xf] %vm3685_vm0, %v5137_v18  ;;  %v5010_v55 = vpack.c.bf16 %v2530_v19, %v2530_v19  ;;  %v5138_v23 = vpack.c.bf16 %v2658_v20, %v2658_v20 }
 0x25b   : > { %3813 = vst.msk [vmem:[%s6332_s20 + $0x1fc] sm:$0xf] %vm3685_vm0, %v5012_v21  ;;  %3941 = vst.msk [vmem:[%s6332_s20 + $0x3fc] sm:$0xf] %vm3685_vm0, %v5140_v22 }
 0x25c   : > { %3811 = vst.msk [vmem:[%s6332_s20 + $0x1f4] sm:$0xf] %vm3685_vm0, %v5010_v55  ;;  %3939 = vst.msk [vmem:[%s6332_s20 + $0x3f4] sm:$0xf] %vm3685_vm0, %v5138_v23 }
 0x25d   : > { %s7351_s27 = smov (!%p3951_p7, %s3950_s27), 256 }
 0x25e   : > { %s4869_s24 = sshll.u32 %s7351_s27, 6 }
 0x25f   : > { %p4872_p9 = scmp.eq.s32.totalorder %s4869_s24, 0 }
 0x260   : > { %s7125_s26 = sshrl.u32 (!%p4872_p9), %s7351_s27, 6 }
 0x261   : > { %3960 = sbr.rel (%p4872_p9) target bundleno = 696 (0x2b8), region = 48  ;;  %p4873_p11 = scmp.le.s32.totalorder (!%p4872_p9), %s7125_s26, 0 }
 0x268   : > { %4384 = sbr.rel (%p4873_p11) target bundleno = 675 (0x2a3), region = 130  ;;  %s7338_s15 = smov (!%p4873_p11), %s7119_s10 }
 0x269   : > { %s7339_s11 = smov (!%p4873_p11), %s6332_s20  ;;  %s7134_s23 = smov (!%p4873_p11), 0  }
 0x26a   : > { %s7136_s28 = smov (!%p4873_p11), 0  }
 0x26f LB: >> { %v3976_v24 = vld [vmem:[%s5982_s11] sm:$0xf]  ;;  %v3978_v25 = vld [vmem:[%s5982_s11 + $0x4] sm:$0xf]  ;;  %v3980_v26 = vld [vmem:[%s5982_s11 + $0x8] sm:$0xf]  ;;  %s5990_s28 = sphi %s7136_s28, %s3970_s28   ;;  %s5986_s23 = sphi %s7134_s23, %s7340_s23   ;;  %s5982_s11 = sphi %s7339_s11, %s4109_s11   ;;  %s5978_s15 = sphi %s7338_s15, %s4110_s15  }
 0x270   : >> { %3977 = vst [vmem:[%s5978_s15] sm:$0xf] %v3976_v24  ;;  %3979 = vst [vmem:[%s5978_s15 + $0x4] sm:$0xf] %v3978_v25  ;;  %v3982_v27 = vld [vmem:[%s5982_s11 + $0xc] sm:$0xf]  ;;  %s4104_s4 = sadd.s32 1, %s5986_s23 }
 0x271   : >> { %3981 = vst [vmem:[%s5978_s15 + $0x8] sm:$0xf] %v3980_v26  ;;  %v3984_v28 = vld [vmem:[%s5982_s11 + $0x10] sm:$0xf]  ;;  %v3986_v29 = vld [vmem:[%s5982_s11 + $0x14] sm:$0xf]  ;;  %p4105_p13 = scmp.ge.s32.totalorder %s4104_s4, %s7125_s26 }
 0x272   : >> { %3983 = vst [vmem:[%s5978_s15 + $0xc] sm:$0xf] %v3982_v27  ;;  %3985 = vst [vmem:[%s5978_s15 + $0x10] sm:$0xf] %v3984_v28  ;;  %v3988_v30 = vld [vmem:[%s5982_s11 + $0x18] sm:$0xf] }
 0x273   : >> { %3987 = vst [vmem:[%s5978_s15 + $0x14] sm:$0xf] %v3986_v29  ;;  %v3990_v31 = vld [vmem:[%s5982_s11 + $0x1c] sm:$0xf]  ;;  %v3992_v32 = vld [vmem:[%s5982_s11 + $0x20] sm:$0xf] }
 0x274   : >> { %3989 = vst [vmem:[%s5978_s15 + $0x18] sm:$0xf] %v3988_v30  ;;  %3991 = vst [vmem:[%s5978_s15 + $0x1c] sm:$0xf] %v3990_v31  ;;  %v3994_v33 = vld [vmem:[%s5982_s11 + $0x24] sm:$0xf] }
 0x275   : >> { %3993 = vst [vmem:[%s5978_s15 + $0x20] sm:$0xf] %v3992_v32  ;;  %v3996_v34 = vld [vmem:[%s5982_s11 + $0x28] sm:$0xf]  ;;  %v3998_v35 = vld [vmem:[%s5982_s11 + $0x2c] sm:$0xf] }
 0x276   : >> { %3995 = vst [vmem:[%s5978_s15 + $0x24] sm:$0xf] %v3994_v33  ;;  %3997 = vst [vmem:[%s5978_s15 + $0x28] sm:$0xf] %v3996_v34  ;;  %v4000_v36 = vld [vmem:[%s5982_s11 + $0x30] sm:$0xf] }
 0x277   : >> { %3999 = vst [vmem:[%s5978_s15 + $0x2c] sm:$0xf] %v3998_v35  ;;  %v4002_v37 = vld [vmem:[%s5982_s11 + $0x34] sm:$0xf]  ;;  %v4004_v38 = vld [vmem:[%s5982_s11 + $0x38] sm:$0xf] }
 0x278   : >> { %4001 = vst [vmem:[%s5978_s15 + $0x30] sm:$0xf] %v4000_v36  ;;  %4003 = vst [vmem:[%s5978_s15 + $0x34] sm:$0xf] %v4002_v37  ;;  %v4006_v39 = vld [vmem:[%s5982_s11 + $0x3c] sm:$0xf] }
 0x279   : >> { %4005 = vst [vmem:[%s5978_s15 + $0x38] sm:$0xf] %v4004_v38  ;;  %v4008_v40 = vld [vmem:[%s5982_s11 + $0x40] sm:$0xf]  ;;  %v4010_v41 = vld [vmem:[%s5982_s11 + $0x44] sm:$0xf] }
 0x27a   : >> { %4007 = vst [vmem:[%s5978_s15 + $0x3c] sm:$0xf] %v4006_v39  ;;  %4009 = vst [vmem:[%s5978_s15 + $0x40] sm:$0xf] %v4008_v40  ;;  %v4012_v42 = vld [vmem:[%s5982_s11 + $0x48] sm:$0xf] }
 0x27b   : >> { %4011 = vst [vmem:[%s5978_s15 + $0x44] sm:$0xf] %v4010_v41  ;;  %v4014_v43 = vld [vmem:[%s5982_s11 + $0x4c] sm:$0xf]  ;;  %v4016_v44 = vld [vmem:[%s5982_s11 + $0x50] sm:$0xf] }
 0x27c   : >> { %4013 = vst [vmem:[%s5978_s15 + $0x48] sm:$0xf] %v4012_v42  ;;  %4015 = vst [vmem:[%s5978_s15 + $0x4c] sm:$0xf] %v4014_v43  ;;  %v4018_v45 = vld [vmem:[%s5982_s11 + $0x54] sm:$0xf] }
 0x27d   : >> { %4017 = vst [vmem:[%s5978_s15 + $0x50] sm:$0xf] %v4016_v44  ;;  %v4020_v46 = vld [vmem:[%s5982_s11 + $0x58] sm:$0xf]  ;;  %v4022_v47 = vld [vmem:[%s5982_s11 + $0x5c] sm:$0xf] }
 0x27e   : >> { %4019 = vst [vmem:[%s5978_s15 + $0x54] sm:$0xf] %v4018_v45  ;;  %4021 = vst [vmem:[%s5978_s15 + $0x58] sm:$0xf] %v4020_v46  ;;  %v4024_v48 = vld [vmem:[%s5982_s11 + $0x60] sm:$0xf] }
 0x27f   : >> { %4023 = vst [vmem:[%s5978_s15 + $0x5c] sm:$0xf] %v4022_v47  ;;  %v4026_v49 = vld [vmem:[%s5982_s11 + $0x64] sm:$0xf]  ;;  %v4028_v50 = vld [vmem:[%s5982_s11 + $0x68] sm:$0xf] }
 0x280   : >> { %4025 = vst [vmem:[%s5978_s15 + $0x60] sm:$0xf] %v4024_v48  ;;  %4027 = vst [vmem:[%s5978_s15 + $0x64] sm:$0xf] %v4026_v49  ;;  %v4030_v16 = vld [vmem:[%s5982_s11 + $0x6c] sm:$0xf] }
 0x281   : >> { %4029 = vst [vmem:[%s5978_s15 + $0x68] sm:$0xf] %v4028_v50  ;;  %v4032_v51 = vld [vmem:[%s5982_s11 + $0x70] sm:$0xf]  ;;  %v4034_v52 = vld [vmem:[%s5982_s11 + $0x74] sm:$0xf] }
 0x282   : >> { %4031 = vst [vmem:[%s5978_s15 + $0x6c] sm:$0xf] %v4030_v16  ;;  %4033 = vst [vmem:[%s5978_s15 + $0x70] sm:$0xf] %v4032_v51  ;;  %v4036_v53 = vld [vmem:[%s5982_s11 + $0x78] sm:$0xf] }
 0x283   : >> { %4035 = vst [vmem:[%s5978_s15 + $0x74] sm:$0xf] %v4034_v52  ;;  %v4038_v56 = vld [vmem:[%s5982_s11 + $0x7c] sm:$0xf]  ;;  %v4040_v57 = vld [vmem:[%s5982_s11 + $0x80] sm:$0xf] }
 0x284   : >> { %4037 = vst [vmem:[%s5978_s15 + $0x78] sm:$0xf] %v4036_v53  ;;  %4039 = vst [vmem:[%s5978_s15 + $0x7c] sm:$0xf] %v4038_v56  ;;  %v4042_v58 = vld [vmem:[%s5982_s11 + $0x84] sm:$0xf] }
 0x285   : >> { %4041 = vst [vmem:[%s5978_s15 + $0x80] sm:$0xf] %v4040_v57  ;;  %v4044_v59 = vld [vmem:[%s5982_s11 + $0x88] sm:$0xf]  ;;  %v4046_v60 = vld [vmem:[%s5982_s11 + $0x8c] sm:$0xf] }
 0x286   : >> { %4043 = vst [vmem:[%s5978_s15 + $0x84] sm:$0xf] %v4042_v58  ;;  %4045 = vst [vmem:[%s5978_s15 + $0x88] sm:$0xf] %v4044_v59  ;;  %v4048_v61 = vld [vmem:[%s5982_s11 + $0x90] sm:$0xf] }
 0x287   : >> { %4047 = vst [vmem:[%s5978_s15 + $0x8c] sm:$0xf] %v4046_v60  ;;  %v4050_v62 = vld [vmem:[%s5982_s11 + $0x94] sm:$0xf]  ;;  %v4052_v63 = vld [vmem:[%s5982_s11 + $0x98] sm:$0xf] }
 0x288   : >> { %4049 = vst [vmem:[%s5978_s15 + $0x90] sm:$0xf] %v4048_v61  ;;  %4051 = vst [vmem:[%s5978_s15 + $0x94] sm:$0xf] %v4050_v62  ;;  %v4054_v0 = vld [vmem:[%s5982_s11 + $0x9c] sm:$0xf] }
 0x289   : >> { %4053 = vst [vmem:[%s5978_s15 + $0x98] sm:$0xf] %v4052_v63  ;;  %v4056_v1 = vld [vmem:[%s5982_s11 + $0xa0] sm:$0xf]  ;;  %v4058_v2 = vld [vmem:[%s5982_s11 + $0xa4] sm:$0xf] }
 0x28a   : >> { %4055 = vst [vmem:[%s5978_s15 + $0x9c] sm:$0xf] %v4054_v0  ;;  %4057 = vst [vmem:[%s5978_s15 + $0xa0] sm:$0xf] %v4056_v1  ;;  %v4060_v3 = vld [vmem:[%s5982_s11 + $0xa8] sm:$0xf] }
 0x28b   : >> { %4059 = vst [vmem:[%s5978_s15 + $0xa4] sm:$0xf] %v4058_v2  ;;  %v4062_v4 = vld [vmem:[%s5982_s11 + $0xac] sm:$0xf]  ;;  %v4064_v5 = vld [vmem:[%s5982_s11 + $0xb0] sm:$0xf] }
 0x28c   : >> { %4061 = vst [vmem:[%s5978_s15 + $0xa8] sm:$0xf] %v4060_v3  ;;  %4063 = vst [vmem:[%s5978_s15 + $0xac] sm:$0xf] %v4062_v4  ;;  %v4066_v6 = vld [vmem:[%s5982_s11 + $0xb4] sm:$0xf] }
 0x28d   : >> { %4065 = vst [vmem:[%s5978_s15 + $0xb0] sm:$0xf] %v4064_v5  ;;  %v4068_v7 = vld [vmem:[%s5982_s11 + $0xb8] sm:$0xf]  ;;  %v4070_v8 = vld [vmem:[%s5982_s11 + $0xbc] sm:$0xf] }
 0x28e   : >> { %4067 = vst [vmem:[%s5978_s15 + $0xb4] sm:$0xf] %v4066_v6  ;;  %4069 = vst [vmem:[%s5978_s15 + $0xb8] sm:$0xf] %v4068_v7  ;;  %v4072_v9 = vld [vmem:[%s5982_s11 + $0xc0] sm:$0xf] }
 0x28f   : >> { %4071 = vst [vmem:[%s5978_s15 + $0xbc] sm:$0xf] %v4070_v8  ;;  %v4074_v10 = vld [vmem:[%s5982_s11 + $0xc4] sm:$0xf]  ;;  %v4076_v11 = vld [vmem:[%s5982_s11 + $0xc8] sm:$0xf] }
 0x290   : >> { %4073 = vst [vmem:[%s5978_s15 + $0xc0] sm:$0xf] %v4072_v9  ;;  %4075 = vst [vmem:[%s5978_s15 + $0xc4] sm:$0xf] %v4074_v10  ;;  %v4078_v12 = vld [vmem:[%s5982_s11 + $0xcc] sm:$0xf] }
 0x291   : >> { %4077 = vst [vmem:[%s5978_s15 + $0xc8] sm:$0xf] %v4076_v11  ;;  %v4080_v54 = vld [vmem:[%s5982_s11 + $0xd0] sm:$0xf]  ;;  %v4082_v13 = vld [vmem:[%s5982_s11 + $0xd4] sm:$0xf] }
 0x292   : >> { %4079 = vst [vmem:[%s5978_s15 + $0xcc] sm:$0xf] %v4078_v12  ;;  %4081 = vst [vmem:[%s5978_s15 + $0xd0] sm:$0xf] %v4080_v54  ;;  %v4084_v14 = vld [vmem:[%s5982_s11 + $0xd8] sm:$0xf] }
 0x293   : >> { %4083 = vst [vmem:[%s5978_s15 + $0xd4] sm:$0xf] %v4082_v13  ;;  %v4086_v15 = vld [vmem:[%s5982_s11 + $0xdc] sm:$0xf]  ;;  %v4088_v17 = vld [vmem:[%s5982_s11 + $0xe0] sm:$0xf] }
 0x294   : >> { %4085 = vst [vmem:[%s5978_s15 + $0xd8] sm:$0xf] %v4084_v14  ;;  %4087 = vst [vmem:[%s5978_s15 + $0xdc] sm:$0xf] %v4086_v15  ;;  %v4090_v18 = vld [vmem:[%s5982_s11 + $0xe4] sm:$0xf] }
 0x295   : >> { %4089 = vst [vmem:[%s5978_s15 + $0xe0] sm:$0xf] %v4088_v17  ;;  %v4092_v19 = vld [vmem:[%s5982_s11 + $0xe8] sm:$0xf]  ;;  %v4094_v20 = vld [vmem:[%s5982_s11 + $0xec] sm:$0xf] }
 0x296   : >> { %4091 = vst [vmem:[%s5978_s15 + $0xe4] sm:$0xf] %v4090_v18  ;;  %4093 = vst [vmem:[%s5978_s15 + $0xe8] sm:$0xf] %v4092_v19  ;;  %v4096_v21 = vld [vmem:[%s5982_s11 + $0xf0] sm:$0xf] }
 0x297   : >> { %4095 = vst [vmem:[%s5978_s15 + $0xec] sm:$0xf] %v4094_v20  ;;  %v4098_v22 = vld [vmem:[%s5982_s11 + $0xf4] sm:$0xf]  ;;  %v4100_v55 = vld [vmem:[%s5982_s11 + $0xf8] sm:$0xf] }
 0x298   : >> { %4097 = vst [vmem:[%s5978_s15 + $0xf0] sm:$0xf] %v4096_v21  ;;  %4099 = vst [vmem:[%s5978_s15 + $0xf4] sm:$0xf] %v4098_v22  ;;  %v4102_v23 = vld [vmem:[%s5982_s11 + $0xfc] sm:$0xf] }
 0x299   : >> { %4101 = vst [vmem:[%s5978_s15 + $0xf8] sm:$0xf] %v4100_v55  ;;  %4103 = vst [vmem:[%s5978_s15 + $0xfc] sm:$0xf] %v4102_v23  ;;  %s7353_s4 = smov (%p4105_p13, %s4104_s4), 0  ;;  %s3970_s28 = sadd.s32 1, %s5990_s28  }
 0x29a   : >> { %s4874_s5 = sshll.u32 %s7353_s4, 8  ;;  %p3969_p1 = scmp.ge.s32.totalorder %s3970_s28, %s7125_s26 }
 0x29b   : >> { %s4109_s11 = scalar_lea.vmem %s6332_s20, %s4874_s5 [#allocation6]   ;;  %s4110_s15 = scalar_lea.vmem %s7119_s10, %s4874_s5  }
 0x29c   : >> { %s7340_s23 = smov %s7353_s4  ;;  %3972 = sbr.rel (!%p3969_p1) target bundleno = 623 (0x26f), region = 136 }
 0x2a3 PF: > { %s7293_s30 = sand.u32 63, %s7351_s27   ;;  %s5142_s29 = sshll.u32 %s7125_s26, 8 }
 0x2a4   : > { %s4115_s21 = scalar_lea.vmem %s6332_s20, %s5142_s29 [#allocation6]   ;;  %s4117_s8 = scalar_lea.vmem %s7119_s10, %s5142_s29  }
 0x2a5   : > { %p4879_p4 = scmp.le.s32.totalorder %s7293_s30, 0 }
 0x2a6   : > { %s5992_s9 = smov (!%p4879_p4), %s4117_s8   ;;  %s5996_s12 = smov (!%p4879_p4), %s4115_s21  }
 0x2a7   : > { %4398 = sbr.rel (%p4879_p4) target bundleno = 696 (0x2b8), region = 141  ;;  %s6000_s18 = smov (!%p4879_p4), 0  }
 0x2a8   : > { %s6004_s22 = smov (!%p4879_p4), 0  }
 0x2ae LB: >> { %v4127_v24 = vld [vmem:[%s5998_s12] sm:$0xf]  ;;  %s4129_s27 = sadd.s32 1, %s6002_s18  ;;  %s4121_s22 = sadd.s32 1, %s6006_s22   ;;  %s6006_s22 = sphi %s6004_s22, %s4121_s22   ;;  %s6002_s18 = sphi %s6000_s18, %s6001_s18   ;;  %s5998_s12 = sphi %s5996_s12, %s4134_s12   ;;  %s5994_s9 = sphi %s5992_s9, %s4135_s9  }
 0x2af   : >> { %4128 = vst [vmem:[%s5994_s9] sm:$0xf] %v4127_v24  ;;  %p4130_p5 = scmp.ge.s32.totalorder %s4129_s27, %s7293_s30  ;;  %p4120_p8 = scmp.ge.s32.totalorder %s4121_s22, %s7293_s30 }
 0x2b1   : >> { %s7355_s27 = smov (%p4130_p5, %s4129_s27), 0  ;;  %4123 = sbr.rel (!%p4120_p8) target bundleno = 686 (0x2ae), region = 147 }
 0x2b2   : >> { %s4880_s20 = sshll.u32 %s7355_s27, 2  ;;  %s6001_s18 = smov %s7355_s27  }
 0x2b3   : >> { %s4134_s12 = scalar_lea.vmem %s4115_s21, %s4880_s20 [#allocation6]   ;;  %s4135_s9 = scalar_lea.vmem %s4117_s8, %s4880_s20  }
 0x2b8 PF: > { %s17_s17 = sadd.s32 1, %s5974_s17   ;;  %s7341_s12 = smov %s5958_s13 }
 0x2b9   : > { %p14_p10 = scmp.ge.s32.totalorder %s17_s17, 27   ;;  %s7342_s13 = smov %s5962_s14 }
 0x2ba   : > { %s7343_s14 = smov %s6087_s25  ;;  %s7344_s15 = smov %s5970_s16 }
 0x2bb   : > { %s7345_s16 = smov %s7347_s19  ;;  %16 = sbr.rel (!%p14_p10) target bundleno = 5 (0x5), region = 158 }
 0x2c2   :  { %4322 = vsyncpa [#allocation3], 1 }
 0x2c3   :  { %4324 = vsyncpa [#allocation3 + $0x1], 1 }
 0x2c4   :  { %4325 = vsyncpa [#allocation5], 1 }

</bundles_post_ra>
